<compile_context>
chip_gen: v5e
topology: v5e:2x2
jax: 0.10.0
libtpu: 0.0.40
codegen_flags: <defaults>
</compile_context>

<pallas_src>
import jax
import jax.numpy as jnp
from jax import lax
from jax.experimental import pallas as pl
from jax.experimental.pallas import tpu as pltpu


def _round_up(x, m):
    return (x + m - 1) // m * m


# ----------------------------------------------------------------------------
# Host-side weight packing: PyTorch (4H, In) gate-stacked weights ->
# transposed, lane-aligned (rows_pad, 4*Hp) with gate k's H real columns at
# lane offset k*Hp (gate order i, f, g, o). Padded rows/cols are zero.
# ----------------------------------------------------------------------------
def _pack_gate_cols(w, H, Hp, rows_pad):
    wt = jnp.transpose(w).astype(jnp.float32)          # (In, 4H)
    In = wt.shape[0]
    out = jnp.zeros((rows_pad, 4 * Hp), jnp.float32)
    for k in range(4):
        out = out.at[:In, k * Hp:k * Hp + H].set(wt[:, k * H:(k + 1) * H])
    return out


def _pack_gate_bias(b, H, Hp):
    b = b.astype(jnp.float32)
    out = jnp.zeros((1, 4 * Hp), jnp.float32)
    for k in range(4):
        out = out.at[0, k * Hp:k * Hp + H].set(b[k * H:(k + 1) * H])
    return out


# ----------------------------------------------------------------------------
# Fused kernel: all LSTM layers for one batch tile.
#   x_ref   : (S, bt, F)       layer-0 input sequence (feature-padded)
#   wih_ref : (L, F, 4Hp)      input->gates weights (pre-transposed, aligned)
#   whh_ref : (L, Hp, 4Hp)     hidden->gates weights
#   b_ref   : (L, 1, 4Hp)      b_ih + b_hh
#   out_ref : (bt, Hp)         last-timestep hidden of last layer
#   seq_ref : (S, bt, Hp)      VMEM scratch: inter-layer hidden sequence
#   gx_ref  : (S, bt, 4Hp)     VMEM scratch: hoisted x@W_ih + b gates
# ----------------------------------------------------------------------------
def fused_lstm_kernel(x_ref, wih_ref, whh_ref, b_ref, out_ref, seq_ref, gx_ref):
    S, bt, F = x_ref.shape
    L, Hp, _ = whh_ref.shape
    unroll = True if S <= 16 else 4

    for l in range(L):                                   # static layer loop
        w_hh = whh_ref[l]                                # (Hp, 4Hp)
        bias = b_ref[l]                                  # (1, 4Hp)

        if l == 0:
            xin = x_ref[...].reshape(S * bt, F)          # (S*bt, F)
            w_ih = wih_ref[l]                            # (F, 4Hp)
        else:
            xin = seq_ref[...].reshape(S * bt, Hp)
            w_ih = wih_ref[l] if F == Hp else wih_ref[l][:Hp, :]

        # Hoisted input-to-gates matmul: one large MXU call per layer.
        gx_ref[...] = (jnp.dot(xin, w_ih, preferred_element_type=jnp.float32)
                       + bias).reshape(S, bt, 4 * Hp)

        last_layer = (l == L - 1)

        def step(t, carry):
            h, c = carry
            gates = gx_ref[t] + jnp.dot(h, w_hh,
                                        preferred_element_type=jnp.float32)
            # Gate blocks are 128-lane aligned -> whole-vreg slices.
            i_g = jax.nn.sigmoid(gates[:, 0 * Hp:1 * Hp])
            f_g = jax.nn.sigmoid(gates[:, 1 * Hp:2 * Hp])
            g_g = jnp.tanh(gates[:, 2 * Hp:3 * Hp])
            o_g = jax.nn.sigmoid(gates[:, 3 * Hp:4 * Hp])
            c_new = f_g * c + i_g * g_g
            h_new = o_g * jnp.tanh(c_new)
            if not last_layer:                           # only needed as next input
                seq_ref[t] = h_new
            return (h_new, c_new)

        h0 = jnp.zeros((bt, Hp), jnp.float32)
        c0 = jnp.zeros((bt, Hp), jnp.float32)
        h_last, _ = lax.fori_loop(0, S, step, (h0, c0), unroll=unroll)

        if last_layer:
            out_ref[...] = h_last


# ----------------------------------------------------------------------------
# LSTMBlock forward: one fused pallas_call for all layers.
# x_ncl: (batch, channels, timesteps); params: list of (w_ih, w_hh, b_ih, b_hh)
# in PyTorch shapes: (4H, In), (4H, H), (4H,), (4H,). Returns (batch, hidden).
# ----------------------------------------------------------------------------
def lstm_block_forward(x_ncl, params):
    B, C, T = x_ncl.shape
    S, L = C, len(params)
    H = params[0][1].shape[1]
    Hp = _round_up(H, 128)                   # lane-aligned hidden
    F = max(_round_up(T, 128), Hp)           # common (padded) input feature dim
    Bp = _round_up(B, 8)                     # sublane-aligned batch

    # (B, C, T) -> (S, B, T) -> zero-pad to (S, Bp, F)
    x_sbt = jnp.transpose(x_ncl.astype(jnp.float32), (1, 0, 2))
    x_pad = jnp.zeros((S, Bp, F), jnp.float32).at[:, :B, :T].set(x_sbt)

    wih_all = jnp.stack([_pack_gate_cols(w_ih, H, Hp, F)
                         for (w_ih, _, _, _) in params])          # (L, F, 4Hp)
    whh_all = jnp.stack([_pack_gate_cols(w_hh, H, Hp, Hp)
                         for (_, w_hh, _, _) in params])          # (L, Hp, 4Hp)
    b_all = jnp.stack([_pack_gate_bias(b_ih + b_hh, H, Hp)
                       for (_, _, b_ih, b_hh) in params])         # (L, 1, 4Hp)

    # Batch tiling: single tile for small batches, split for large ones
    # (lets v7x's two TensorCores each take half the batch).
    bt = Bp
    for cand in (64, 32, 16, 8):
        if Bp > cand and Bp % cand == 0:
            bt = cand
            break
    nb = Bp // bt

    out = pl.pallas_call(
        fused_lstm_kernel,
        out_shape=jax.ShapeDtypeStruct((Bp, Hp), jnp.float32),
        grid=(nb,),
        in_specs=[
            pl.BlockSpec((S, bt, F), lambda i: (0, i, 0)),
            pl.BlockSpec((L, F, 4 * Hp), lambda i: (0, 0, 0)),
            pl.BlockSpec((L, Hp, 4 * Hp), lambda i: (0, 0, 0)),
            pl.BlockSpec((L, 1, 4 * Hp), lambda i: (0, 0, 0)),
        ],
        out_specs=pl.BlockSpec((bt, Hp), lambda i: (i, 0)),
        scratch_shapes=[
            pltpu.VMEM((S, bt, Hp), jnp.float32),       # inter-layer hiddens
            pltpu.VMEM((S, bt, 4 * Hp), jnp.float32),   # hoisted gates_x
        ],
        compiler_params=pltpu.CompilerParams(
            dimension_semantics=("parallel",)),
    )(x_pad, wih_all, whh_all, b_all)

    return out[:B, :H]                                   # strip padding


lstm_block_forward_jit = jax.jit(lstm_block_forward)


# ----------------------------------------------------------------------------
# Pure-JAX reference (same math, lax.scan) for correctness checking.
# ----------------------------------------------------------------------------
def lstm_block_reference(x_ncl, params):
    h_seq = jnp.transpose(x_ncl.astype(jnp.float32), (1, 0, 2))  # (S, B, I)
    for (w_ih, w_hh, b_ih, b_hh) in params:
        H = w_hh.shape[1]
        B = h_seq.shape[1]
        b = (b_ih + b_hh)[None, :]

        def cell(carry, x_t):
            h, c = carry
            gates = x_t @ w_ih.T + h @ w_hh.T + b
            i_g = jax.nn.sigmoid(gates[:, 0 * H:1 * H])
            f_g = jax.nn.sigmoid(gates[:, 1 * H:2 * H])
            g_g = jnp.tanh(gates[:, 2 * H:3 * H])
            o_g = jax.nn.sigmoid(gates[:, 3 * H:4 * H])
            c_new = f_g * c + i_g * g_g
            h_new = o_g * jnp.tanh(c_new)
            return (h_new, c_new), h_new

        init = (jnp.zeros((B, H), jnp.float32), jnp.zeros((B, H), jnp.float32))
        _, h_seq = lax.scan(cell, init, h_seq)
    return h_seq[-1]


def init_params(key, timesteps, hidden_size, num_layers):
    """PyTorch-style init: U(-1/sqrt(H), 1/sqrt(H))."""
    params = []
    k = 1.0 / jnp.sqrt(jnp.float32(hidden_size))
    for i in range(num_layers):
        in_size = timesteps if i == 0 else hidden_size
        key, k1, k2, k3, k4 = jax.random.split(key, 5)
        w_ih = jax.random.uniform(k1, (4 * hidden_size, in_size), jnp.float32, -k, k)
        w_hh = jax.random.uniform(k2, (4 * hidden_size, hidden_size), jnp.float32, -k, k)
        b_ih = jax.random.uniform(k3, (4 * hidden_size,), jnp.float32, -k, k)
        b_hh = jax.random.uniform(k4, (4 * hidden_size,), jnp.float32, -k, k)
        params.append((w_ih, w_hh, b_ih, b_hh))
    return params


if __name__ == "__main__":
    batch = 2
    channels = 8        # sequence length seen by the LSTM (batch_first)
    timesteps = 16      # feature size of layer 0
    hidden_size = 32
    num_layers = 2
    # dropout = 0.1 -> identity at inference; bidirectional = False (default)

    key = jax.random.PRNGKey(0)
    key, kx = jax.random.split(key)
    x = jax.random.normal(kx, (batch, channels, timesteps), jnp.float32)

    params = init_params(key, timesteps, hidden_size, num_layers)

    out = jax.block_until_ready(lstm_block_forward_jit(x, params))
    ref = jax.block_until_ready(lstm_block_reference(x, params))

    assert out.shape == (batch, hidden_size), out.shape
    assert jnp.allclose(out, ref, atol=1e-5, rtol=1e-5), \
        f"max abs err = {jnp.max(jnp.abs(out - ref))}"

    print("KERNEL_OK")
</pallas_src>

<mosaic_0001>
module attributes {stable_mosaic.version = 11 : i64} {
  func.func @fused_lstm_kernel(%arg0: i32, %arg1: memref<8x8x128xf32, #tpu.memory_space<vmem>>, %arg2: memref<2x128x512xf32, #tpu.memory_space<vmem>>, %arg3: memref<2x128x512xf32, #tpu.memory_space<vmem>>, %arg4: memref<2x1x512xf32, #tpu.memory_space<vmem>>, %arg5: memref<8x128xf32, #tpu.memory_space<vmem>>, %arg6: memref<8x8x128xf32, #tpu.memory_space<vmem>>, %arg7: memref<8x8x512xf32, #tpu.memory_space<vmem>>) attributes {dimension_semantics = [#tpu.dimension_semantics<parallel>], iteration_bounds = array<i64: 1>, scalar_prefetch = 0 : i64, scratch_operands = 2 : i64, tpu.core_type = #tpu.core_type<tc>, window_params = [{transform_indices = @transform_0, window_bounds = array<i64: 8, 8, 128>}, {pipeline_mode = #tpu.pipeline_mode<synchronous>, transform_indices = @transform_1, window_bounds = array<i64: 2, 128, 512>}, {pipeline_mode = #tpu.pipeline_mode<synchronous>, transform_indices = @transform_2, window_bounds = array<i64: 2, 128, 512>}, {pipeline_mode = #tpu.pipeline_mode<synchronous>, transform_indices = @transform_3, window_bounds = array<i64: 2, 1, 512>}, {transform_indices = @transform_4, window_bounds = array<i64: 8, 128>}]} {
    %c0 = arith.constant 0 : index
    %c0_0 = arith.constant 0 : index
    %c0_1 = arith.constant 0 : index
    %0 = vector.load %arg3[%c0, %c0_0, %c0_1] : memref<2x128x512xf32, #tpu.memory_space<vmem>>, vector<1x128x512xf32>
    %1 = vector.shape_cast %0 : vector<1x128x512xf32> to vector<128x512xf32>
    %c0_2 = arith.constant 0 : index
    %c0_3 = arith.constant 0 : index
    %c0_4 = arith.constant 0 : index
    %2 = vector.load %arg4[%c0_2, %c0_3, %c0_4] : memref<2x1x512xf32, #tpu.memory_space<vmem>>, vector<1x1x512xf32>
    %3 = vector.shape_cast %2 : vector<1x1x512xf32> to vector<1x512xf32>
    %c0_5 = arith.constant 0 : index
    %c0_6 = arith.constant 0 : index
    %c0_7 = arith.constant 0 : index
    %4 = vector.load %arg1[%c0_5, %c0_6, %c0_7] : memref<8x8x128xf32, #tpu.memory_space<vmem>>, vector<8x8x128xf32>
    %5 = vector.shape_cast %4 : vector<8x8x128xf32> to vector<64x128xf32>
    %c0_8 = arith.constant 0 : index
    %c0_9 = arith.constant 0 : index
    %c0_10 = arith.constant 0 : index
    %6 = vector.load %arg2[%c0_8, %c0_9, %c0_10] : memref<2x128x512xf32, #tpu.memory_space<vmem>>, vector<1x128x512xf32>
    %7 = vector.shape_cast %6 : vector<1x128x512xf32> to vector<128x512xf32>
    %cst = arith.constant dense<0.000000e+00> : vector<64x512xf32>
    %8 = tpu.matmul %5, %7, %cst {dimension_numbers = #tpu.dot_dimension_numbers<[1], [0], [0], [1], [0, 0, 1, 1], [], []>} : vector<64x128xf32>, vector<128x512xf32>, vector<64x512xf32> -> vector<64x512xf32>
    %9 = vector.broadcast %3 : vector<1x512xf32> to vector<64x512xf32>
    %10 = arith.addf %8, %9 : vector<64x512xf32>
    %11 = vector.shape_cast %10 : vector<64x512xf32> to vector<8x8x512xf32>
    %c0_11 = arith.constant 0 : index
    %c0_12 = arith.constant 0 : index
    %c0_13 = arith.constant 0 : index
    %12 = vector.load %arg7[%c0_11, %c0_12, %c0_13] : memref<8x8x512xf32, #tpu.memory_space<vmem>>, vector<8x8x512xf32>
    tpu.vector_store %arg7[%c0_11, %c0_12, %c0_13], %11 {strides = array<i32>} : memref<8x8x512xf32, #tpu.memory_space<vmem>>, vector<8x8x512xf32>,
    %cst_14 = arith.constant 0.000000e+00 : f32
    %13 = vector.broadcast %cst_14 : f32 to vector<8x128xf32>
    %cst_15 = arith.constant 0.000000e+00 : f32
    %14 = vector.broadcast %cst_15 : f32 to vector<8x128xf32>
    %c0_i32 = arith.constant 0 : i32
    %15 = arith.index_cast %c0_i32 : i32 to index
    %c0_16 = arith.constant 0 : index
    %c0_17 = arith.constant 0 : index
    %16 = vector.load %arg7[%15, %c0_16, %c0_17] : memref<8x8x512xf32, #tpu.memory_space<vmem>>, vector<1x8x512xf32>
    %17 = vector.shape_cast %16 : vector<1x8x512xf32> to vector<8x512xf32>
    %cst_18 = arith.constant dense<0.000000e+00> : vector<8x512xf32>
    %18 = tpu.matmul %13, %1, %cst_18 {dimension_numbers = #tpu.dot_dimension_numbers<[1], [0], [0], [1], [0, 0, 1, 1], [], []>} : vector<8x128xf32>, vector<128x512xf32>, vector<8x512xf32> -> vector<8x512xf32>
    %19 = arith.addf %17, %18 : vector<8x512xf32>
    %20 = vector.extract_strided_slice %19 {offsets = [0, 0], sizes = [8, 128], strides = [1, 1]} : vector<8x512xf32> to vector<8x128xf32>
    %21 = arith.negf %20 : vector<8x128xf32>
    %22 = math.exp %21 : vector<8x128xf32>
    %cst_19 = arith.constant 1.000000e+00 : f32
    %23 = vector.broadcast %cst_19 : f32 to vector<8x128xf32>
    %24 = arith.addf %23, %22 : vector<8x128xf32>
    %25 = arith.divf %23, %24 : vector<8x128xf32>
    %26 = vector.extract_strided_slice %19 {offsets = [0, 128], sizes = [8, 128], strides = [1, 1]} : vector<8x512xf32> to vector<8x128xf32>
    %27 = arith.negf %26 : vector<8x128xf32>
    %28 = math.exp %27 : vector<8x128xf32>
    %cst_20 = arith.constant 1.000000e+00 : f32
    %29 = vector.broadcast %cst_20 : f32 to vector<8x128xf32>
    %30 = arith.addf %29, %28 : vector<8x128xf32>
    %31 = arith.divf %29, %30 : vector<8x128xf32>
    %32 = vector.extract_strided_slice %19 {offsets = [0, 256], sizes = [8, 128], strides = [1, 1]} : vector<8x512xf32> to vector<8x128xf32>
    %33 = math.tanh %32 : vector<8x128xf32>
    %34 = vector.extract_strided_slice %19 {offsets = [0, 384], sizes = [8, 128], strides = [1, 1]} : vector<8x512xf32> to vector<8x128xf32>
    %35 = arith.negf %34 : vector<8x128xf32>
    %36 = math.exp %35 : vector<8x128xf32>
    %cst_21 = arith.constant 1.000000e+00 : f32
    %37 = vector.broadcast %cst_21 : f32 to vector<8x128xf32>
    %38 = arith.addf %37, %36 : vector<8x128xf32>
    %39 = arith.divf %37, %38 : vector<8x128xf32>
    %40 = arith.mulf %31, %14 : vector<8x128xf32>
    %41 = arith.mulf %25, %33 : vector<8x128xf32>
    %42 = arith.addf %40, %41 : vector<8x128xf32>
    %43 = math.tanh %42 : vector<8x128xf32>
    %44 = arith.mulf %39, %43 : vector<8x128xf32>
    %45 = arith.index_cast %c0_i32 : i32 to index
    %c0_22 = arith.constant 0 : index
    %c0_23 = arith.constant 0 : index
    %46 = vector.load %arg6[%45, %c0_22, %c0_23] : memref<8x8x128xf32, #tpu.memory_space<vmem>>, vector<1x8x128xf32>
    %47 = vector.shape_cast %46 : vector<1x8x128xf32> to vector<8x128xf32>
    %48 = vector.shape_cast %44 : vector<8x128xf32> to vector<1x8x128xf32>
    tpu.vector_store %arg6[%45, %c0_22, %c0_23], %48 {strides = array<i32>} : memref<8x8x128xf32, #tpu.memory_space<vmem>>, vector<1x8x128xf32>,
    %c1_i32 = arith.constant 1 : i32
    %49 = arith.index_cast %c1_i32 : i32 to index
    %c0_24 = arith.constant 0 : index
    %c0_25 = arith.constant 0 : index
    %50 = vector.load %arg7[%49, %c0_24, %c0_25] : memref<8x8x512xf32, #tpu.memory_space<vmem>>, vector<1x8x512xf32>
    %51 = vector.shape_cast %50 : vector<1x8x512xf32> to vector<8x512xf32>
    %cst_26 = arith.constant dense<0.000000e+00> : vector<8x512xf32>
    %52 = tpu.matmul %44, %1, %cst_26 {dimension_numbers = #tpu.dot_dimension_numbers<[1], [0], [0], [1], [0, 0, 1, 1], [], []>} : vector<8x128xf32>, vector<128x512xf32>, vector<8x512xf32> -> vector<8x512xf32>
    %53 = arith.addf %51, %52 : vector<8x512xf32>
    %54 = vector.extract_strided_slice %53 {offsets = [0, 0], sizes = [8, 128], strides = [1, 1]} : vector<8x512xf32> to vector<8x128xf32>
    %55 = arith.negf %54 : vector<8x128xf32>
    %56 = math.exp %55 : vector<8x128xf32>
    %cst_27 = arith.constant 1.000000e+00 : f32
    %57 = vector.broadcast %cst_27 : f32 to vector<8x128xf32>
    %58 = arith.addf %57, %56 : vector<8x128xf32>
    %59 = arith.divf %57, %58 : vector<8x128xf32>
    %60 = vector.extract_strided_slice %53 {offsets = [0, 128], sizes = [8, 128], strides = [1, 1]} : vector<8x512xf32> to vector<8x128xf32>
    %61 = arith.negf %60 : vector<8x128xf32>
    %62 = math.exp %61 : vector<8x128xf32>
    %cst_28 = arith.constant 1.000000e+00 : f32
    %63 = vector.broadcast %cst_28 : f32 to vector<8x128xf32>
    %64 = arith.addf %63, %62 : vector<8x128xf32>
    %65 = arith.divf %63, %64 : vector<8x128xf32>
    %66 = vector.extract_strided_slice %53 {offsets = [0, 256], sizes = [8, 128], strides = [1, 1]} : vector<8x512xf32> to vector<8x128xf32>
    %67 = math.tanh %66 : vector<8x128xf32>
    %68 = vector.extract_strided_slice %53 {offsets = [0, 384], sizes = [8, 128], strides = [1, 1]} : vector<8x512xf32> to vector<8x128xf32>
    %69 = arith.negf %68 : vector<8x128xf32>
    %70 = math.exp %69 : vector<8x128xf32>
    %cst_29 = arith.constant 1.000000e+00 : f32
    %71 = vector.broadcast %cst_29 : f32 to vector<8x128xf32>
    %72 = arith.addf %71, %70 : vector<8x128xf32>
    %73 = arith.divf %71, %72 : vector<8x128xf32>
    %74 = arith.mulf %65, %42 : vector<8x128xf32>
    %75 = arith.mulf %59, %67 : vector<8x128xf32>
    %76 = arith.addf %74, %75 : vector<8x128xf32>
    %77 = math.tanh %76 : vector<8x128xf32>
    %78 = arith.mulf %73, %77 : vector<8x128xf32>
    %79 = arith.index_cast %c1_i32 : i32 to index
    %c0_30 = arith.constant 0 : index
    %c0_31 = arith.constant 0 : index
    %80 = vector.load %arg6[%79, %c0_30, %c0_31] : memref<8x8x128xf32, #tpu.memory_space<vmem>>, vector<1x8x128xf32>
    %81 = vector.shape_cast %80 : vector<1x8x128xf32> to vector<8x128xf32>
    %82 = vector.shape_cast %78 : vector<8x128xf32> to vector<1x8x128xf32>
    tpu.vector_store %arg6[%79, %c0_30, %c0_31], %82 {strides = array<i32>} : memref<8x8x128xf32, #tpu.memory_space<vmem>>, vector<1x8x128xf32>,
    %c2_i32 = arith.constant 2 : i32
    %83 = arith.index_cast %c2_i32 : i32 to index
    %c0_32 = arith.constant 0 : index
    %c0_33 = arith.constant 0 : index
    %84 = vector.load %arg7[%83, %c0_32, %c0_33] : memref<8x8x512xf32, #tpu.memory_space<vmem>>, vector<1x8x512xf32>
    %85 = vector.shape_cast %84 : vector<1x8x512xf32> to vector<8x512xf32>
    %cst_34 = arith.constant dense<0.000000e+00> : vector<8x512xf32>
    %86 = tpu.matmul %78, %1, %cst_34 {dimension_numbers = #tpu.dot_dimension_numbers<[1], [0], [0], [1], [0, 0, 1, 1], [], []>} : vector<8x128xf32>, vector<128x512xf32>, vector<8x512xf32> -> vector<8x512xf32>
    %87 = arith.addf %85, %86 : vector<8x512xf32>
    %88 = vector.extract_strided_slice %87 {offsets = [0, 0], sizes = [8, 128], strides = [1, 1]} : vector<8x512xf32> to vector<8x128xf32>
    %89 = arith.negf %88 : vector<8x128xf32>
    %90 = math.exp %89 : vector<8x128xf32>
    %cst_35 = arith.constant 1.000000e+00 : f32
    %91 = vector.broadcast %cst_35 : f32 to vector<8x128xf32>
    %92 = arith.addf %91, %90 : vector<8x128xf32>
    %93 = arith.divf %91, %92 : vector<8x128xf32>
    %94 = vector.extract_strided_slice %87 {offsets = [0, 128], sizes = [8, 128], strides = [1, 1]} : vector<8x512xf32> to vector<8x128xf32>
    %95 = arith.negf %94 : vector<8x128xf32>
    %96 = math.exp %95 : vector<8x128xf32>
    %cst_36 = arith.constant 1.000000e+00 : f32
    %97 = vector.broadcast %cst_36 : f32 to vector<8x128xf32>
    %98 = arith.addf %97, %96 : vector<8x128xf32>
    %99 = arith.divf %97, %98 : vector<8x128xf32>
    %100 = vector.extract_strided_slice %87 {offsets = [0, 256], sizes = [8, 128], strides = [1, 1]} : vector<8x512xf32> to vector<8x128xf32>
    %101 = math.tanh %100 : vector<8x128xf32>
    %102 = vector.extract_strided_slice %87 {offsets = [0, 384], sizes = [8, 128], strides = [1, 1]} : vector<8x512xf32> to vector<8x128xf32>
    %103 = arith.negf %102 : vector<8x128xf32>
    %104 = math.exp %103 : vector<8x128xf32>
    %cst_37 = arith.constant 1.000000e+00 : f32
    %105 = vector.broadcast %cst_37 : f32 to vector<8x128xf32>
    %106 = arith.addf %105, %104 : vector<8x128xf32>
    %107 = arith.divf %105, %106 : vector<8x128xf32>
    %108 = arith.mulf %99, %76 : vector<8x128xf32>
    %109 = arith.mulf %93, %101 : vector<8x128xf32>
    %110 = arith.addf %108, %109 : vector<8x128xf32>
    %111 = math.tanh %110 : vector<8x128xf32>
    %112 = arith.mulf %107, %111 : vector<8x128xf32>
    %113 = arith.index_cast %c2_i32 : i32 to index
    %c0_38 = arith.constant 0 : index
    %c0_39 = arith.constant 0 : index
    %114 = vector.load %arg6[%113, %c0_38, %c0_39] : memref<8x8x128xf32, #tpu.memory_space<vmem>>, vector<1x8x128xf32>
    %115 = vector.shape_cast %114 : vector<1x8x128xf32> to vector<8x128xf32>
    %116 = vector.shape_cast %112 : vector<8x128xf32> to vector<1x8x128xf32>
    tpu.vector_store %arg6[%113, %c0_38, %c0_39], %116 {strides = array<i32>} : memref<8x8x128xf32, #tpu.memory_space<vmem>>, vector<1x8x128xf32>,
    %c3_i32 = arith.constant 3 : i32
    %117 = arith.index_cast %c3_i32 : i32 to index
    %c0_40 = arith.constant 0 : index
    %c0_41 = arith.constant 0 : index
    %118 = vector.load %arg7[%117, %c0_40, %c0_41] : memref<8x8x512xf32, #tpu.memory_space<vmem>>, vector<1x8x512xf32>
    %119 = vector.shape_cast %118 : vector<1x8x512xf32> to vector<8x512xf32>
    %cst_42 = arith.constant dense<0.000000e+00> : vector<8x512xf32>
    %120 = tpu.matmul %112, %1, %cst_42 {dimension_numbers = #tpu.dot_dimension_numbers<[1], [0], [0], [1], [0, 0, 1, 1], [], []>} : vector<8x128xf32>, vector<128x512xf32>, vector<8x512xf32> -> vector<8x512xf32>
    %121 = arith.addf %119, %120 : vector<8x512xf32>
    %122 = vector.extract_strided_slice %121 {offsets = [0, 0], sizes = [8, 128], strides = [1, 1]} : vector<8x512xf32> to vector<8x128xf32>
    %123 = arith.negf %122 : vector<8x128xf32>
    %124 = math.exp %123 : vector<8x128xf32>
    %cst_43 = arith.constant 1.000000e+00 : f32
    %125 = vector.broadcast %cst_43 : f32 to vector<8x128xf32>
    %126 = arith.addf %125, %124 : vector<8x128xf32>
    %127 = arith.divf %125, %126 : vector<8x128xf32>
    %128 = vector.extract_strided_slice %121 {offsets = [0, 128], sizes = [8, 128], strides = [1, 1]} : vector<8x512xf32> to vector<8x128xf32>
    %129 = arith.negf %128 : vector<8x128xf32>
    %130 = math.exp %129 : vector<8x128xf32>
    %cst_44 = arith.constant 1.000000e+00 : f32
    %131 = vector.broadcast %cst_44 : f32 to vector<8x128xf32>
    %132 = arith.addf %131, %130 : vector<8x128xf32>
    %133 = arith.divf %131, %132 : vector<8x128xf32>
    %134 = vector.extract_strided_slice %121 {offsets = [0, 256], sizes = [8, 128], strides = [1, 1]} : vector<8x512xf32> to vector<8x128xf32>
    %135 = math.tanh %134 : vector<8x128xf32>
    %136 = vector.extract_strided_slice %121 {offsets = [0, 384], sizes = [8, 128], strides = [1, 1]} : vector<8x512xf32> to vector<8x128xf32>
    %137 = arith.negf %136 : vector<8x128xf32>
    %138 = math.exp %137 : vector<8x128xf32>
    %cst_45 = arith.constant 1.000000e+00 : f32
    %139 = vector.broadcast %cst_45 : f32 to vector<8x128xf32>
    %140 = arith.addf %139, %138 : vector<8x128xf32>
    %141 = arith.divf %139, %140 : vector<8x128xf32>
    %142 = arith.mulf %133, %110 : vector<8x128xf32>
    %143 = arith.mulf %127, %135 : vector<8x128xf32>
    %144 = arith.addf %142, %143 : vector<8x128xf32>
    %145 = math.tanh %144 : vector<8x128xf32>
    %146 = arith.mulf %141, %145 : vector<8x128xf32>
    %147 = arith.index_cast %c3_i32 : i32 to index
    %c0_46 = arith.constant 0 : index
    %c0_47 = arith.constant 0 : index
    %148 = vector.load %arg6[%147, %c0_46, %c0_47] : memref<8x8x128xf32, #tpu.memory_space<vmem>>, vector<1x8x128xf32>
    %149 = vector.shape_cast %148 : vector<1x8x128xf32> to vector<8x128xf32>
    %150 = vector.shape_cast %146 : vector<8x128xf32> to vector<1x8x128xf32>
    tpu.vector_store %arg6[%147, %c0_46, %c0_47], %150 {strides = array<i32>} : memref<8x8x128xf32, #tpu.memory_space<vmem>>, vector<1x8x128xf32>,
    %c4_i32 = arith.constant 4 : i32
    %151 = arith.index_cast %c4_i32 : i32 to index
    %c0_48 = arith.constant 0 : index
    %c0_49 = arith.constant 0 : index
    %152 = vector.load %arg7[%151, %c0_48, %c0_49] : memref<8x8x512xf32, #tpu.memory_space<vmem>>, vector<1x8x512xf32>
    %153 = vector.shape_cast %152 : vector<1x8x512xf32> to vector<8x512xf32>
    %cst_50 = arith.constant dense<0.000000e+00> : vector<8x512xf32>
    %154 = tpu.matmul %146, %1, %cst_50 {dimension_numbers = #tpu.dot_dimension_numbers<[1], [0], [0], [1], [0, 0, 1, 1], [], []>} : vector<8x128xf32>, vector<128x512xf32>, vector<8x512xf32> -> vector<8x512xf32>
    %155 = arith.addf %153, %154 : vector<8x512xf32>
    %156 = vector.extract_strided_slice %155 {offsets = [0, 0], sizes = [8, 128], strides = [1, 1]} : vector<8x512xf32> to vector<8x128xf32>
    %157 = arith.negf %156 : vector<8x128xf32>
    %158 = math.exp %157 : vector<8x128xf32>
    %cst_51 = arith.constant 1.000000e+00 : f32
    %159 = vector.broadcast %cst_51 : f32 to vector<8x128xf32>
    %160 = arith.addf %159, %158 : vector<8x128xf32>
    %161 = arith.divf %159, %160 : vector<8x128xf32>
    %162 = vector.extract_strided_slice %155 {offsets = [0, 128], sizes = [8, 128], strides = [1, 1]} : vector<8x512xf32> to vector<8x128xf32>
    %163 = arith.negf %162 : vector<8x128xf32>
    %164 = math.exp %163 : vector<8x128xf32>
    %cst_52 = arith.constant 1.000000e+00 : f32
    %165 = vector.broadcast %cst_52 : f32 to vector<8x128xf32>
    %166 = arith.addf %165, %164 : vector<8x128xf32>
    %167 = arith.divf %165, %166 : vector<8x128xf32>
    %168 = vector.extract_strided_slice %155 {offsets = [0, 256], sizes = [8, 128], strides = [1, 1]} : vector<8x512xf32> to vector<8x128xf32>
    %169 = math.tanh %168 : vector<8x128xf32>
    %170 = vector.extract_strided_slice %155 {offsets = [0, 384], sizes = [8, 128], strides = [1, 1]} : vector<8x512xf32> to vector<8x128xf32>
    %171 = arith.negf %170 : vector<8x128xf32>
    %172 = math.exp %171 : vector<8x128xf32>
    %cst_53 = arith.constant 1.000000e+00 : f32
    %173 = vector.broadcast %cst_53 : f32 to vector<8x128xf32>
    %174 = arith.addf %173, %172 : vector<8x128xf32>
    %175 = arith.divf %173, %174 : vector<8x128xf32>
    %176 = arith.mulf %167, %144 : vector<8x128xf32>
    %177 = arith.mulf %161, %169 : vector<8x128xf32>
    %178 = arith.addf %176, %177 : vector<8x128xf32>
    %179 = math.tanh %178 : vector<8x128xf32>
    %180 = arith.mulf %175, %179 : vector<8x128xf32>
    %181 = arith.index_cast %c4_i32 : i32 to index
    %c0_54 = arith.constant 0 : index
    %c0_55 = arith.constant 0 : index
    %182 = vector.load %arg6[%181, %c0_54, %c0_55] : memref<8x8x128xf32, #tpu.memory_space<vmem>>, vector<1x8x128xf32>
    %183 = vector.shape_cast %182 : vector<1x8x128xf32> to vector<8x128xf32>
    %184 = vector.shape_cast %180 : vector<8x128xf32> to vector<1x8x128xf32>
    tpu.vector_store %arg6[%181, %c0_54, %c0_55], %184 {strides = array<i32>} : memref<8x8x128xf32, #tpu.memory_space<vmem>>, vector<1x8x128xf32>,
    %c5_i32 = arith.constant 5 : i32
    %185 = arith.index_cast %c5_i32 : i32 to index
    %c0_56 = arith.constant 0 : index
    %c0_57 = arith.constant 0 : index
    %186 = vector.load %arg7[%185, %c0_56, %c0_57] : memref<8x8x512xf32, #tpu.memory_space<vmem>>, vector<1x8x512xf32>
    %187 = vector.shape_cast %186 : vector<1x8x512xf32> to vector<8x512xf32>
    %cst_58 = arith.constant dense<0.000000e+00> : vector<8x512xf32>
    %188 = tpu.matmul %180, %1, %cst_58 {dimension_numbers = #tpu.dot_dimension_numbers<[1], [0], [0], [1], [0, 0, 1, 1], [], []>} : vector<8x128xf32>, vector<128x512xf32>, vector<8x512xf32> -> vector<8x512xf32>
    %189 = arith.addf %187, %188 : vector<8x512xf32>
    %190 = vector.extract_strided_slice %189 {offsets = [0, 0], sizes = [8, 128], strides = [1, 1]} : vector<8x512xf32> to vector<8x128xf32>
    %191 = arith.negf %190 : vector<8x128xf32>
    %192 = math.exp %191 : vector<8x128xf32>
    %cst_59 = arith.constant 1.000000e+00 : f32
    %193 = vector.broadcast %cst_59 : f32 to vector<8x128xf32>
    %194 = arith.addf %193, %192 : vector<8x128xf32>
    %195 = arith.divf %193, %194 : vector<8x128xf32>
    %196 = vector.extract_strided_slice %189 {offsets = [0, 128], sizes = [8, 128], strides = [1, 1]} : vector<8x512xf32> to vector<8x128xf32>
    %197 = arith.negf %196 : vector<8x128xf32>
    %198 = math.exp %197 : vector<8x128xf32>
    %cst_60 = arith.constant 1.000000e+00 : f32
    %199 = vector.broadcast %cst_60 : f32 to vector<8x128xf32>
    %200 = arith.addf %199, %198 : vector<8x128xf32>
    %201 = arith.divf %199, %200 : vector<8x128xf32>
    %202 = vector.extract_strided_slice %189 {offsets = [0, 256], sizes = [8, 128], strides = [1, 1]} : vector<8x512xf32> to vector<8x128xf32>
    %203 = math.tanh %202 : vector<8x128xf32>
    %204 = vector.extract_strided_slice %189 {offsets = [0, 384], sizes = [8, 128], strides = [1, 1]} : vector<8x512xf32> to vector<8x128xf32>
    %205 = arith.negf %204 : vector<8x128xf32>
    %206 = math.exp %205 : vector<8x128xf32>
    %cst_61 = arith.constant 1.000000e+00 : f32
    %207 = vector.broadcast %cst_61 : f32 to vector<8x128xf32>
    %208 = arith.addf %207, %206 : vector<8x128xf32>
    %209 = arith.divf %207, %208 : vector<8x128xf32>
    %210 = arith.mulf %201, %178 : vector<8x128xf32>
    %211 = arith.mulf %195, %203 : vector<8x128xf32>
    %212 = arith.addf %210, %211 : vector<8x128xf32>
    %213 = math.tanh %212 : vector<8x128xf32>
    %214 = arith.mulf %209, %213 : vector<8x128xf32>
    %215 = arith.index_cast %c5_i32 : i32 to index
    %c0_62 = arith.constant 0 : index
    %c0_63 = arith.constant 0 : index
    %216 = vector.load %arg6[%215, %c0_62, %c0_63] : memref<8x8x128xf32, #tpu.memory_space<vmem>>, vector<1x8x128xf32>
    %217 = vector.shape_cast %216 : vector<1x8x128xf32> to vector<8x128xf32>
    %218 = vector.shape_cast %214 : vector<8x128xf32> to vector<1x8x128xf32>
    tpu.vector_store %arg6[%215, %c0_62, %c0_63], %218 {strides = array<i32>} : memref<8x8x128xf32, #tpu.memory_space<vmem>>, vector<1x8x128xf32>,
    %c6_i32 = arith.constant 6 : i32
    %219 = arith.index_cast %c6_i32 : i32 to index
    %c0_64 = arith.constant 0 : index
    %c0_65 = arith.constant 0 : index
    %220 = vector.load %arg7[%219, %c0_64, %c0_65] : memref<8x8x512xf32, #tpu.memory_space<vmem>>, vector<1x8x512xf32>
    %221 = vector.shape_cast %220 : vector<1x8x512xf32> to vector<8x512xf32>
    %cst_66 = arith.constant dense<0.000000e+00> : vector<8x512xf32>
    %222 = tpu.matmul %214, %1, %cst_66 {dimension_numbers = #tpu.dot_dimension_numbers<[1], [0], [0], [1], [0, 0, 1, 1], [], []>} : vector<8x128xf32>, vector<128x512xf32>, vector<8x512xf32> -> vector<8x512xf32>
    %223 = arith.addf %221, %222 : vector<8x512xf32>
    %224 = vector.extract_strided_slice %223 {offsets = [0, 0], sizes = [8, 128], strides = [1, 1]} : vector<8x512xf32> to vector<8x128xf32>
    %225 = arith.negf %224 : vector<8x128xf32>
    %226 = math.exp %225 : vector<8x128xf32>
    %cst_67 = arith.constant 1.000000e+00 : f32
    %227 = vector.broadcast %cst_67 : f32 to vector<8x128xf32>
    %228 = arith.addf %227, %226 : vector<8x128xf32>
    %229 = arith.divf %227, %228 : vector<8x128xf32>
    %230 = vector.extract_strided_slice %223 {offsets = [0, 128], sizes = [8, 128], strides = [1, 1]} : vector<8x512xf32> to vector<8x128xf32>
    %231 = arith.negf %230 : vector<8x128xf32>
    %232 = math.exp %231 : vector<8x128xf32>
    %cst_68 = arith.constant 1.000000e+00 : f32
    %233 = vector.broadcast %cst_68 : f32 to vector<8x128xf32>
    %234 = arith.addf %233, %232 : vector<8x128xf32>
    %235 = arith.divf %233, %234 : vector<8x128xf32>
    %236 = vector.extract_strided_slice %223 {offsets = [0, 256], sizes = [8, 128], strides = [1, 1]} : vector<8x512xf32> to vector<8x128xf32>
    %237 = math.tanh %236 : vector<8x128xf32>
    %238 = vector.extract_strided_slice %223 {offsets = [0, 384], sizes = [8, 128], strides = [1, 1]} : vector<8x512xf32> to vector<8x128xf32>
    %239 = arith.negf %238 : vector<8x128xf32>
    %240 = math.exp %239 : vector<8x128xf32>
    %cst_69 = arith.constant 1.000000e+00 : f32
    %241 = vector.broadcast %cst_69 : f32 to vector<8x128xf32>
    %242 = arith.addf %241, %240 : vector<8x128xf32>
    %243 = arith.divf %241, %242 : vector<8x128xf32>
    %244 = arith.mulf %235, %212 : vector<8x128xf32>
    %245 = arith.mulf %229, %237 : vector<8x128xf32>
    %246 = arith.addf %244, %245 : vector<8x128xf32>
    %247 = math.tanh %246 : vector<8x128xf32>
    %248 = arith.mulf %243, %247 : vector<8x128xf32>
    %249 = arith.index_cast %c6_i32 : i32 to index
    %c0_70 = arith.constant 0 : index
    %c0_71 = arith.constant 0 : index
    %250 = vector.load %arg6[%249, %c0_70, %c0_71] : memref<8x8x128xf32, #tpu.memory_space<vmem>>, vector<1x8x128xf32>
    %251 = vector.shape_cast %250 : vector<1x8x128xf32> to vector<8x128xf32>
    %252 = vector.shape_cast %248 : vector<8x128xf32> to vector<1x8x128xf32>
    tpu.vector_store %arg6[%249, %c0_70, %c0_71], %252 {strides = array<i32>} : memref<8x8x128xf32, #tpu.memory_space<vmem>>, vector<1x8x128xf32>,
    %c7_i32 = arith.constant 7 : i32
    %253 = arith.index_cast %c7_i32 : i32 to index
    %c0_72 = arith.constant 0 : index
    %c0_73 = arith.constant 0 : index
    %254 = vector.load %arg7[%253, %c0_72, %c0_73] : memref<8x8x512xf32, #tpu.memory_space<vmem>>, vector<1x8x512xf32>
    %255 = vector.shape_cast %254 : vector<1x8x512xf32> to vector<8x512xf32>
    %cst_74 = arith.constant dense<0.000000e+00> : vector<8x512xf32>
    %256 = tpu.matmul %248, %1, %cst_74 {dimension_numbers = #tpu.dot_dimension_numbers<[1], [0], [0], [1], [0, 0, 1, 1], [], []>} : vector<8x128xf32>, vector<128x512xf32>, vector<8x512xf32> -> vector<8x512xf32>
    %257 = arith.addf %255, %256 : vector<8x512xf32>
    %258 = vector.extract_strided_slice %257 {offsets = [0, 0], sizes = [8, 128], strides = [1, 1]} : vector<8x512xf32> to vector<8x128xf32>
    %259 = arith.negf %258 : vector<8x128xf32>
    %260 = math.exp %259 : vector<8x128xf32>
    %cst_75 = arith.constant 1.000000e+00 : f32
    %261 = vector.broadcast %cst_75 : f32 to vector<8x128xf32>
    %262 = arith.addf %261, %260 : vector<8x128xf32>
    %263 = arith.divf %261, %262 : vector<8x128xf32>
    %264 = vector.extract_strided_slice %257 {offsets = [0, 128], sizes = [8, 128], strides = [1, 1]} : vector<8x512xf32> to vector<8x128xf32>
    %265 = arith.negf %264 : vector<8x128xf32>
    %266 = math.exp %265 : vector<8x128xf32>
    %cst_76 = arith.constant 1.000000e+00 : f32
    %267 = vector.broadcast %cst_76 : f32 to vector<8x128xf32>
    %268 = arith.addf %267, %266 : vector<8x128xf32>
    %269 = arith.divf %267, %268 : vector<8x128xf32>
    %270 = vector.extract_strided_slice %257 {offsets = [0, 256], sizes = [8, 128], strides = [1, 1]} : vector<8x512xf32> to vector<8x128xf32>
    %271 = math.tanh %270 : vector<8x128xf32>
    %272 = vector.extract_strided_slice %257 {offsets = [0, 384], sizes = [8, 128], strides = [1, 1]} : vector<8x512xf32> to vector<8x128xf32>
    %273 = arith.negf %272 : vector<8x128xf32>
    %274 = math.exp %273 : vector<8x128xf32>
    %cst_77 = arith.constant 1.000000e+00 : f32
    %275 = vector.broadcast %cst_77 : f32 to vector<8x128xf32>
    %276 = arith.addf %275, %274 : vector<8x128xf32>
    %277 = arith.divf %275, %276 : vector<8x128xf32>
    %278 = arith.mulf %269, %246 : vector<8x128xf32>
    %279 = arith.mulf %263, %271 : vector<8x128xf32>
    %280 = arith.addf %278, %279 : vector<8x128xf32>
    %281 = math.tanh %280 : vector<8x128xf32>
    %282 = arith.mulf %277, %281 : vector<8x128xf32>
    %283 = arith.index_cast %c7_i32 : i32 to index
    %c0_78 = arith.constant 0 : index
    %c0_79 = arith.constant 0 : index
    %284 = vector.load %arg6[%283, %c0_78, %c0_79] : memref<8x8x128xf32, #tpu.memory_space<vmem>>, vector<1x8x128xf32>
    %285 = vector.shape_cast %284 : vector<1x8x128xf32> to vector<8x128xf32>
    %286 = vector.shape_cast %282 : vector<8x128xf32> to vector<1x8x128xf32>
    tpu.vector_store %arg6[%283, %c0_78, %c0_79], %286 {strides = array<i32>} : memref<8x8x128xf32, #tpu.memory_space<vmem>>, vector<1x8x128xf32>,
    %c8_i32 = arith.constant 8 : i32
    %c1 = arith.constant 1 : index
    %c0_80 = arith.constant 0 : index
    %c0_81 = arith.constant 0 : index
    %287 = vector.load %arg3[%c1, %c0_80, %c0_81] : memref<2x128x512xf32, #tpu.memory_space<vmem>>, vector<1x128x512xf32>
    %288 = vector.shape_cast %287 : vector<1x128x512xf32> to vector<128x512xf32>
    %c1_82 = arith.constant 1 : index
    %c0_83 = arith.constant 0 : index
    %c0_84 = arith.constant 0 : index
    %289 = vector.load %arg4[%c1_82, %c0_83, %c0_84] : memref<2x1x512xf32, #tpu.memory_space<vmem>>, vector<1x1x512xf32>
    %290 = vector.shape_cast %289 : vector<1x1x512xf32> to vector<1x512xf32>
    %c0_85 = arith.constant 0 : index
    %c0_86 = arith.constant 0 : index
    %c0_87 = arith.constant 0 : index
    %291 = vector.load %arg6[%c0_85, %c0_86, %c0_87] : memref<8x8x128xf32, #tpu.memory_space<vmem>>, vector<8x8x128xf32>
    %292 = vector.shape_cast %291 : vector<8x8x128xf32> to vector<64x128xf32>
    %c1_88 = arith.constant 1 : index
    %c0_89 = arith.constant 0 : index
    %c0_90 = arith.constant 0 : index
    %293 = vector.load %arg2[%c1_88, %c0_89, %c0_90] : memref<2x128x512xf32, #tpu.memory_space<vmem>>, vector<1x128x512xf32>
    %294 = vector.shape_cast %293 : vector<1x128x512xf32> to vector<128x512xf32>
    %cst_91 = arith.constant dense<0.000000e+00> : vector<64x512xf32>
    %295 = tpu.matmul %292, %294, %cst_91 {dimension_numbers = #tpu.dot_dimension_numbers<[1], [0], [0], [1], [0, 0, 1, 1], [], []>} : vector<64x128xf32>, vector<128x512xf32>, vector<64x512xf32> -> vector<64x512xf32>
    %296 = vector.broadcast %290 : vector<1x512xf32> to vector<64x512xf32>
    %297 = arith.addf %295, %296 : vector<64x512xf32>
    %298 = vector.shape_cast %297 : vector<64x512xf32> to vector<8x8x512xf32>
    %c0_92 = arith.constant 0 : index
    %c0_93 = arith.constant 0 : index
    %c0_94 = arith.constant 0 : index
    %299 = vector.load %arg7[%c0_92, %c0_93, %c0_94] : memref<8x8x512xf32, #tpu.memory_space<vmem>>, vector<8x8x512xf32>
    tpu.vector_store %arg7[%c0_92, %c0_93, %c0_94], %298 {strides = array<i32>} : memref<8x8x512xf32, #tpu.memory_space<vmem>>, vector<8x8x512xf32>,
    %cst_95 = arith.constant 0.000000e+00 : f32
    %300 = vector.broadcast %cst_95 : f32 to vector<8x128xf32>
    %cst_96 = arith.constant 0.000000e+00 : f32
    %301 = vector.broadcast %cst_96 : f32 to vector<8x128xf32>
    %c0_i32_97 = arith.constant 0 : i32
    %302 = arith.index_cast %c0_i32_97 : i32 to index
    %c0_98 = arith.constant 0 : index
    %c0_99 = arith.constant 0 : index
    %303 = vector.load %arg7[%302, %c0_98, %c0_99] : memref<8x8x512xf32, #tpu.memory_space<vmem>>, vector<1x8x512xf32>
    %304 = vector.shape_cast %303 : vector<1x8x512xf32> to vector<8x512xf32>
    %cst_100 = arith.constant dense<0.000000e+00> : vector<8x512xf32>
    %305 = tpu.matmul %300, %288, %cst_100 {dimension_numbers = #tpu.dot_dimension_numbers<[1], [0], [0], [1], [0, 0, 1, 1], [], []>} : vector<8x128xf32>, vector<128x512xf32>, vector<8x512xf32> -> vector<8x512xf32>
    %306 = arith.addf %304, %305 : vector<8x512xf32>
    %307 = vector.extract_strided_slice %306 {offsets = [0, 0], sizes = [8, 128], strides = [1, 1]} : vector<8x512xf32> to vector<8x128xf32>
    %308 = arith.negf %307 : vector<8x128xf32>
    %309 = math.exp %308 : vector<8x128xf32>
    %cst_101 = arith.constant 1.000000e+00 : f32
    %310 = vector.broadcast %cst_101 : f32 to vector<8x128xf32>
    %311 = arith.addf %310, %309 : vector<8x128xf32>
    %312 = arith.divf %310, %311 : vector<8x128xf32>
    %313 = vector.extract_strided_slice %306 {offsets = [0, 128], sizes = [8, 128], strides = [1, 1]} : vector<8x512xf32> to vector<8x128xf32>
    %314 = arith.negf %313 : vector<8x128xf32>
    %315 = math.exp %314 : vector<8x128xf32>
    %cst_102 = arith.constant 1.000000e+00 : f32
    %316 = vector.broadcast %cst_102 : f32 to vector<8x128xf32>
    %317 = arith.addf %316, %315 : vector<8x128xf32>
    %318 = arith.divf %316, %317 : vector<8x128xf32>
    %319 = vector.extract_strided_slice %306 {offsets = [0, 256], sizes = [8, 128], strides = [1, 1]} : vector<8x512xf32> to vector<8x128xf32>
    %320 = math.tanh %319 : vector<8x128xf32>
    %321 = vector.extract_strided_slice %306 {offsets = [0, 384], sizes = [8, 128], strides = [1, 1]} : vector<8x512xf32> to vector<8x128xf32>
    %322 = arith.negf %321 : vector<8x128xf32>
    %323 = math.exp %322 : vector<8x128xf32>
    %cst_103 = arith.constant 1.000000e+00 : f32
    %324 = vector.broadcast %cst_103 : f32 to vector<8x128xf32>
    %325 = arith.addf %324, %323 : vector<8x128xf32>
    %326 = arith.divf %324, %325 : vector<8x128xf32>
    %327 = arith.mulf %318, %301 : vector<8x128xf32>
    %328 = arith.mulf %312, %320 : vector<8x128xf32>
    %329 = arith.addf %327, %328 : vector<8x128xf32>
    %330 = math.tanh %329 : vector<8x128xf32>
    %331 = arith.mulf %326, %330 : vector<8x128xf32>
    %c1_i32_104 = arith.constant 1 : i32
    %332 = arith.index_cast %c1_i32_104 : i32 to index
    %c0_105 = arith.constant 0 : index
    %c0_106 = arith.constant 0 : index
    %333 = vector.load %arg7[%332, %c0_105, %c0_106] : memref<8x8x512xf32, #tpu.memory_space<vmem>>, vector<1x8x512xf32>
    %334 = vector.shape_cast %333 : vector<1x8x512xf32> to vector<8x512xf32>
    %cst_107 = arith.constant dense<0.000000e+00> : vector<8x512xf32>
    %335 = tpu.matmul %331, %288, %cst_107 {dimension_numbers = #tpu.dot_dimension_numbers<[1], [0], [0], [1], [0, 0, 1, 1], [], []>} : vector<8x128xf32>, vector<128x512xf32>, vector<8x512xf32> -> vector<8x512xf32>
    %336 = arith.addf %334, %335 : vector<8x512xf32>
    %337 = vector.extract_strided_slice %336 {offsets = [0, 0], sizes = [8, 128], strides = [1, 1]} : vector<8x512xf32> to vector<8x128xf32>
    %338 = arith.negf %337 : vector<8x128xf32>
    %339 = math.exp %338 : vector<8x128xf32>
    %cst_108 = arith.constant 1.000000e+00 : f32
    %340 = vector.broadcast %cst_108 : f32 to vector<8x128xf32>
    %341 = arith.addf %340, %339 : vector<8x128xf32>
    %342 = arith.divf %340, %341 : vector<8x128xf32>
    %343 = vector.extract_strided_slice %336 {offsets = [0, 128], sizes = [8, 128], strides = [1, 1]} : vector<8x512xf32> to vector<8x128xf32>
    %344 = arith.negf %343 : vector<8x128xf32>
    %345 = math.exp %344 : vector<8x128xf32>
    %cst_109 = arith.constant 1.000000e+00 : f32
    %346 = vector.broadcast %cst_109 : f32 to vector<8x128xf32>
    %347 = arith.addf %346, %345 : vector<8x128xf32>
    %348 = arith.divf %346, %347 : vector<8x128xf32>
    %349 = vector.extract_strided_slice %336 {offsets = [0, 256], sizes = [8, 128], strides = [1, 1]} : vector<8x512xf32> to vector<8x128xf32>
    %350 = math.tanh %349 : vector<8x128xf32>
    %351 = vector.extract_strided_slice %336 {offsets = [0, 384], sizes = [8, 128], strides = [1, 1]} : vector<8x512xf32> to vector<8x128xf32>
    %352 = arith.negf %351 : vector<8x128xf32>
    %353 = math.exp %352 : vector<8x128xf32>
    %cst_110 = arith.constant 1.000000e+00 : f32
    %354 = vector.broadcast %cst_110 : f32 to vector<8x128xf32>
    %355 = arith.addf %354, %353 : vector<8x128xf32>
    %356 = arith.divf %354, %355 : vector<8x128xf32>
    %357 = arith.mulf %348, %329 : vector<8x128xf32>
    %358 = arith.mulf %342, %350 : vector<8x128xf32>
    %359 = arith.addf %357, %358 : vector<8x128xf32>
    %360 = math.tanh %359 : vector<8x128xf32>
    %361 = arith.mulf %356, %360 : vector<8x128xf32>
    %c2_i32_111 = arith.constant 2 : i32
    %362 = arith.index_cast %c2_i32_111 : i32 to index
    %c0_112 = arith.constant 0 : index
    %c0_113 = arith.constant 0 : index
    %363 = vector.load %arg7[%362, %c0_112, %c0_113] : memref<8x8x512xf32, #tpu.memory_space<vmem>>, vector<1x8x512xf32>
    %364 = vector.shape_cast %363 : vector<1x8x512xf32> to vector<8x512xf32>
    %cst_114 = arith.constant dense<0.000000e+00> : vector<8x512xf32>
    %365 = tpu.matmul %361, %288, %cst_114 {dimension_numbers = #tpu.dot_dimension_numbers<[1], [0], [0], [1], [0, 0, 1, 1], [], []>} : vector<8x128xf32>, vector<128x512xf32>, vector<8x512xf32> -> vector<8x512xf32>
    %366 = arith.addf %364, %365 : vector<8x512xf32>
    %367 = vector.extract_strided_slice %366 {offsets = [0, 0], sizes = [8, 128], strides = [1, 1]} : vector<8x512xf32> to vector<8x128xf32>
    %368 = arith.negf %367 : vector<8x128xf32>
    %369 = math.exp %368 : vector<8x128xf32>
    %cst_115 = arith.constant 1.000000e+00 : f32
    %370 = vector.broadcast %cst_115 : f32 to vector<8x128xf32>
    %371 = arith.addf %370, %369 : vector<8x128xf32>
    %372 = arith.divf %370, %371 : vector<8x128xf32>
    %373 = vector.extract_strided_slice %366 {offsets = [0, 128], sizes = [8, 128], strides = [1, 1]} : vector<8x512xf32> to vector<8x128xf32>
    %374 = arith.negf %373 : vector<8x128xf32>
    %375 = math.exp %374 : vector<8x128xf32>
    %cst_116 = arith.constant 1.000000e+00 : f32
    %376 = vector.broadcast %cst_116 : f32 to vector<8x128xf32>
    %377 = arith.addf %376, %375 : vector<8x128xf32>
    %378 = arith.divf %376, %377 : vector<8x128xf32>
    %379 = vector.extract_strided_slice %366 {offsets = [0, 256], sizes = [8, 128], strides = [1, 1]} : vector<8x512xf32> to vector<8x128xf32>
    %380 = math.tanh %379 : vector<8x128xf32>
    %381 = vector.extract_strided_slice %366 {offsets = [0, 384], sizes = [8, 128], strides = [1, 1]} : vector<8x512xf32> to vector<8x128xf32>
    %382 = arith.negf %381 : vector<8x128xf32>
    %383 = math.exp %382 : vector<8x128xf32>
    %cst_117 = arith.constant 1.000000e+00 : f32
    %384 = vector.broadcast %cst_117 : f32 to vector<8x128xf32>
    %385 = arith.addf %384, %383 : vector<8x128xf32>
    %386 = arith.divf %384, %385 : vector<8x128xf32>
    %387 = arith.mulf %378, %359 : vector<8x128xf32>
    %388 = arith.mulf %372, %380 : vector<8x128xf32>
    %389 = arith.addf %387, %388 : vector<8x128xf32>
    %390 = math.tanh %389 : vector<8x128xf32>
    %391 = arith.mulf %386, %390 : vector<8x128xf32>
    %c3_i32_118 = arith.constant 3 : i32
    %392 = arith.index_cast %c3_i32_118 : i32 to index
    %c0_119 = arith.constant 0 : index
    %c0_120 = arith.constant 0 : index
    %393 = vector.load %arg7[%392, %c0_119, %c0_120] : memref<8x8x512xf32, #tpu.memory_space<vmem>>, vector<1x8x512xf32>
    %394 = vector.shape_cast %393 : vector<1x8x512xf32> to vector<8x512xf32>
    %cst_121 = arith.constant dense<0.000000e+00> : vector<8x512xf32>
    %395 = tpu.matmul %391, %288, %cst_121 {dimension_numbers = #tpu.dot_dimension_numbers<[1], [0], [0], [1], [0, 0, 1, 1], [], []>} : vector<8x128xf32>, vector<128x512xf32>, vector<8x512xf32> -> vector<8x512xf32>
    %396 = arith.addf %394, %395 : vector<8x512xf32>
    %397 = vector.extract_strided_slice %396 {offsets = [0, 0], sizes = [8, 128], strides = [1, 1]} : vector<8x512xf32> to vector<8x128xf32>
    %398 = arith.negf %397 : vector<8x128xf32>
    %399 = math.exp %398 : vector<8x128xf32>
    %cst_122 = arith.constant 1.000000e+00 : f32
    %400 = vector.broadcast %cst_122 : f32 to vector<8x128xf32>
    %401 = arith.addf %400, %399 : vector<8x128xf32>
    %402 = arith.divf %400, %401 : vector<8x128xf32>
    %403 = vector.extract_strided_slice %396 {offsets = [0, 128], sizes = [8, 128], strides = [1, 1]} : vector<8x512xf32> to vector<8x128xf32>
    %404 = arith.negf %403 : vector<8x128xf32>
    %405 = math.exp %404 : vector<8x128xf32>
    %cst_123 = arith.constant 1.000000e+00 : f32
    %406 = vector.broadcast %cst_123 : f32 to vector<8x128xf32>
    %407 = arith.addf %406, %405 : vector<8x128xf32>
    %408 = arith.divf %406, %407 : vector<8x128xf32>
    %409 = vector.extract_strided_slice %396 {offsets = [0, 256], sizes = [8, 128], strides = [1, 1]} : vector<8x512xf32> to vector<8x128xf32>
    %410 = math.tanh %409 : vector<8x128xf32>
    %411 = vector.extract_strided_slice %396 {offsets = [0, 384], sizes = [8, 128], strides = [1, 1]} : vector<8x512xf32> to vector<8x128xf32>
    %412 = arith.negf %411 : vector<8x128xf32>
    %413 = math.exp %412 : vector<8x128xf32>
    %cst_124 = arith.constant 1.000000e+00 : f32
    %414 = vector.broadcast %cst_124 : f32 to vector<8x128xf32>
    %415 = arith.addf %414, %413 : vector<8x128xf32>
    %416 = arith.divf %414, %415 : vector<8x128xf32>
    %417 = arith.mulf %408, %389 : vector<8x128xf32>
    %418 = arith.mulf %402, %410 : vector<8x128xf32>
    %419 = arith.addf %417, %418 : vector<8x128xf32>
    %420 = math.tanh %419 : vector<8x128xf32>
    %421 = arith.mulf %416, %420 : vector<8x128xf32>
    %c4_i32_125 = arith.constant 4 : i32
    %422 = arith.index_cast %c4_i32_125 : i32 to index
    %c0_126 = arith.constant 0 : index
    %c0_127 = arith.constant 0 : index
    %423 = vector.load %arg7[%422, %c0_126, %c0_127] : memref<8x8x512xf32, #tpu.memory_space<vmem>>, vector<1x8x512xf32>
    %424 = vector.shape_cast %423 : vector<1x8x512xf32> to vector<8x512xf32>
    %cst_128 = arith.constant dense<0.000000e+00> : vector<8x512xf32>
    %425 = tpu.matmul %421, %288, %cst_128 {dimension_numbers = #tpu.dot_dimension_numbers<[1], [0], [0], [1], [0, 0, 1, 1], [], []>} : vector<8x128xf32>, vector<128x512xf32>, vector<8x512xf32> -> vector<8x512xf32>
    %426 = arith.addf %424, %425 : vector<8x512xf32>
    %427 = vector.extract_strided_slice %426 {offsets = [0, 0], sizes = [8, 128], strides = [1, 1]} : vector<8x512xf32> to vector<8x128xf32>
    %428 = arith.negf %427 : vector<8x128xf32>
    %429 = math.exp %428 : vector<8x128xf32>
    %cst_129 = arith.constant 1.000000e+00 : f32
    %430 = vector.broadcast %cst_129 : f32 to vector<8x128xf32>
    %431 = arith.addf %430, %429 : vector<8x128xf32>
    %432 = arith.divf %430, %431 : vector<8x128xf32>
    %433 = vector.extract_strided_slice %426 {offsets = [0, 128], sizes = [8, 128], strides = [1, 1]} : vector<8x512xf32> to vector<8x128xf32>
    %434 = arith.negf %433 : vector<8x128xf32>
    %435 = math.exp %434 : vector<8x128xf32>
    %cst_130 = arith.constant 1.000000e+00 : f32
    %436 = vector.broadcast %cst_130 : f32 to vector<8x128xf32>
    %437 = arith.addf %436, %435 : vector<8x128xf32>
    %438 = arith.divf %436, %437 : vector<8x128xf32>
    %439 = vector.extract_strided_slice %426 {offsets = [0, 256], sizes = [8, 128], strides = [1, 1]} : vector<8x512xf32> to vector<8x128xf32>
    %440 = math.tanh %439 : vector<8x128xf32>
    %441 = vector.extract_strided_slice %426 {offsets = [0, 384], sizes = [8, 128], strides = [1, 1]} : vector<8x512xf32> to vector<8x128xf32>
    %442 = arith.negf %441 : vector<8x128xf32>
    %443 = math.exp %442 : vector<8x128xf32>
    %cst_131 = arith.constant 1.000000e+00 : f32
    %444 = vector.broadcast %cst_131 : f32 to vector<8x128xf32>
    %445 = arith.addf %444, %443 : vector<8x128xf32>
    %446 = arith.divf %444, %445 : vector<8x128xf32>
    %447 = arith.mulf %438, %419 : vector<8x128xf32>
    %448 = arith.mulf %432, %440 : vector<8x128xf32>
    %449 = arith.addf %447, %448 : vector<8x128xf32>
    %450 = math.tanh %449 : vector<8x128xf32>
    %451 = arith.mulf %446, %450 : vector<8x128xf32>
    %c5_i32_132 = arith.constant 5 : i32
    %452 = arith.index_cast %c5_i32_132 : i32 to index
    %c0_133 = arith.constant 0 : index
    %c0_134 = arith.constant 0 : index
    %453 = vector.load %arg7[%452, %c0_133, %c0_134] : memref<8x8x512xf32, #tpu.memory_space<vmem>>, vector<1x8x512xf32>
    %454 = vector.shape_cast %453 : vector<1x8x512xf32> to vector<8x512xf32>
    %cst_135 = arith.constant dense<0.000000e+00> : vector<8x512xf32>
    %455 = tpu.matmul %451, %288, %cst_135 {dimension_numbers = #tpu.dot_dimension_numbers<[1], [0], [0], [1], [0, 0, 1, 1], [], []>} : vector<8x128xf32>, vector<128x512xf32>, vector<8x512xf32> -> vector<8x512xf32>
    %456 = arith.addf %454, %455 : vector<8x512xf32>
    %457 = vector.extract_strided_slice %456 {offsets = [0, 0], sizes = [8, 128], strides = [1, 1]} : vector<8x512xf32> to vector<8x128xf32>
    %458 = arith.negf %457 : vector<8x128xf32>
    %459 = math.exp %458 : vector<8x128xf32>
    %cst_136 = arith.constant 1.000000e+00 : f32
    %460 = vector.broadcast %cst_136 : f32 to vector<8x128xf32>
    %461 = arith.addf %460, %459 : vector<8x128xf32>
    %462 = arith.divf %460, %461 : vector<8x128xf32>
    %463 = vector.extract_strided_slice %456 {offsets = [0, 128], sizes = [8, 128], strides = [1, 1]} : vector<8x512xf32> to vector<8x128xf32>
    %464 = arith.negf %463 : vector<8x128xf32>
    %465 = math.exp %464 : vector<8x128xf32>
    %cst_137 = arith.constant 1.000000e+00 : f32
    %466 = vector.broadcast %cst_137 : f32 to vector<8x128xf32>
    %467 = arith.addf %466, %465 : vector<8x128xf32>
    %468 = arith.divf %466, %467 : vector<8x128xf32>
    %469 = vector.extract_strided_slice %456 {offsets = [0, 256], sizes = [8, 128], strides = [1, 1]} : vector<8x512xf32> to vector<8x128xf32>
    %470 = math.tanh %469 : vector<8x128xf32>
    %471 = vector.extract_strided_slice %456 {offsets = [0, 384], sizes = [8, 128], strides = [1, 1]} : vector<8x512xf32> to vector<8x128xf32>
    %472 = arith.negf %471 : vector<8x128xf32>
    %473 = math.exp %472 : vector<8x128xf32>
    %cst_138 = arith.constant 1.000000e+00 : f32
    %474 = vector.broadcast %cst_138 : f32 to vector<8x128xf32>
    %475 = arith.addf %474, %473 : vector<8x128xf32>
    %476 = arith.divf %474, %475 : vector<8x128xf32>
    %477 = arith.mulf %468, %449 : vector<8x128xf32>
    %478 = arith.mulf %462, %470 : vector<8x128xf32>
    %479 = arith.addf %477, %478 : vector<8x128xf32>
    %480 = math.tanh %479 : vector<8x128xf32>
    %481 = arith.mulf %476, %480 : vector<8x128xf32>
    %c6_i32_139 = arith.constant 6 : i32
    %482 = arith.index_cast %c6_i32_139 : i32 to index
    %c0_140 = arith.constant 0 : index
    %c0_141 = arith.constant 0 : index
    %483 = vector.load %arg7[%482, %c0_140, %c0_141] : memref<8x8x512xf32, #tpu.memory_space<vmem>>, vector<1x8x512xf32>
    %484 = vector.shape_cast %483 : vector<1x8x512xf32> to vector<8x512xf32>
    %cst_142 = arith.constant dense<0.000000e+00> : vector<8x512xf32>
    %485 = tpu.matmul %481, %288, %cst_142 {dimension_numbers = #tpu.dot_dimension_numbers<[1], [0], [0], [1], [0, 0, 1, 1], [], []>} : vector<8x128xf32>, vector<128x512xf32>, vector<8x512xf32> -> vector<8x512xf32>
    %486 = arith.addf %484, %485 : vector<8x512xf32>
    %487 = vector.extract_strided_slice %486 {offsets = [0, 0], sizes = [8, 128], strides = [1, 1]} : vector<8x512xf32> to vector<8x128xf32>
    %488 = arith.negf %487 : vector<8x128xf32>
    %489 = math.exp %488 : vector<8x128xf32>
    %cst_143 = arith.constant 1.000000e+00 : f32
    %490 = vector.broadcast %cst_143 : f32 to vector<8x128xf32>
    %491 = arith.addf %490, %489 : vector<8x128xf32>
    %492 = arith.divf %490, %491 : vector<8x128xf32>
    %493 = vector.extract_strided_slice %486 {offsets = [0, 128], sizes = [8, 128], strides = [1, 1]} : vector<8x512xf32> to vector<8x128xf32>
    %494 = arith.negf %493 : vector<8x128xf32>
    %495 = math.exp %494 : vector<8x128xf32>
    %cst_144 = arith.constant 1.000000e+00 : f32
    %496 = vector.broadcast %cst_144 : f32 to vector<8x128xf32>
    %497 = arith.addf %496, %495 : vector<8x128xf32>
    %498 = arith.divf %496, %497 : vector<8x128xf32>
    %499 = vector.extract_strided_slice %486 {offsets = [0, 256], sizes = [8, 128], strides = [1, 1]} : vector<8x512xf32> to vector<8x128xf32>
    %500 = math.tanh %499 : vector<8x128xf32>
    %501 = vector.extract_strided_slice %486 {offsets = [0, 384], sizes = [8, 128], strides = [1, 1]} : vector<8x512xf32> to vector<8x128xf32>
    %502 = arith.negf %501 : vector<8x128xf32>
    %503 = math.exp %502 : vector<8x128xf32>
    %cst_145 = arith.constant 1.000000e+00 : f32
    %504 = vector.broadcast %cst_145 : f32 to vector<8x128xf32>
    %505 = arith.addf %504, %503 : vector<8x128xf32>
    %506 = arith.divf %504, %505 : vector<8x128xf32>
    %507 = arith.mulf %498, %479 : vector<8x128xf32>
    %508 = arith.mulf %492, %500 : vector<8x128xf32>
    %509 = arith.addf %507, %508 : vector<8x128xf32>
    %510 = math.tanh %509 : vector<8x128xf32>
    %511 = arith.mulf %506, %510 : vector<8x128xf32>
    %c7_i32_146 = arith.constant 7 : i32
    %512 = arith.index_cast %c7_i32_146 : i32 to index
    %c0_147 = arith.constant 0 : index
    %c0_148 = arith.constant 0 : index
    %513 = vector.load %arg7[%512, %c0_147, %c0_148] : memref<8x8x512xf32, #tpu.memory_space<vmem>>, vector<1x8x512xf32>
    %514 = vector.shape_cast %513 : vector<1x8x512xf32> to vector<8x512xf32>
    %cst_149 = arith.constant dense<0.000000e+00> : vector<8x512xf32>
    %515 = tpu.matmul %511, %288, %cst_149 {dimension_numbers = #tpu.dot_dimension_numbers<[1], [0], [0], [1], [0, 0, 1, 1], [], []>} : vector<8x128xf32>, vector<128x512xf32>, vector<8x512xf32> -> vector<8x512xf32>
    %516 = arith.addf %514, %515 : vector<8x512xf32>
    %517 = vector.extract_strided_slice %516 {offsets = [0, 0], sizes = [8, 128], strides = [1, 1]} : vector<8x512xf32> to vector<8x128xf32>
    %518 = arith.negf %517 : vector<8x128xf32>
    %519 = math.exp %518 : vector<8x128xf32>
    %cst_150 = arith.constant 1.000000e+00 : f32
    %520 = vector.broadcast %cst_150 : f32 to vector<8x128xf32>
    %521 = arith.addf %520, %519 : vector<8x128xf32>
    %522 = arith.divf %520, %521 : vector<8x128xf32>
    %523 = vector.extract_strided_slice %516 {offsets = [0, 128], sizes = [8, 128], strides = [1, 1]} : vector<8x512xf32> to vector<8x128xf32>
    %524 = arith.negf %523 : vector<8x128xf32>
    %525 = math.exp %524 : vector<8x128xf32>
    %cst_151 = arith.constant 1.000000e+00 : f32
    %526 = vector.broadcast %cst_151 : f32 to vector<8x128xf32>
    %527 = arith.addf %526, %525 : vector<8x128xf32>
    %528 = arith.divf %526, %527 : vector<8x128xf32>
    %529 = vector.extract_strided_slice %516 {offsets = [0, 256], sizes = [8, 128], strides = [1, 1]} : vector<8x512xf32> to vector<8x128xf32>
    %530 = math.tanh %529 : vector<8x128xf32>
    %531 = vector.extract_strided_slice %516 {offsets = [0, 384], sizes = [8, 128], strides = [1, 1]} : vector<8x512xf32> to vector<8x128xf32>
    %532 = arith.negf %531 : vector<8x128xf32>
    %533 = math.exp %532 : vector<8x128xf32>
    %cst_152 = arith.constant 1.000000e+00 : f32
    %534 = vector.broadcast %cst_152 : f32 to vector<8x128xf32>
    %535 = arith.addf %534, %533 : vector<8x128xf32>
    %536 = arith.divf %534, %535 : vector<8x128xf32>
    %537 = arith.mulf %528, %509 : vector<8x128xf32>
    %538 = arith.mulf %522, %530 : vector<8x128xf32>
    %539 = arith.addf %537, %538 : vector<8x128xf32>
    %540 = math.tanh %539 : vector<8x128xf32>
    %541 = arith.mulf %536, %540 : vector<8x128xf32>
    %c8_i32_153 = arith.constant 8 : i32
    %c0_154 = arith.constant 0 : index
    %c0_155 = arith.constant 0 : index
    %542 = vector.load %arg5[%c0_154, %c0_155] : memref<8x128xf32, #tpu.memory_space<vmem>>, vector<8x128xf32>
    tpu.vector_store %arg5[%c0_154, %c0_155], %541 {strides = array<i32>} : memref<8x128xf32, #tpu.memory_space<vmem>>, vector<8x128xf32>,
    return
  }
  func.func @transform_0(%arg0: i32) -> (i32, i32, i32) {
    %c0_i32 = arith.constant 0 : i32
    %c0_i32_0 = arith.constant 0 : i32
    %c0_i32_1 = arith.constant 0 : i32
    return %c0_i32, %arg0, %c0_i32_0 : i32, i32, i32
  }
  func.func @transform_1(%arg0: i32) -> (i32, i32, i32) {
    %c0_i32 = arith.constant 0 : i32
    %c0_i32_0 = arith.constant 0 : i32
    %c0_i32_1 = arith.constant 0 : i32
    %c0_i32_2 = arith.constant 0 : i32
    return %c0_i32, %c0_i32_0, %c0_i32_1 : i32, i32, i32
  }
  func.func @transform_2(%arg0: i32) -> (i32, i32, i32) {
    %c0_i32 = arith.constant 0 : i32
    %c0_i32_0 = arith.constant 0 : i32
    %c0_i32_1 = arith.constant 0 : i32
    %c0_i32_2 = arith.constant 0 : i32
    return %c0_i32, %c0_i32_0, %c0_i32_1 : i32, i32, i32
  }
  func.func @transform_3(%arg0: i32) -> (i32, i32, i32) {
    %c0_i32 = arith.constant 0 : i32
    %c0_i32_0 = arith.constant 0 : i32
    %c0_i32_1 = arith.constant 0 : i32
    %c0_i32_2 = arith.constant 0 : i32
    return %c0_i32, %c0_i32_0, %c0_i32_1 : i32, i32, i32
  }
  func.func @transform_4(%arg0: i32) -> (i32, i32) {
    %c0_i32 = arith.constant 0 : i32
    %c0_i32_0 = arith.constant 0 : i32
    return %arg0, %c0_i32 : i32, i32
  }
}

</mosaic_0001>

<bundles_post_ra>
// kernel: lstm_block_forward.1
= control target key start
LH: loop header
LB: loop body
LE: loop exit
PB: predicated region body
PF: predicated region fallthrough
CT: control target
= control target key end

     0   :  { %s6872_s1 = inlined_call_operand.vmem [shape: f32[2,128,512], index: 1, kind: input, shape index: {}]   ;;  %s6873_s0 = inlined_call_operand.vmem [shape: f32[8,8,128], index: 0, kind: input, shape index: {}]   ;;  %s6874_s2 = inlined_call_operand.vmem [shape: f32[2,128,512], index: 2, kind: input, shape index: {}]   ;;  %s6875_s3 = inlined_call_operand.vmem [shape: f32[2,1,512], index: 3, kind: input, shape index: {}]   ;;  %s6876_s4 = inlined_call_operand.vmem [shape: f32[8,128], index: 4, kind: output, shape index: {}]  }
   0x1   :  { %v150_v0 = vld [vmem:[%s6872_s1 + $0x1e0] sm:$0xff]  ;;  %v151_v1 = vld [vmem:[%s6872_s1 + $0x1e8] sm:$0xff]  ;;  %v152_v2 = vld [vmem:[%s6872_s1 + $0x1f0] sm:$0xff] }
   0x2   :  { %163 = vmatpush.msra.mxu0 %v150_v0  ;;  %204 = vmatpush.msra.mxu1 %v151_v1  ;;  %v153_v3 = vld [vmem:[%s6872_s1 + $0x1f8] sm:$0xff]  ;;  %v146_v4 = vld [vmem:[%s6872_s1 + $0x1c0] sm:$0xff]  ;;  %v147_v5 = vld [vmem:[%s6872_s1 + $0x1c8] sm:$0xff] }
   0x3   :  { %245 = vmatpush.msra.mxu2 %v152_v2  ;;  %286 = vmatpush.msra.mxu3 %v153_v3  ;;  %v148_v6 = vld [vmem:[%s6872_s1 + $0x1d0] sm:$0xff]  ;;  %v149_v7 = vld [vmem:[%s6872_s1 + $0x1d8] sm:$0xff]  ;;  %v142_v8 = vld [vmem:[%s6872_s1 + $0x1a0] sm:$0xff] }
   0x4   :  { %164 = vmatpush.msra.mxu0 %v146_v4  ;;  %205 = vmatpush.msra.mxu1 %v147_v5  ;;  %v143_v9 = vld [vmem:[%s6872_s1 + $0x1a8] sm:$0xff]  ;;  %v144_v10 = vld [vmem:[%s6872_s1 + $0x1b0] sm:$0xff]  ;;  %v145_v11 = vld [vmem:[%s6872_s1 + $0x1b8] sm:$0xff] }
   0x5   :  { %246 = vmatpush.msra.mxu2 %v148_v6  ;;  %287 = vmatpush.msra.mxu3 %v149_v7  ;;  %v138_v12 = vld [vmem:[%s6872_s1 + $0x180] sm:$0xff]  ;;  %v139_v13 = vld [vmem:[%s6872_s1 + $0x188] sm:$0xff]  ;;  %v140_v14 = vld [vmem:[%s6872_s1 + $0x190] sm:$0xff] }
   0x6   :  { %165 = vmatpush.msra.mxu0 %v142_v8  ;;  %206 = vmatpush.msra.mxu1 %v143_v9  ;;  %v141_v15 = vld [vmem:[%s6872_s1 + $0x198] sm:$0xff]  ;;  %v134_v16 = vld [vmem:[%s6872_s1 + $0x160] sm:$0xff]  ;;  %v135_v17 = vld [vmem:[%s6872_s1 + $0x168] sm:$0xff] }
   0x7   :  { %247 = vmatpush.msra.mxu2 %v144_v10  ;;  %288 = vmatpush.msra.mxu3 %v145_v11  ;;  %v136_v18 = vld [vmem:[%s6872_s1 + $0x170] sm:$0xff]  ;;  %v137_v19 = vld [vmem:[%s6872_s1 + $0x178] sm:$0xff]  ;;  %v130_v20 = vld [vmem:[%s6872_s1 + $0x140] sm:$0xff] }
   0x8   :  { %166 = vmatpush.msra.mxu0 %v138_v12  ;;  %207 = vmatpush.msra.mxu1 %v139_v13  ;;  %v131_v21 = vld [vmem:[%s6872_s1 + $0x148] sm:$0xff]  ;;  %v132_v22 = vld [vmem:[%s6872_s1 + $0x150] sm:$0xff]  ;;  %v133_v23 = vld [vmem:[%s6872_s1 + $0x158] sm:$0xff] }
   0x9   :  { %248 = vmatpush.msra.mxu2 %v140_v14  ;;  %289 = vmatpush.msra.mxu3 %v141_v15  ;;  %v126_v24 = vld [vmem:[%s6872_s1 + $0x120] sm:$0xff]  ;;  %v127_v25 = vld [vmem:[%s6872_s1 + $0x128] sm:$0xff]  ;;  %v128_v26 = vld [vmem:[%s6872_s1 + $0x130] sm:$0xff] }
   0xa   :  { %167 = vmatpush.msra.mxu0 %v134_v16  ;;  %208 = vmatpush.msra.mxu1 %v135_v17  ;;  %v129_v27 = vld [vmem:[%s6872_s1 + $0x138] sm:$0xff]  ;;  %v122_v28 = vld [vmem:[%s6872_s1 + $0x100] sm:$0xff]  ;;  %v123_v29 = vld [vmem:[%s6872_s1 + $0x108] sm:$0xff] }
   0xb   :  { %249 = vmatpush.msra.mxu2 %v136_v18  ;;  %290 = vmatpush.msra.mxu3 %v137_v19  ;;  %v124_v30 = vld [vmem:[%s6872_s1 + $0x110] sm:$0xff]  ;;  %v125_v31 = vld [vmem:[%s6872_s1 + $0x118] sm:$0xff]  ;;  %v118_v32 = vld [vmem:[%s6872_s1 + $0xe0] sm:$0xff] }
   0xc   :  { %168 = vmatpush.msra.mxu0 %v130_v20  ;;  %209 = vmatpush.msra.mxu1 %v131_v21  ;;  %v119_v33 = vld [vmem:[%s6872_s1 + $0xe8] sm:$0xff]  ;;  %v120_v34 = vld [vmem:[%s6872_s1 + $0xf0] sm:$0xff]  ;;  %v121_v35 = vld [vmem:[%s6872_s1 + $0xf8] sm:$0xff] }
   0xd   :  { %250 = vmatpush.msra.mxu2 %v132_v22  ;;  %291 = vmatpush.msra.mxu3 %v133_v23  ;;  %v114_v36 = vld [vmem:[%s6872_s1 + $0xc0] sm:$0xff]  ;;  %v115_v37 = vld [vmem:[%s6872_s1 + $0xc8] sm:$0xff]  ;;  %v116_v38 = vld [vmem:[%s6872_s1 + $0xd0] sm:$0xff] }
   0xe   :  { %169 = vmatpush.msra.mxu0 %v126_v24  ;;  %210 = vmatpush.msra.mxu1 %v127_v25  ;;  %v117_v39 = vld [vmem:[%s6872_s1 + $0xd8] sm:$0xff]  ;;  %v110_v40 = vld [vmem:[%s6872_s1 + $0xa0] sm:$0xff]  ;;  %v111_v41 = vld [vmem:[%s6872_s1 + $0xa8] sm:$0xff] }
   0xf   :  { %251 = vmatpush.msra.mxu2 %v128_v26  ;;  %292 = vmatpush.msra.mxu3 %v129_v27  ;;  %v112_v42 = vld [vmem:[%s6872_s1 + $0xb0] sm:$0xff]  ;;  %v113_v43 = vld [vmem:[%s6872_s1 + $0xb8] sm:$0xff]  ;;  %v106_v44 = vld [vmem:[%s6872_s1 + $0x80] sm:$0xff] }
  0x10   :  { %170 = vmatpush.msra.mxu0 %v122_v28  ;;  %211 = vmatpush.msra.mxu1 %v123_v29  ;;  %v107_v45 = vld [vmem:[%s6872_s1 + $0x88] sm:$0xff]  ;;  %v108_v46 = vld [vmem:[%s6872_s1 + $0x90] sm:$0xff]  ;;  %v109_v47 = vld [vmem:[%s6872_s1 + $0x98] sm:$0xff] }
  0x11   :  { %252 = vmatpush.msra.mxu2 %v124_v30  ;;  %293 = vmatpush.msra.mxu3 %v125_v31  ;;  %v102_v48 = vld [vmem:[%s6872_s1 + $0x60] sm:$0xff]  ;;  %v103_v49 = vld [vmem:[%s6872_s1 + $0x68] sm:$0xff]  ;;  %v104_v50 = vld [vmem:[%s6872_s1 + $0x70] sm:$0xff] }
  0x12   :  { %171 = vmatpush.msra.mxu0 %v118_v32  ;;  %212 = vmatpush.msra.mxu1 %v119_v33  ;;  %v105_v51 = vld [vmem:[%s6872_s1 + $0x78] sm:$0xff]  ;;  %v98_v52 = vld [vmem:[%s6872_s1 + $0x40] sm:$0xff]  ;;  %v99_v53 = vld [vmem:[%s6872_s1 + $0x48] sm:$0xff] }
  0x13   :  { %253 = vmatpush.msra.mxu2 %v120_v34  ;;  %294 = vmatpush.msra.mxu3 %v121_v35  ;;  %v100_v54 = vld [vmem:[%s6872_s1 + $0x50] sm:$0xff]  ;;  %v101_v55 = vld [vmem:[%s6872_s1 + $0x58] sm:$0xff]  ;;  %v94_v56 = vld [vmem:[%s6872_s1 + $0x20] sm:$0xff] }
  0x14   :  { %172 = vmatpush.msra.mxu0 %v114_v36  ;;  %213 = vmatpush.msra.mxu1 %v115_v37  ;;  %v95_v57 = vld [vmem:[%s6872_s1 + $0x28] sm:$0xff]  ;;  %v96_v58 = vld [vmem:[%s6872_s1 + $0x30] sm:$0xff]  ;;  %v97_v59 = vld [vmem:[%s6872_s1 + $0x38] sm:$0xff] }
  0x15   :  { %254 = vmatpush.msra.mxu2 %v116_v38  ;;  %295 = vmatpush.msra.mxu3 %v117_v39  ;;  %v90_v60 = vld [vmem:[%s6872_s1] sm:$0xff]  ;;  %v91_v61 = vld [vmem:[%s6872_s1 + $0x8] sm:$0xff]  ;;  %v92_v62 = vld [vmem:[%s6872_s1 + $0x10] sm:$0xff] }
  0x16   :  { %173 = vmatpush.msra.mxu0 %v110_v40  ;;  %214 = vmatpush.msra.mxu1 %v111_v41  ;;  %v93_v63 = vld [vmem:[%s6872_s1 + $0x18] sm:$0xff]  ;;  %v82_v0 = vld [vmem:[%s6873_s0] sm:$0xff]  ;;  %v3938_v2 = vld [vmem:[%s6874_s2 + $0x1e8] sm:$0xff] }
  0x17   :  { %255 = vmatpush.msra.mxu2 %v112_v42  ;;  %296 = vmatpush.msra.mxu3 %v113_v43  ;;  %v3933_v1 = vld [vmem:[%s6874_s2 + $0x1e0] sm:$0xff]  ;;  %v3943_v3 = vld [vmem:[%s6874_s2 + $0x1f8] sm:$0xff]  ;;  %v3948_v4 = vld [vmem:[%s6874_s2 + $0x1f0] sm:$0xff] }
  0x18   :  { %174 = vmatpush.msra.mxu0 %v106_v44  ;;  %215 = vmatpush.msra.mxu1 %v107_v45  ;;  %v3953_v5 = vld [vmem:[%s6874_s2 + $0x1c0] sm:$0xff]  ;;  %v3958_v6 = vld [vmem:[%s6874_s2 + $0x1c8] sm:$0xff]  ;;  %v3965_v7 = vld [vmem:[%s6874_s2 + $0x1d8] sm:$0xff] }
  0x19   :  { %256 = vmatpush.msra.mxu2 %v108_v46  ;;  %297 = vmatpush.msra.mxu3 %v109_v47  ;;  %v3970_v8 = vld [vmem:[%s6874_s2 + $0x1d0] sm:$0xff]  ;;  %v3976_v9 = vld [vmem:[%s6874_s2 + $0x1a0] sm:$0xff]  ;;  %v3981_v10 = vld [vmem:[%s6874_s2 + $0x1a8] sm:$0xff] }
  0x1a   :  { %175 = vmatpush.msra.mxu0 %v102_v48  ;;  %216 = vmatpush.msra.mxu1 %v103_v49  ;;  %v3989_v11 = vld [vmem:[%s6874_s2 + $0x1b8] sm:$0xff]  ;;  %v3994_v12 = vld [vmem:[%s6874_s2 + $0x1b0] sm:$0xff]  ;;  %v83_v13 = vld [vmem:[%s6873_s0 + $0x8] sm:$0xff] }
  0x1b   :  { %257 = vmatpush.msra.mxu2 %v104_v50  ;;  %298 = vmatpush.msra.mxu3 %v105_v51  ;;  %v4006_v14 = vld [vmem:[%s6874_s2 + $0x180] sm:$0xff]  ;;  %v4011_v15 = vld [vmem:[%s6874_s2 + $0x188] sm:$0xff]  ;;  %v4018_v16 = vld [vmem:[%s6874_s2 + $0x198] sm:$0xff] }
  0x1c   :  { %176 = vmatpush.msra.mxu0 %v98_v52  ;;  %217 = vmatpush.msra.mxu1 %v99_v53  ;;  %v4023_v17 = vld [vmem:[%s6874_s2 + $0x190] sm:$0xff]  ;;  %v4028_v18 = vld [vmem:[%s6874_s2 + $0x160] sm:$0xff]  ;;  %v4033_v19 = vld [vmem:[%s6874_s2 + $0x168] sm:$0xff] }
  0x1d   :  { %258 = vmatpush.msra.mxu2 %v100_v54  ;;  %299 = vmatpush.msra.mxu3 %v101_v55  ;;  %v4040_v20 = vld [vmem:[%s6874_s2 + $0x178] sm:$0xff]  ;;  %v4045_v21 = vld [vmem:[%s6874_s2 + $0x170] sm:$0xff]  ;;  %v4051_v22 = vld [vmem:[%s6874_s2 + $0x140] sm:$0xff] }
  0x1e   :  { %177 = vmatpush.msra.mxu0 %v94_v56  ;;  %218 = vmatpush.msra.mxu1 %v95_v57  ;;  %v4056_v23 = vld [vmem:[%s6874_s2 + $0x148] sm:$0xff]  ;;  %v4064_v24 = vld [vmem:[%s6874_s2 + $0x158] sm:$0xff]  ;;  %v4069_v25 = vld [vmem:[%s6874_s2 + $0x150] sm:$0xff] }
  0x1f   :  { %259 = vmatpush.msra.mxu2 %v96_v58  ;;  %300 = vmatpush.msra.mxu3 %v97_v59  ;;  %v84_v26 = vld [vmem:[%s6873_s0 + $0x10] sm:$0xff]  ;;  %v4081_v27 = vld [vmem:[%s6874_s2 + $0x120] sm:$0xff]  ;;  %v4086_v28 = vld [vmem:[%s6874_s2 + $0x128] sm:$0xff] }
  0x20   :  { %178 = vmatpush.msra.mxu0 %v90_v60  ;;  %219 = vmatpush.msra.mxu1 %v91_v61  ;;  %v4093_v29 = vld [vmem:[%s6874_s2 + $0x138] sm:$0xff]  ;;  %v4098_v30 = vld [vmem:[%s6874_s2 + $0x130] sm:$0xff]  ;;  %v4103_v31 = vld [vmem:[%s6874_s2 + $0x100] sm:$0xff] }
  0x21   :  { %260 = vmatpush.msra.mxu2 %v92_v62  ;;  %301 = vmatpush.msra.mxu3 %v93_v63  ;;  %v4108_v32 = vld [vmem:[%s6874_s2 + $0x108] sm:$0xff]  ;;  %v4115_v33 = vld [vmem:[%s6874_s2 + $0x118] sm:$0xff]  ;;  %v4120_v34 = vld [vmem:[%s6874_s2 + $0x110] sm:$0xff] }
  0x22   :  { %179 = vmatmul.f32.vlgmr.msra.gmra.mxu0 %v82_v0  ;;  %220 = vmatmul.f32.vlgmr.msra.gmra.mxu1 %v82_v0  ;;  %v4126_v35 = vld [vmem:[%s6874_s2 + $0xe0] sm:$0xff]  ;;  %v4131_v36 = vld [vmem:[%s6874_s2 + $0xe8] sm:$0xff]  ;;  %v4139_v37 = vld [vmem:[%s6874_s2 + $0xf8] sm:$0xff] }
  0x23   :  { %261 = vmatmul.f32.vlgmr.msra.gmra.mxu2 %v82_v0  ;;  %302 = vmatmul.f32.vlgmr.msra.gmra.mxu3 %v82_v0  ;;  %v4144_v38 = vld [vmem:[%s6874_s2 + $0xf0] sm:$0xff]  ;;  %v85_v39 = vld [vmem:[%s6873_s0 + $0x18] sm:$0xff]  ;;  %v4156_v40 = vld [vmem:[%s6874_s2 + $0xc0] sm:$0xff] }
  0x24   :  { %363 = vmatpush.msrb.mxu0 %v3933_v1  ;;  %383 = vmatpush.msrb.mxu1 %v3938_v2  ;;  %v4161_v41 = vld [vmem:[%s6874_s2 + $0xc8] sm:$0xff]  ;;  %v4168_v42 = vld [vmem:[%s6874_s2 + $0xd8] sm:$0xff]  ;;  %v4173_v43 = vld [vmem:[%s6874_s2 + $0xd0] sm:$0xff] }
  0x25   :  { %423 = vmatpush.msrb.mxu3 %v3943_v3  ;;  %403 = vmatpush.msrb.mxu2 %v3948_v4  ;;  %7145 = vst [vmem:[#allocation4_spill] sm:$0xff] %v4168_v42  ;;  %v4178_v44 = vld [vmem:[%s6874_s2 + $0xa0] sm:$0xff]  ;;  %v4183_v45 = vld [vmem:[%s6874_s2 + $0xa8] sm:$0xff]  ;;  %v4190_v46 = vld [vmem:[%s6874_s2 + $0xb8] sm:$0xff] }
  0x26   :  { %364 = vmatpush.msrb.mxu0 %v3953_v5  ;;  %384 = vmatpush.msrb.mxu1 %v3958_v6  ;;  %7146 = vst [vmem:[#allocation5_spill] sm:$0xff] %v4173_v43  ;;  %v4195_v47 = vld [vmem:[%s6874_s2 + $0xb0] sm:$0xff]  ;;  %v4201_v48 = vld [vmem:[%s6874_s2 + $0x80] sm:$0xff]  ;;  %v4206_v49 = vld [vmem:[%s6874_s2 + $0x88] sm:$0xff] }
  0x27   :  { %424 = vmatpush.msrb.mxu3 %v3965_v7  ;;  %404 = vmatpush.msrb.mxu2 %v3970_v8  ;;  %7147 = vst [vmem:[#allocation6_spill] sm:$0xff] %v4178_v44  ;;  %v4214_v50 = vld [vmem:[%s6874_s2 + $0x98] sm:$0xff]  ;;  %v4219_v51 = vld [vmem:[%s6874_s2 + $0x90] sm:$0xff]  ;;  %v86_v52 = vld [vmem:[%s6873_s0 + $0x20] sm:$0xff] }
  0x28   :  { %365 = vmatpush.msrb.mxu0 %v3976_v9  ;;  %385 = vmatpush.msrb.mxu1 %v3981_v10  ;;  %7148 = vst [vmem:[#allocation7_spill] sm:$0xff] %v4183_v45  ;;  %v4231_v53 = vld [vmem:[%s6874_s2 + $0x60] sm:$0xff]  ;;  %v4236_v54 = vld [vmem:[%s6874_s2 + $0x68] sm:$0xff]  ;;  %v4243_v55 = vld [vmem:[%s6874_s2 + $0x78] sm:$0xff] }
  0x29   :  { %425 = vmatpush.msrb.mxu3 %v3989_v11  ;;  %405 = vmatpush.msrb.mxu2 %v3994_v12  ;;  %7149 = vst [vmem:[#allocation8_spill] sm:$0xff] %v4190_v46  ;;  %v4248_v56 = vld [vmem:[%s6874_s2 + $0x70] sm:$0xff]  ;;  %v4253_v57 = vld [vmem:[%s6874_s2 + $0x40] sm:$0xff]  ;;  %v4258_v58 = vld [vmem:[%s6874_s2 + $0x48] sm:$0xff] }
  0x2a   :  { %182 = vmatmul.f32.gmra.mxu0 %v83_v13  ;;  %223 = vmatmul.f32.gmra.mxu1 %v83_v13  ;;  %7150 = vst [vmem:[#allocation9_spill] sm:$0xff] %v4195_v47  ;;  %v4265_v59 = vld [vmem:[%s6874_s2 + $0x58] sm:$0xff]  ;;  %v4270_v60 = vld [vmem:[%s6874_s2 + $0x50] sm:$0xff]  ;;  %v4276_v61 = vld [vmem:[%s6874_s2 + $0x20] sm:$0xff] }
  0x2b   :  { %264 = vmatmul.f32.gmra.mxu2 %v83_v13  ;;  %305 = vmatmul.f32.gmra.mxu3 %v83_v13  ;;  %7151 = vst [vmem:[#allocation10_spill] sm:$0xff] %v4201_v48  ;;  %v4281_v62 = vld [vmem:[%s6874_s2 + $0x28] sm:$0xff]  ;;  %v4289_v63 = vld [vmem:[%s6874_s2 + $0x30] sm:$0xff]  ;;  %v4294_v0 = vld [vmem:[%s6874_s2 + $0x38] sm:$0xff] }
  0x2c   :  { %366 = vmatpush.msrb.mxu0 %v4006_v14  ;;  %386 = vmatpush.msrb.mxu1 %v4011_v15  ;;  %7152 = vst [vmem:[#allocation11_spill] sm:$0xff] %v4206_v49  ;;  %v87_v13 = vld [vmem:[%s6873_s0 + $0x28] sm:$0xff] }
  0x2d   :  { %426 = vmatpush.msrb.mxu3 %v4018_v16  ;;  %406 = vmatpush.msrb.mxu2 %v4023_v17  ;;  %7153 = vst [vmem:[#allocation12_spill] sm:$0xff] %v4214_v50 }
  0x2e   :  { %367 = vmatpush.msrb.mxu0 %v4028_v18  ;;  %387 = vmatpush.msrb.mxu1 %v4033_v19  ;;  %7154 = vst [vmem:[#allocation13_spill] sm:$0xff] %v4219_v51 }
  0x2f   :  { %427 = vmatpush.msrb.mxu3 %v4040_v20  ;;  %407 = vmatpush.msrb.mxu2 %v4045_v21  ;;  %7155 = vst [vmem:[#allocation14_spill] sm:$0xff] %v4231_v53 }
  0x30   :  { %368 = vmatpush.msrb.mxu0 %v4051_v22  ;;  %388 = vmatpush.msrb.mxu1 %v4056_v23  ;;  %7156 = vst [vmem:[#allocation15_spill] sm:$0xff] %v4236_v54 }
  0x31   :  { %428 = vmatpush.msrb.mxu3 %v4064_v24  ;;  %408 = vmatpush.msrb.mxu2 %v4069_v25  ;;  %7157 = vst [vmem:[#allocation16_spill] sm:$0xff] %v4243_v55 }
  0x32   :  { %185 = vmatmul.f32.gmra.mxu0 %v84_v26  ;;  %226 = vmatmul.f32.gmra.mxu1 %v84_v26  ;;  %7158 = vst [vmem:[#allocation17_spill] sm:$0xff] %v4248_v56 }
  0x33   :  { %267 = vmatmul.f32.gmra.mxu2 %v84_v26  ;;  %308 = vmatmul.f32.gmra.mxu3 %v84_v26  ;;  %7159 = vst [vmem:[#allocation18_spill] sm:$0xff] %v4253_v57  ;;  %v4306_v26 = vld [vmem:[%s6874_s2] sm:$0xff] }
  0x34   :  { %369 = vmatpush.msrb.mxu0 %v4081_v27  ;;  %389 = vmatpush.msrb.mxu1 %v4086_v28  ;;  %7160 = vst [vmem:[#allocation19_spill] sm:$0xff] %v4258_v58 }
  0x35   :  { %429 = vmatpush.msrb.mxu3 %v4093_v29  ;;  %409 = vmatpush.msrb.mxu2 %v4098_v30  ;;  %7161 = vst [vmem:[#allocation20_spill] sm:$0xff] %v4265_v59 }
  0x36   :  { %370 = vmatpush.msrb.mxu0 %v4103_v31  ;;  %390 = vmatpush.msrb.mxu1 %v4108_v32  ;;  %7162 = vst [vmem:[#allocation21_spill] sm:$0xff] %v4270_v60 }
  0x37   :  { %430 = vmatpush.msrb.mxu3 %v4115_v33  ;;  %410 = vmatpush.msrb.mxu2 %v4120_v34  ;;  %7163 = vst [vmem:[#allocation22_spill] sm:$0xff] %v4276_v61 }
  0x38   :  { %371 = vmatpush.msrb.mxu0 %v4126_v35  ;;  %391 = vmatpush.msrb.mxu1 %v4131_v36  ;;  %7164 = vst [vmem:[#allocation23_spill] sm:$0xff] %v4281_v62 }
  0x39   :  { %431 = vmatpush.msrb.mxu3 %v4139_v37  ;;  %411 = vmatpush.msrb.mxu2 %v4144_v38  ;;  %7165 = vst [vmem:[#allocation24_spill] sm:$0xff] %v4289_v63 }
  0x3a   :  { %188 = vmatmul.f32.gmra.mxu0 %v85_v39  ;;  %229 = vmatmul.f32.gmra.mxu1 %v85_v39  ;;  %7166 = vst [vmem:[#allocation25_spill] sm:$0xff] %v4294_v0 }
  0x3b   :  { %270 = vmatmul.f32.gmra.mxu2 %v85_v39  ;;  %311 = vmatmul.f32.gmra.mxu3 %v85_v39  ;;  %7167 = vst [vmem:[#allocation26_spill] sm:$0xff] %v4306_v26  ;;  %v4311_v39 = vld [vmem:[%s6874_s2 + $0x8] sm:$0xff] }
  0x3c   :  { %372 = vmatpush.msrb.mxu0 %v4156_v40  ;;  %392 = vmatpush.msrb.mxu1 %v4161_v41  ;;  %7168 = vst [vmem:[#allocation27_spill] sm:$0xff] %v4311_v39 }
  0x3d   :  { %432 = vmatpush.msrb.mxu3 %v4168_v42  ;;  %412 = vmatpush.msrb.mxu2 %v4173_v43 }
  0x3e   :  { %373 = vmatpush.msrb.mxu0 %v4178_v44  ;;  %393 = vmatpush.msrb.mxu1 %v4183_v45 }
  0x3f   :  { %433 = vmatpush.msrb.mxu3 %v4190_v46  ;;  %413 = vmatpush.msrb.mxu2 %v4195_v47 }
  0x40   :  { %374 = vmatpush.msrb.mxu0 %v4201_v48  ;;  %394 = vmatpush.msrb.mxu1 %v4206_v49 }
  0x41   :  { %434 = vmatpush.msrb.mxu3 %v4214_v50  ;;  %414 = vmatpush.msrb.mxu2 %v4219_v51 }
  0x42   :  { %191 = vmatmul.f32.gmra.mxu0 %v86_v52  ;;  %232 = vmatmul.f32.gmra.mxu1 %v86_v52 }
  0x43   :  { %273 = vmatmul.f32.gmra.mxu2 %v86_v52  ;;  %314 = vmatmul.f32.gmra.mxu3 %v86_v52  ;;  %v4318_v52 = vld [vmem:[%s6874_s2 + $0x10] sm:$0xff] }
  0x44   :  { %375 = vmatpush.msrb.mxu0 %v4231_v53  ;;  %395 = vmatpush.msrb.mxu1 %v4236_v54  ;;  %7169 = vst [vmem:[#allocation28_spill] sm:$0xff] %v4318_v52 }
  0x45   :  { %435 = vmatpush.msrb.mxu3 %v4243_v55  ;;  %415 = vmatpush.msrb.mxu2 %v4248_v56 }
  0x46   :  { %376 = vmatpush.msrb.mxu0 %v4253_v57  ;;  %396 = vmatpush.msrb.mxu1 %v4258_v58 }
  0x47   :  { %436 = vmatpush.msrb.mxu3 %v4265_v59  ;;  %416 = vmatpush.msrb.mxu2 %v4270_v60 }
  0x48   :  { %377 = vmatpush.msrb.mxu0 %v4276_v61  ;;  %397 = vmatpush.msrb.mxu1 %v4281_v62  ;;  %v4323_v62 = vld [vmem:[%s6874_s2 + $0x18] sm:$0xff] }
  0x49   :  { %417 = vmatpush.msrb.mxu2 %v4289_v63  ;;  %437 = vmatpush.msrb.mxu3 %v4294_v0  ;;  %7170 = vst [vmem:[#allocation29_spill] sm:$0xff] %v4323_v62  ;;  %v88_v0 = vld [vmem:[%s6873_s0 + $0x30] sm:$0xff] }
  0x4a   :  { %194 = vmatmul.f32.gmra.mxu0 %v87_v13  ;;  %235 = vmatmul.f32.gmra.mxu1 %v87_v13 }
  0x4b   :  { %276 = vmatmul.f32.gmra.mxu2 %v87_v13  ;;  %317 = vmatmul.f32.gmra.mxu3 %v87_v13  ;;  %v89_v13 = vld [vmem:[%s6873_s0 + $0x38] sm:$0xff] }
  0x4c   :  { %378 = vmatpush.msrb.mxu0 %v4306_v26  ;;  %398 = vmatpush.msrb.mxu1 %v4311_v39 }
  0x4d   :  { %418 = vmatpush.msrb.mxu2 %v4318_v52  ;;  %438 = vmatpush.msrb.mxu3 %v4323_v62 }
  0x4e   :  { %516 = vmatpush.msra.mxu0 %v3933_v1  ;;  %536 = vmatpush.msra.mxu1 %v3938_v2 }
  0x4f   :  { %556 = vmatpush.msra.mxu2 %v3948_v4  ;;  %576 = vmatpush.msra.mxu3 %v3943_v3 }
  0x50   :  { %517 = vmatpush.msra.mxu0 %v3953_v5  ;;  %537 = vmatpush.msra.mxu1 %v3958_v6 }
  0x51   :  { %557 = vmatpush.msra.mxu2 %v3970_v8  ;;  %577 = vmatpush.msra.mxu3 %v3965_v7 }
  0x52   :  { %197 = vmatmul.f32.gmra.mxu0 %v88_v0  ;;  %238 = vmatmul.f32.gmra.mxu1 %v88_v0 }
  0x53   :  { %279 = vmatmul.f32.gmra.mxu2 %v88_v0  ;;  %320 = vmatmul.f32.gmra.mxu3 %v88_v0  ;;  %v6881_v0 = vmov 0.0  }
  0x54   :  { %518 = vmatpush.msra.mxu0 %v3976_v9  ;;  %538 = vmatpush.msra.mxu1 %v3981_v10 }
  0x55   :  { %558 = vmatpush.msra.mxu2 %v3994_v12  ;;  %578 = vmatpush.msra.mxu3 %v3989_v11 }
  0x56   :  { %519 = vmatpush.msra.mxu0 %v4006_v14  ;;  %539 = vmatpush.msra.mxu1 %v4011_v15 }
  0x57   :  { %559 = vmatpush.msra.mxu2 %v4023_v17  ;;  %579 = vmatpush.msra.mxu3 %v4018_v16 }
  0x58   :  { %520 = vmatpush.msra.mxu0 %v4028_v18  ;;  %540 = vmatpush.msra.mxu1 %v4033_v19 }
  0x59   :  { %560 = vmatpush.msra.mxu2 %v4045_v21  ;;  %580 = vmatpush.msra.mxu3 %v4040_v20 }
  0x5a   :  { %200 = vmatmul.f32.gmra.mxu0 %v89_v13  ;;  %241 = vmatmul.f32.gmra.mxu1 %v89_v13 }
  0x5b   :  { %282 = vmatmul.f32.gmra.mxu2 %v89_v13  ;;  %323 = vmatmul.f32.gmra.mxu3 %v89_v13  ;;  %v7171_v13 = vld [vmem:[#allocation23_spill] sm:$0xff] }
  0x5c   :  { %521 = vmatpush.msra.mxu0 %v4051_v22  ;;  %541 = vmatpush.msra.mxu1 %v4056_v23 }
  0x5d   :  { %561 = vmatpush.msra.mxu2 %v4069_v25  ;;  %581 = vmatpush.msra.mxu3 %v4064_v24 }
  0x5e   :  { %522 = vmatpush.msra.mxu0 %v4081_v27  ;;  %542 = vmatpush.msra.mxu1 %v4086_v28 }
  0x5f   :  { %562 = vmatpush.msra.mxu2 %v4098_v30  ;;  %582 = vmatpush.msra.mxu3 %v4093_v29 }
  0x60   :  { %523 = vmatpush.msra.mxu0 %v4103_v31  ;;  %543 = vmatpush.msra.mxu1 %v4108_v32 }
  0x61   :  { %563 = vmatpush.msra.mxu2 %v4120_v34  ;;  %583 = vmatpush.msra.mxu3 %v4115_v33 }
  0x62   :  { %379 = vmatmul.f32.vlgmr.msrb.gmra.mxu0 %v6881_v0  ;;  %399 = vmatmul.f32.vlgmr.msrb.gmra.mxu1 %v6881_v0 }
  0x63   :  { %419 = vmatmul.f32.vlgmr.msrb.gmra.mxu2 %v6881_v0  ;;  %439 = vmatmul.f32.vlgmr.msrb.gmra.mxu3 %v6881_v0  ;;  %v7172_v0 = vld [vmem:[#allocation25_spill] sm:$0xff] }
  0x64   :  { %524 = vmatpush.msra.mxu0 %v4126_v35  ;;  %544 = vmatpush.msra.mxu1 %v4131_v36 }
  0x65   :  { %564 = vmatpush.msra.mxu2 %v4144_v38  ;;  %584 = vmatpush.msra.mxu3 %v4139_v37 }
  0x66   :  { %525 = vmatpush.msra.mxu0 %v4156_v40  ;;  %545 = vmatpush.msra.mxu1 %v4161_v41 }
  0x67   :  { %565 = vmatpush.msra.mxu2 %v4173_v43  ;;  %585 = vmatpush.msra.mxu3 %v4168_v42 }
  0x68   :  { %526 = vmatpush.msra.mxu0 %v4178_v44  ;;  %546 = vmatpush.msra.mxu1 %v4183_v45 }
  0x69   :  { %566 = vmatpush.msra.mxu2 %v4195_v47  ;;  %586 = vmatpush.msra.mxu3 %v4190_v46 }
  0x6a   :  { %527 = vmatpush.msra.mxu0 %v4201_v48  ;;  %547 = vmatpush.msra.mxu1 %v4206_v49 }
  0x6b   :  { %567 = vmatpush.msra.mxu2 %v4219_v51  ;;  %587 = vmatpush.msra.mxu3 %v4214_v50 }
  0x6c   :  { %528 = vmatpush.msra.mxu0 %v4231_v53  ;;  %548 = vmatpush.msra.mxu1 %v4236_v54 }
  0x6d   :  { %568 = vmatpush.msra.mxu2 %v4248_v56  ;;  %588 = vmatpush.msra.mxu3 %v4243_v55 }
  0x6e   :  { %529 = vmatpush.msra.mxu0 %v4253_v57  ;;  %549 = vmatpush.msra.mxu1 %v4258_v58 }
  0x6f   :  { %569 = vmatpush.msra.mxu2 %v4270_v60  ;;  %589 = vmatpush.msra.mxu3 %v4265_v59 }
  0x70   :  { %530 = vmatpush.msra.mxu0 %v4276_v61  ;;  %550 = vmatpush.msra.mxu1 %v7171_v13 }
  0x71   :  { %570 = vmatpush.msra.mxu2 %v4289_v63  ;;  %590 = vmatpush.msra.mxu3 %v7172_v0 }
  0x72   :  { %531 = vmatpush.msra.mxu0 %v4306_v26  ;;  %551 = vmatpush.msra.mxu1 %v4311_v39 }
  0x73   :  { %571 = vmatpush.msra.mxu2 %v4318_v52  ;;  %591 = vmatpush.msra.mxu3 %v4323_v62 }
  0x74   :  { %670 = vmatpush.msrb.mxu0 %v3933_v1  ;;  %690 = vmatpush.msrb.mxu1 %v3938_v2 }
  0x75   :  { %710 = vmatpush.msrb.mxu2 %v3948_v4  ;;  %730 = vmatpush.msrb.mxu3 %v3943_v3 }
  0x76   :  { %671 = vmatpush.msrb.mxu0 %v3953_v5  ;;  %691 = vmatpush.msrb.mxu1 %v3958_v6 }
  0x77   :  { %711 = vmatpush.msrb.mxu2 %v3970_v8  ;;  %731 = vmatpush.msrb.mxu3 %v3965_v7 }
  0x78   :  { %672 = vmatpush.msrb.mxu0 %v3976_v9  ;;  %692 = vmatpush.msrb.mxu1 %v3981_v10 }
  0x79   :  { %712 = vmatpush.msrb.mxu2 %v3994_v12  ;;  %732 = vmatpush.msrb.mxu3 %v3989_v11 }
  0x7a   :  { %673 = vmatpush.msrb.mxu0 %v4006_v14  ;;  %693 = vmatpush.msrb.mxu1 %v4011_v15 }
  0x7b   :  { %713 = vmatpush.msrb.mxu2 %v4023_v17  ;;  %733 = vmatpush.msrb.mxu3 %v4018_v16 }
  0x7c   :  { %674 = vmatpush.msrb.mxu0 %v4028_v18  ;;  %694 = vmatpush.msrb.mxu1 %v4033_v19 }
  0x7d   :  { %714 = vmatpush.msrb.mxu2 %v4045_v21  ;;  %734 = vmatpush.msrb.mxu3 %v4040_v20 }
  0x7e   :  { %675 = vmatpush.msrb.mxu0 %v4051_v22  ;;  %695 = vmatpush.msrb.mxu1 %v4056_v23 }
  0x7f   :  { %715 = vmatpush.msrb.mxu2 %v4069_v25  ;;  %735 = vmatpush.msrb.mxu3 %v4064_v24 }
  0x80   :  { %676 = vmatpush.msrb.mxu0 %v4081_v27  ;;  %696 = vmatpush.msrb.mxu1 %v4086_v28 }
  0x81   :  { %716 = vmatpush.msrb.mxu2 %v4098_v30  ;;  %736 = vmatpush.msrb.mxu3 %v4093_v29 }
  0x82   :  { %677 = vmatpush.msrb.mxu0 %v4103_v31  ;;  %697 = vmatpush.msrb.mxu1 %v4108_v32 }
  0x83   :  { %717 = vmatpush.msrb.mxu2 %v4120_v34  ;;  %737 = vmatpush.msrb.mxu3 %v4115_v33 }
  0x84   :  { %678 = vmatpush.msrb.mxu0 %v4126_v35  ;;  %698 = vmatpush.msrb.mxu1 %v4131_v36 }
  0x85   :  { %718 = vmatpush.msrb.mxu2 %v4144_v38  ;;  %738 = vmatpush.msrb.mxu3 %v4139_v37 }
  0x86   :  { %679 = vmatpush.msrb.mxu0 %v4156_v40  ;;  %699 = vmatpush.msrb.mxu1 %v4161_v41 }
  0x87   :  { %719 = vmatpush.msrb.mxu2 %v4173_v43  ;;  %739 = vmatpush.msrb.mxu3 %v4168_v42 }
  0x88   :  { %680 = vmatpush.msrb.mxu0 %v4178_v44  ;;  %700 = vmatpush.msrb.mxu1 %v4183_v45 }
  0x89   :  { %720 = vmatpush.msrb.mxu2 %v4195_v47  ;;  %740 = vmatpush.msrb.mxu3 %v4190_v46 }
  0x8a   :  { %681 = vmatpush.msrb.mxu0 %v4201_v48  ;;  %701 = vmatpush.msrb.mxu1 %v4206_v49 }
  0x8b   :  { %721 = vmatpush.msrb.mxu2 %v4219_v51  ;;  %741 = vmatpush.msrb.mxu3 %v4214_v50 }
  0x8c   :  { %682 = vmatpush.msrb.mxu0 %v4231_v53  ;;  %702 = vmatpush.msrb.mxu1 %v4236_v54 }
  0x8d   :  { %722 = vmatpush.msrb.mxu2 %v4248_v56  ;;  %742 = vmatpush.msrb.mxu3 %v4243_v55 }
  0x8e   :  { %683 = vmatpush.msrb.mxu0 %v4253_v57  ;;  %703 = vmatpush.msrb.mxu1 %v4258_v58 }
  0x8f   :  { %723 = vmatpush.msrb.mxu2 %v4270_v60  ;;  %743 = vmatpush.msrb.mxu3 %v4265_v59 }
  0x90   :  { %684 = vmatpush.msrb.mxu0 %v4276_v61  ;;  %704 = vmatpush.msrb.mxu1 %v7171_v13 }
  0x91   :  { %724 = vmatpush.msrb.mxu2 %v4289_v63  ;;  %744 = vmatpush.msrb.mxu3 %v7172_v0 }
  0x92   :  { %685 = vmatpush.msrb.mxu0 %v4306_v26  ;;  %705 = vmatpush.msrb.mxu1 %v4311_v39 }
  0x93   :  { %725 = vmatpush.msrb.mxu2 %v4318_v52  ;;  %745 = vmatpush.msrb.mxu3 %v4323_v62 }
  0x9f   :  { %v180_v58 = vpop.f32.mrf.mxu0  ;;  %v221_v60 = vpop.f32.mrf.mxu1 }
  0xa6   :  { %v262_v57 = vpop.f32.mrf.mxu2  ;;  %v303_v59 = vpop.f32.mrf.mxu3 }
  0xa7   :  { %v4467_v55 = vpop.f32.mrf.mxu0  ;;  %v4469_v61 = vpop.f32.mrf.mxu1 }
  0xa8   :  { %7173 = vst [vmem:[#allocation30_spill] sm:$0xff] %v4467_v55 }
  0xa9   :  { %7174 = vst [vmem:[#allocation31_spill] sm:$0xff] %v4469_v61 }
  0xae   :  { %v4471_v13 = vpop.f32.mrf.mxu2  ;;  %v4473_v63 = vpop.f32.mrf.mxu3 }
  0xaf   :  { %7175 = vst [vmem:[#allocation32_spill] sm:$0xff] %v4471_v13  ;;  %v4475_v0 = vpop.f32.mrf.mxu0  ;;  %v4477_v26 = vpop.f32.mrf.mxu1 }
  0xb0   :  { %7176 = vst [vmem:[#allocation33_spill] sm:$0xff] %v4473_v63 }
  0xb1   :  { %7177 = vst [vmem:[#allocation34_spill] sm:$0xff] %v4475_v0 }
  0xb2   :  { %7178 = vst [vmem:[#allocation35_spill] sm:$0xff] %v4477_v26 }
  0xb6   :  { %v4479_v39 = vpop.f32.mrf.mxu2  ;;  %v4481_v52 = vpop.f32.mrf.mxu3 }
  0xb7   :  { %7179 = vst [vmem:[#allocation36_spill] sm:$0xff] %v4479_v39  ;;  %v4483_v62 = vpop.f32.mrf.mxu0  ;;  %v4485_v56 = vpop.f32.mrf.mxu1 }
  0xb8   :  { %7180 = vst [vmem:[#allocation37_spill] sm:$0xff] %v4481_v52 }
  0xb9   :  { %7181 = vst [vmem:[#allocation38_spill] sm:$0xff] %v4483_v62 }
  0xba   :  { %7182 = vst [vmem:[#allocation39_spill] sm:$0xff] %v4485_v56 }
  0xbe   :  { %v4487_v54 = vpop.f32.mrf.mxu2  ;;  %v4489_v55 = vpop.f32.mrf.mxu3 }
  0xbf   :  { %7183 = vst [vmem:[#allocation40_spill] sm:$0xff] %v4487_v54  ;;  %v4491_v61 = vpop.f32.mrf.mxu0  ;;  %v4493_v13 = vpop.f32.mrf.mxu1 }
  0xc0   :  { %7184 = vst [vmem:[#allocation41_spill] sm:$0xff] %v4489_v55 }
  0xc1   :  { %7185 = vst [vmem:[#allocation42_spill] sm:$0xff] %v4491_v61 }
  0xc2   :  { %7186 = vst [vmem:[#allocation43_spill] sm:$0xff] %v4493_v13 }
  0xc6   :  { %v4495_v63 = vpop.f32.mrf.mxu3  ;;  %v4501_v39 = vpop.f32.mrf.mxu2 }
  0xc7   :  { %7187 = vst [vmem:[#allocation44_spill] sm:$0xff] %v4495_v63  ;;  %v4497_v0 = vpop.f32.mrf.mxu0  ;;  %v4499_v26 = vpop.f32.mrf.mxu1  ;;  %v81_v63 = vld [vmem:[%s6875_s3] sm:$0xf] }
  0xc8   :  { %7188 = vst [vmem:[#allocation45_spill] sm:$0xff] %v4497_v0  ;;  %v4530_v51 = vperm.slane %v81_v63, 3 }
  0xc9   :  { %7189 = vst [vmem:[#allocation46_spill] sm:$0xff] %v4499_v26  ;;  %v4520_v26 = vperm.slane %v81_v63, 0 }
  0xca   :  { %7190 = vst [vmem:[#allocation47_spill] sm:$0xff] %v4501_v39  ;;  %v4522_v39 = vperm.slane %v81_v63, 1  ;;  %v304_v49 = vadd.f32 %v303_v59, %v4530_v51 }
  0xcb   :  { %7198 = vst [vmem:[#allocation55_spill] sm:$0xff] %v4520_v26 }
  0xcc   :  { %7199 = vst [vmem:[#allocation56_spill] sm:$0xff] %v4522_v39 }
  0xcd   :  { %7202 = vst [vmem:[#allocation59_spill] sm:$0xff] %v4530_v51 }
  0xce   :  { %v4503_v52 = vpop.f32.mrf.mxu3  ;;  %v4509_v54 = vpop.f32.mrf.mxu2 }
  0xcf   :  { %7191 = vst [vmem:[#allocation48_spill] sm:$0xff] %v4503_v52  ;;  %v4505_v62 = vpop.f32.mrf.mxu0  ;;  %v4507_v56 = vpop.f32.mrf.mxu1 }
  0xd0   :  { %7192 = vst [vmem:[#allocation49_spill] sm:$0xff] %v4505_v62  ;;  %v222_v62 = vadd.f32 %v221_v60, %v4522_v39 }
  0xd1   :  { %7193 = vst [vmem:[#allocation50_spill] sm:$0xff] %v4507_v56  ;;  %v181_v56 = vadd.f32 %v180_v58, %v4520_v26 }
  0xd2   :  { %7194 = vst [vmem:[#allocation51_spill] sm:$0xff] %v4509_v54 }
  0xd6   :  { %v4511_v55 = vpop.f32.mrf.mxu3  ;;  %v4524_v52 = vpop.f32.mrf.mxu2 }
  0xd7   :  { %7195 = vst [vmem:[#allocation52_spill] sm:$0xff] %v4511_v55  ;;  %v4516_v13 = vpop.f32.mrf.mxu0  ;;  %v4518_v0 = vpop.f32.mrf.mxu1 }
  0xd8   :  { %7196 = vst [vmem:[#allocation53_spill] sm:$0xff] %v4516_v13 }
  0xd9   :  { %7197 = vst [vmem:[#allocation54_spill] sm:$0xff] %v4518_v0 }
  0xda   :  { %7200 = vst [vmem:[#allocation57_spill] sm:$0xff] %v4524_v52 }
  0xde   :  { %v4528_v54 = vpop.f32.mrf.mxu3  ;;  %v4533_v48 = vpop.f32.mrf.mxu2 }
  0xdf   :  { %7201 = vst [vmem:[#allocation58_spill] sm:$0xff] %v4528_v54  ;;  %v380_v55 = vpop.f32.mrf.mxu0  ;;  %v400_v61 = vpop.f32.mrf.mxu1 }
  0xe0   :  { %v443_v53 = vadd.f32 %v380_v55, %v181_v56  ;;  %v444_v50 = vadd.f32 %v400_v61, %v222_v62  ;;  %7203 = vst [vmem:[#allocation60_spill] sm:$0xff] %v4533_v48  ;;  %v4535_v55 = vperm.slane %v81_v63, 2 }
  0xe2   :  { %v3147_v13 = vmul.f32 -1.442695, %v443_v53  ;;  %v3148_v0 = vmul.f32 -1.442695, %v444_v50  ;;  %7204 = vst [vmem:[#allocation61_spill] sm:$0xff] %v4535_v55  ;;  %v263_v56 = vadd.f32 %v262_v57, %v4535_v55 }
  0xe4   :  { %3325 = vpow2.f32 %v3147_v13 }
  0xe5   :  { %3327 = vpow2.f32 %v3148_v0 }
  0xe6   :  { %v440_v52 = vpop.f32.mrf.mxu3  ;;  %v420_v53 = vpop.f32.mrf.mxu2 }
  0xe7   :  { %v446_v58 = vadd.f32 %v440_v52, %v304_v49  ;;  %v445_v62 = vadd.f32 %v420_v53, %v263_v56 }
  0xe9   :  { %v3149_v26 = vmul.f32 -1.442695, %v446_v58 }
  0xea   :  { %v3326_v60 = vpop.eup %3325 }
  0xeb   :  { %v3328_v39 = vpop.eup %3327  ;;  %v450_v54 = vadd.f32 1.0, %v3326_v60  ;;  %3329 = vpow2.f32 %v3149_v26 }
  0xec   :  { %v469_v46 = vadd.f32 1.0, %v3328_v39 }
  0xed   :  { %3331 = vrcp.f32 %v450_v54  ;;  %v462_v60 = vand.u32 2147483648, %v450_v54  ;;  %v460_v39 = vand.u32 2147483647, %v450_v54  ;;  %vm456_vm2 = vweird.f32 %v450_v54 }
  0xee   :  { %3333 = vrcp.f32 %v469_v46  ;;  %v481_v26 = vand.u32 2147483648, %v469_v46  ;;  %v479_v51 = vand.u32 2147483647, %v469_v46  ;;  %vm475_vm3 = vweird.f32 %v469_v46 }
  0xef   :  { %v463_v53 = vor.u32 1.1754944e-38, %v462_v60  ;;  %vm461_vm5 = vcmp.eq.f32.partialorder %v460_v39, 8.507059e+37 }
  0xf0   :  { %v482_v55 = vor.u32 1.1754944e-38, %v481_v26  ;;  %vm480_vm7 = vcmp.eq.f32.partialorder %v479_v51, 8.507059e+37 }
  0xf1   :  { %v3330_v50 = vpop.eup %3329 }
  0xf2   :  { %v489_v59 = vadd.f32 1.0, %v3330_v50 }
  0xf3   :  { %v3332_v61 = vpop.eup %3331 }
  0xf4   :  { %v3334_v0 = vpop.eup %3333  ;;  %v452_v13 = vmul.f32 %v3332_v61, %v450_v54  ;;  %3335 = vrcp.f32 %v489_v59  ;;  %vm457_vm0 = vweird.f32 %v3332_v61  ;;  %vm495_vm9 = vweird.f32 %v489_v59 }
  0xf5   :  { %v471_v49 = vmul.f32 %v3334_v0, %v469_v46  ;;  %3337 = vtanh.f32 %v445_v62  ;;  %vm476_vm1 = vweird.f32 %v3334_v0  ;;  %vm458_vm4 = vmor %vm456_vm2, %vm457_vm0  ;;  %v499_v54 = vand.u32 2147483647, %v489_v59 }
  0xf6   :  { %v453_v52 = vsub.f32 1.0, %v452_v13  ;;  %vm477_vm6 = vmor %vm475_vm3, %vm476_vm1 }
  0xf7   :  { %v472_v58 = vsub.f32 1.0, %v471_v49  ;;  %vm500_vm11 = vcmp.eq.f32.partialorder %v499_v54, 8.507059e+37 }
  0xf8   :  { %v454_v63 = vmul.f32 %v3332_v61, %v453_v52 }
  0xf9   :  { %v473_v48 = vmul.f32 %v3334_v0, %v472_v58 }
  0xfa   :  { %v3336_v47 = vpop.eup %3335  ;;  %v455_v57 = vadd.f32 %v3332_v61, %v454_v63 }
  0xfb   :  { %v474_v50 = vadd.f32 %v3334_v0, %v473_v48  ;;  %v491_v56 = vmul.f32 %v3336_v47, %v489_v59  ;;  %v3338_v62 = vpop.eup %3337  ;;  %vm496_vm8 = vweird.f32 %v3336_v47  ;;  %v501_v48 = vand.u32 2147483648, %v489_v59 }
  0xfc   :  { %v459_v13 = vsel %vm458_vm4, %v3332_v61, %v455_v57  ;;  %vm497_vm10 = vmor %vm495_vm9, %vm496_vm8 }
  0xfd   :  { %v464_v49 = vsel %vm461_vm5, %v463_v53, %v459_v13  ;;  %v478_v52 = vsel %vm477_vm6, %v3334_v0, %v474_v50  ;;  %v492_v45 = vsub.f32 1.0, %v491_v56  ;;  %v502_v60 = vor.u32 1.1754944e-38, %v501_v48  ;;  %v7238_v13 = vld [vmem:[#allocation61_spill] sm:$0xff] }
  0xfe   :  { %v483_v58 = vsel %vm480_vm7, %v482_v55, %v478_v52  ;;  %v506_v44 = vmul.f32 %v3338_v62, %v464_v49  ;;  %v7239_v62 = vld [vmem:[#allocation32_spill] sm:$0xff] }
  0xff   :  { %v505_v42 = vmul.f32 0.0, %v483_v58  ;;  %v493_v43 = vmul.f32 %v3336_v47, %v492_v45  ;;  %v266_v49 = vadd.f32 %v7239_v62, %v7238_v13 }
 0x101   :  { %v4538_v63 = vadd.f32 %v506_v44, %v505_v42  ;;  %v494_v46 = vadd.f32 %v3336_v47, %v493_v43  ;;  %v7236_v42 = vld [vmem:[#allocation59_spill] sm:$0xff]  ;;  %v7237_v43 = vld [vmem:[#allocation33_spill] sm:$0xff] }
 0x102   :  { %v307_v44 = vadd.f32 %v7237_v43, %v7236_v42 }
 0x103   :  { %3339 = vtanh.f32 %v4538_v63  ;;  %v498_v61 = vsel %vm497_vm10, %v3336_v47, %v494_v46 }
 0x104   :  { %v503_v51 = vsel %vm500_vm11, %v502_v60, %v498_v61 }
 0x109   :  { %v3340_v0 = vpop.eup %3339 }
 0x10a   :  { %v4541_v26 = vmul.f32 %v3340_v0, %v503_v51 }
 0x10c   :  { %7205 = vst [vmem:[#allocation62_spill] sm:$0xff] %v4541_v26  ;;  %532 = vmatmul.f32.vlgmr.msra.gmra.mxu0 %v4541_v26  ;;  %552 = vmatmul.f32.vlgmr.msra.gmra.mxu1 %v4541_v26 }
 0x10d   :  { %572 = vmatmul.f32.vlgmr.msra.gmra.mxu2 %v4541_v26  ;;  %592 = vmatmul.f32.vlgmr.msra.gmra.mxu3 %v4541_v26  ;;  %v4830_v26 = vld [vmem:[%s6874_s2 + $0xe8] sm:$0xff] }
 0x10e   :  { %824 = vmatpush.msra.mxu0 %v3933_v1  ;;  %844 = vmatpush.msra.mxu1 %v3938_v2  ;;  %v7206_v1 = vld [vmem:[#allocation5_spill] sm:$0xff]  ;;  %v7207_v2 = vld [vmem:[#allocation4_spill] sm:$0xff] }
 0x10f   :  { %864 = vmatpush.msra.mxu2 %v3948_v4  ;;  %884 = vmatpush.msra.mxu3 %v3943_v3  ;;  %v7208_v3 = vld [vmem:[#allocation6_spill] sm:$0xff]  ;;  %v7209_v4 = vld [vmem:[#allocation7_spill] sm:$0xff] }
 0x110   :  { %825 = vmatpush.msra.mxu0 %v3953_v5  ;;  %845 = vmatpush.msra.mxu1 %v3958_v6  ;;  %v7210_v5 = vld [vmem:[#allocation9_spill] sm:$0xff]  ;;  %v7211_v6 = vld [vmem:[#allocation8_spill] sm:$0xff] }
 0x111   :  { %865 = vmatpush.msra.mxu2 %v3970_v8  ;;  %885 = vmatpush.msra.mxu3 %v3965_v7  ;;  %v7212_v7 = vld [vmem:[#allocation10_spill] sm:$0xff]  ;;  %v7213_v8 = vld [vmem:[#allocation11_spill] sm:$0xff]  ;;  %7244 = vst [vmem:[#allocation9_spill] sm:$0xff] %v4830_v26 }
 0x112   :  { %826 = vmatpush.msra.mxu0 %v3976_v9  ;;  %846 = vmatpush.msra.mxu1 %v3981_v10  ;;  %v7214_v9 = vld [vmem:[#allocation13_spill] sm:$0xff]  ;;  %v7215_v10 = vld [vmem:[#allocation12_spill] sm:$0xff] }
 0x113   :  { %866 = vmatpush.msra.mxu2 %v3994_v12  ;;  %886 = vmatpush.msra.mxu3 %v3989_v11  ;;  %v7216_v11 = vld [vmem:[#allocation14_spill] sm:$0xff]  ;;  %v7217_v12 = vld [vmem:[#allocation15_spill] sm:$0xff] }
 0x114   :  { %827 = vmatpush.msra.mxu0 %v4006_v14  ;;  %847 = vmatpush.msra.mxu1 %v4011_v15  ;;  %v7218_v14 = vld [vmem:[#allocation17_spill] sm:$0xff]  ;;  %v7219_v15 = vld [vmem:[#allocation16_spill] sm:$0xff] }
 0x115   :  { %867 = vmatpush.msra.mxu2 %v4023_v17  ;;  %887 = vmatpush.msra.mxu3 %v4018_v16  ;;  %v7220_v16 = vld [vmem:[#allocation18_spill] sm:$0xff]  ;;  %v7221_v17 = vld [vmem:[#allocation19_spill] sm:$0xff] }
 0x116   :  { %828 = vmatpush.msra.mxu0 %v4028_v18  ;;  %848 = vmatpush.msra.mxu1 %v4033_v19  ;;  %v7222_v18 = vld [vmem:[#allocation21_spill] sm:$0xff]  ;;  %v7223_v19 = vld [vmem:[#allocation20_spill] sm:$0xff] }
 0x117   :  { %868 = vmatpush.msra.mxu2 %v4045_v21  ;;  %888 = vmatpush.msra.mxu3 %v4040_v20  ;;  %v7224_v20 = vld [vmem:[#allocation22_spill] sm:$0xff]  ;;  %v7225_v21 = vld [vmem:[#allocation23_spill] sm:$0xff] }
 0x118   :  { %829 = vmatpush.msra.mxu0 %v4051_v22  ;;  %849 = vmatpush.msra.mxu1 %v4056_v23  ;;  %v7226_v22 = vld [vmem:[#allocation24_spill] sm:$0xff]  ;;  %v7227_v23 = vld [vmem:[#allocation25_spill] sm:$0xff] }
 0x119   :  { %869 = vmatpush.msra.mxu2 %v4069_v25  ;;  %889 = vmatpush.msra.mxu3 %v4064_v24  ;;  %v7228_v24 = vld [vmem:[#allocation26_spill] sm:$0xff]  ;;  %v7229_v25 = vld [vmem:[#allocation27_spill] sm:$0xff] }
 0x11a   :  { %830 = vmatpush.msra.mxu0 %v4081_v27  ;;  %850 = vmatpush.msra.mxu1 %v4086_v28  ;;  %v7230_v27 = vld [vmem:[#allocation28_spill] sm:$0xff]  ;;  %v7231_v28 = vld [vmem:[#allocation29_spill] sm:$0xff] }
 0x11b   :  { %870 = vmatpush.msra.mxu2 %v4098_v30  ;;  %890 = vmatpush.msra.mxu3 %v4093_v29  ;;  %v7232_v29 = vld [vmem:[#allocation55_spill] sm:$0xff]  ;;  %v7233_v30 = vld [vmem:[#allocation30_spill] sm:$0xff] }
 0x11c   :  { %831 = vmatpush.msra.mxu0 %v4103_v31  ;;  %851 = vmatpush.msra.mxu1 %v4108_v32  ;;  %v184_v31 = vadd.f32 %v7233_v30, %v7232_v29  ;;  %v7234_v32 = vld [vmem:[#allocation56_spill] sm:$0xff] }
 0x11d   :  { %871 = vmatpush.msra.mxu2 %v4120_v34  ;;  %891 = vmatpush.msra.mxu3 %v4115_v33  ;;  %v7235_v33 = vld [vmem:[#allocation31_spill] sm:$0xff] }
 0x11e   :  { %832 = vmatpush.msra.mxu0 %v4126_v35  ;;  %852 = vmatpush.msra.mxu1 %v4131_v36  ;;  %v225_v34 = vadd.f32 %v7235_v33, %v7234_v32 }
 0x11f   :  { %872 = vmatpush.msra.mxu2 %v4144_v38  ;;  %892 = vmatpush.msra.mxu3 %v4139_v37 }
 0x120   :  { %833 = vmatpush.msra.mxu0 %v4156_v40  ;;  %853 = vmatpush.msra.mxu1 %v4161_v41 }
 0x121   :  { %873 = vmatpush.msra.mxu2 %v7206_v1  ;;  %893 = vmatpush.msra.mxu3 %v7207_v2 }
 0x122   :  { %834 = vmatpush.msra.mxu0 %v7208_v3  ;;  %854 = vmatpush.msra.mxu1 %v7209_v4 }
 0x123   :  { %874 = vmatpush.msra.mxu2 %v7210_v5  ;;  %894 = vmatpush.msra.mxu3 %v7211_v6 }
 0x124   :  { %835 = vmatpush.msra.mxu0 %v7212_v7  ;;  %855 = vmatpush.msra.mxu1 %v7213_v8 }
 0x125   :  { %875 = vmatpush.msra.mxu2 %v7214_v9  ;;  %895 = vmatpush.msra.mxu3 %v7215_v10 }
 0x126   :  { %836 = vmatpush.msra.mxu0 %v7216_v11  ;;  %856 = vmatpush.msra.mxu1 %v7217_v12 }
 0x127   :  { %876 = vmatpush.msra.mxu2 %v7218_v14  ;;  %896 = vmatpush.msra.mxu3 %v7219_v15 }
 0x128   :  { %837 = vmatpush.msra.mxu0 %v7220_v16  ;;  %857 = vmatpush.msra.mxu1 %v7221_v17 }
 0x129   :  { %877 = vmatpush.msra.mxu2 %v7222_v18  ;;  %897 = vmatpush.msra.mxu3 %v7223_v19 }
 0x12a   :  { %838 = vmatpush.msra.mxu0 %v7224_v20  ;;  %858 = vmatpush.msra.mxu1 %v7225_v21 }
 0x12b   :  { %878 = vmatpush.msra.mxu2 %v7226_v22  ;;  %898 = vmatpush.msra.mxu3 %v7227_v23 }
 0x12c   :  { %839 = vmatpush.msra.mxu0 %v7228_v24  ;;  %859 = vmatpush.msra.mxu1 %v7229_v25 }
 0x12d   :  { %879 = vmatpush.msra.mxu2 %v7230_v27  ;;  %899 = vmatpush.msra.mxu3 %v7231_v28 }
 0x189   :  { %v533_v35 = vpop.f32.mrf.mxu0  ;;  %v553_v36 = vpop.f32.mrf.mxu1 }
 0x18a   :  { %v596_v37 = vadd.f32 %v533_v35, %v184_v31  ;;  %v597_v38 = vadd.f32 %v553_v36, %v225_v34 }
 0x18c   :  { %v3150_v40 = vmul.f32 -1.442695, %v596_v37  ;;  %v3151_v41 = vmul.f32 -1.442695, %v597_v38 }
 0x18e   :  { %3341 = vpow2.f32 %v3150_v40 }
 0x18f   :  { %3343 = vpow2.f32 %v3151_v41 }
 0x190   :  { %v593_v45 = vpop.f32.mrf.mxu3  ;;  %v573_v50 = vpop.f32.mrf.mxu2 }
 0x191   :  { %v599_v47 = vadd.f32 %v593_v45, %v307_v44  ;;  %v598_v46 = vadd.f32 %v573_v50, %v266_v49 }
 0x193   :  { %v3152_v55 = vmul.f32 -1.442695, %v599_v47 }
 0x194   :  { %v3342_v59 = vpop.eup %3341 }
 0x195   :  { %v3344_v39 = vpop.eup %3343  ;;  %v603_v57 = vadd.f32 1.0, %v3342_v59  ;;  %3345 = vpow2.f32 %v3152_v55 }
 0x196   :  { %v622_v53 = vadd.f32 1.0, %v3344_v39 }
 0x197   :  { %3347 = vrcp.f32 %v603_v57  ;;  %v615_v51 = vand.u32 2147483648, %v603_v57  ;;  %v613_v31 = vand.u32 2147483647, %v603_v57  ;;  %vm609_vm14 = vweird.f32 %v603_v57 }
 0x198   :  { %3349 = vrcp.f32 %v622_v53  ;;  %v634_v2 = vand.u32 2147483648, %v622_v53  ;;  %v632_v34 = vand.u32 2147483647, %v622_v53  ;;  %vm628_vm15 = vweird.f32 %v622_v53 }
 0x199   :  { %v616_v37 = vor.u32 1.1754944e-38, %v615_v51  ;;  %vm614_vm2 = vcmp.eq.f32.partialorder %v613_v31, 8.507059e+37  ;;  %v4656_v51 = vld [vmem:[%s6874_s2 + $0x1c0] sm:$0xff]  ;;  %v4674_v31 = vld [vmem:[%s6874_s2 + $0x1d8] sm:$0xff] }
 0x19a   :  { %v635_v41 = vor.u32 1.1754944e-38, %v634_v2  ;;  %vm633_vm3 = vcmp.eq.f32.partialorder %v632_v34, 8.507059e+37  ;;  %v4662_v2 = vld [vmem:[%s6874_s2 + $0x1c8] sm:$0xff] }
 0x19b   :  { %v3346_v56 = vpop.eup %3345  ;;  %v4686_v34 = vld [vmem:[%s6874_s2 + $0x1a8] sm:$0xff] }
 0x19c   :  { %v642_v52 = vadd.f32 1.0, %v3346_v56 }
 0x19d   :  { %v3348_v58 = vpop.eup %3347 }
 0x19e   :  { %v3350_v48 = vpop.eup %3349  ;;  %v605_v54 = vmul.f32 %v3348_v58, %v603_v57  ;;  %3351 = vrcp.f32 %v642_v52  ;;  %vm610_vm12 = vweird.f32 %v3348_v58  ;;  %v654_v62 = vand.u32 2147483648, %v642_v52 }
 0x19f   :  { %v624_v61 = vmul.f32 %v3350_v48, %v622_v53  ;;  %3353 = vtanh.f32 %v598_v46  ;;  %vm629_vm13 = vweird.f32 %v3350_v48  ;;  %vm611_vm0 = vmor %vm609_vm14, %vm610_vm12  ;;  %vm648_vm5 = vweird.f32 %v642_v52 }
 0x1a0   :  { %v606_v60 = vsub.f32 1.0, %v605_v54  ;;  %vm630_vm1 = vmor %vm628_vm15, %vm629_vm13  ;;  %v652_v49 = vand.u32 2147483647, %v642_v52  ;;  %v655_v46 = vor.u32 1.1754944e-38, %v654_v62  ;;  %v4788_v62 = vld [vmem:[%s6874_s2 + $0x130] sm:$0xff] }
 0x1a1   :  { %v625_v0 = vsub.f32 1.0, %v624_v61 }
 0x1a2   :  { %v607_v30 = vmul.f32 %v3348_v58, %v606_v60  ;;  %vm653_vm7 = vcmp.eq.f32.partialorder %v652_v49, 8.507059e+37  ;;  %v4644_v60 = vld [vmem:[%s6874_s2 + $0x1f0] sm:$0xff]  ;;  %v4794_v49 = vld [vmem:[%s6874_s2 + $0x138] sm:$0xff] }
 0x1a3   :  { %v626_v33 = vmul.f32 %v3350_v48, %v625_v0  ;;  %v4650_v0 = vld [vmem:[%s6874_s2 + $0x1f8] sm:$0xff] }
 0x1a4   :  { %v3352_v35 = vpop.eup %3351  ;;  %v608_v36 = vadd.f32 %v3348_v58, %v607_v30  ;;  %v4668_v30 = vld [vmem:[%s6874_s2 + $0x1d0] sm:$0xff] }
 0x1a5   :  { %v627_v38 = vadd.f32 %v3350_v48, %v626_v33  ;;  %v644_v40 = vmul.f32 %v3352_v35, %v642_v52  ;;  %v3354_v44 = vpop.eup %3353  ;;  %vm649_vm4 = vweird.f32 %v3352_v35  ;;  %v4638_v52 = vld [vmem:[%s6874_s2 + $0x1e8] sm:$0xff]  ;;  %v4680_v33 = vld [vmem:[%s6874_s2 + $0x1a0] sm:$0xff] }
 0x1a6   :  { %v612_v43 = vsel %vm611_vm0, %v3348_v58, %v608_v36  ;;  %vm650_vm6 = vmor %vm648_vm5, %vm649_vm4  ;;  %v4698_v36 = vld [vmem:[%s6874_s2 + $0x1b8] sm:$0xff] }
 0x1a7   :  { %v617_v45 = vsel %vm614_vm2, %v616_v37, %v612_v43  ;;  %v631_v47 = vsel %vm630_vm1, %v3350_v48, %v627_v38  ;;  %v645_v55 = vsub.f32 1.0, %v644_v40  ;;  %v4704_v37 = vld [vmem:[%s6874_s2 + $0x180] sm:$0xff]  ;;  %v4710_v38 = vld [vmem:[%s6874_s2 + $0x188] sm:$0xff]  ;;  %v4716_v40 = vld [vmem:[%s6874_s2 + $0x190] sm:$0xff] }
 0x1a8   :  { %v636_v59 = vsel %vm633_vm3, %v635_v41, %v631_v47  ;;  %v659_v39 = vmul.f32 %v3354_v44, %v617_v45  ;;  %v4722_v41 = vld [vmem:[%s6874_s2 + $0x198] sm:$0xff]  ;;  %v4728_v43 = vld [vmem:[%s6874_s2 + $0x160] sm:$0xff]  ;;  %v4734_v44 = vld [vmem:[%s6874_s2 + $0x168] sm:$0xff] }
 0x1a9   :  { %v658_v50 = vmul.f32 %v636_v59, %v4538_v63  ;;  %v646_v56 = vmul.f32 %v3352_v35, %v645_v55  ;;  %v4632_v63 = vld [vmem:[%s6874_s2 + $0x1e0] sm:$0xff]  ;;  %v4740_v45 = vld [vmem:[%s6874_s2 + $0x170] sm:$0xff]  ;;  %v4746_v47 = vld [vmem:[%s6874_s2 + $0x178] sm:$0xff] }
 0x1aa   :  { %v4752_v55 = vld [vmem:[%s6874_s2 + $0x140] sm:$0xff]  ;;  %v4758_v59 = vld [vmem:[%s6874_s2 + $0x148] sm:$0xff] }
 0x1ab   :  { %v4620_v57 = vadd.f32 %v659_v39, %v658_v50  ;;  %v647_v53 = vadd.f32 %v3352_v35, %v646_v56  ;;  %v4764_v39 = vld [vmem:[%s6874_s2 + $0x150] sm:$0xff]  ;;  %v4770_v50 = vld [vmem:[%s6874_s2 + $0x158] sm:$0xff]  ;;  %v4776_v56 = vld [vmem:[%s6874_s2 + $0x120] sm:$0xff] }
 0x1ad   :  { %3355 = vtanh.f32 %v4620_v57  ;;  %v651_v58 = vsel %vm650_vm6, %v3352_v35, %v647_v53  ;;  %v4692_v35 = vld [vmem:[%s6874_s2 + $0x1b0] sm:$0xff]  ;;  %v4782_v53 = vld [vmem:[%s6874_s2 + $0x128] sm:$0xff] }
 0x1ae   :  { %v656_v54 = vsel %vm653_vm7, %v655_v46, %v651_v58  ;;  %v4800_v58 = vld [vmem:[%s6874_s2 + $0x100] sm:$0xff]  ;;  %v4806_v46 = vld [vmem:[%s6874_s2 + $0x108] sm:$0xff] }
 0x1b3   :  { %v3356_v48 = vpop.eup %3355 }
 0x1b4   :  { %v4623_v61 = vmul.f32 %v3356_v48, %v656_v54  ;;  %v4812_v48 = vld [vmem:[%s6874_s2 + $0x110] sm:$0xff]  ;;  %v4818_v54 = vld [vmem:[%s6874_s2 + $0x118] sm:$0xff] }
 0x1b5   :  { %7241 = vst [vmem:[#allocation4_spill] sm:$0xff] %v4812_v48 }
 0x1b6   :  { %7240 = vst [vmem:[#allocation5_spill] sm:$0xff] %v4623_v61  ;;  %686 = vmatmul.f32.vlgmr.msrb.gmra.mxu0 %v4623_v61  ;;  %706 = vmatmul.f32.vlgmr.msrb.gmra.mxu1 %v4623_v61 }
 0x1b7   :  { %726 = vmatmul.f32.vlgmr.msrb.gmra.mxu2 %v4623_v61  ;;  %746 = vmatmul.f32.vlgmr.msrb.gmra.mxu3 %v4623_v61  ;;  %7242 = vst [vmem:[#allocation6_spill] sm:$0xff] %v4818_v54  ;;  %v4824_v61 = vld [vmem:[%s6874_s2 + $0xe0] sm:$0xff] }
 0x1b8   :  { %978 = vmatpush.msrb.mxu0 %v4632_v63  ;;  %998 = vmatpush.msrb.mxu1 %v4638_v52  ;;  %7243 = vst [vmem:[#allocation7_spill] sm:$0xff] %v4824_v61 }
 0x1b9   :  { %1018 = vmatpush.msrb.mxu2 %v4644_v60  ;;  %1038 = vmatpush.msrb.mxu3 %v4650_v0 }
 0x1ba   :  { %979 = vmatpush.msrb.mxu0 %v4656_v51  ;;  %999 = vmatpush.msrb.mxu1 %v4662_v2 }
 0x1bb   :  { %1019 = vmatpush.msrb.mxu2 %v4668_v30  ;;  %1039 = vmatpush.msrb.mxu3 %v4674_v31 }
 0x1bc   :  { %980 = vmatpush.msrb.mxu0 %v4680_v33  ;;  %1000 = vmatpush.msrb.mxu1 %v4686_v34 }
 0x1bd   :  { %1020 = vmatpush.msrb.mxu2 %v4692_v35  ;;  %1040 = vmatpush.msrb.mxu3 %v4698_v36 }
 0x1be   :  { %981 = vmatpush.msrb.mxu0 %v4704_v37  ;;  %1001 = vmatpush.msrb.mxu1 %v4710_v38 }
 0x1bf   :  { %1021 = vmatpush.msrb.mxu2 %v4716_v40  ;;  %1041 = vmatpush.msrb.mxu3 %v4722_v41 }
 0x1c0   :  { %982 = vmatpush.msrb.mxu0 %v4728_v43  ;;  %1002 = vmatpush.msrb.mxu1 %v4734_v44 }
 0x1c1   :  { %1022 = vmatpush.msrb.mxu2 %v4740_v45  ;;  %1042 = vmatpush.msrb.mxu3 %v4746_v47 }
 0x1c2   :  { %983 = vmatpush.msrb.mxu0 %v4752_v55  ;;  %1003 = vmatpush.msrb.mxu1 %v4758_v59 }
 0x1c3   :  { %1023 = vmatpush.msrb.mxu2 %v4764_v39  ;;  %1043 = vmatpush.msrb.mxu3 %v4770_v50 }
 0x1c4   :  { %984 = vmatpush.msrb.mxu0 %v4776_v56  ;;  %1004 = vmatpush.msrb.mxu1 %v4782_v53 }
 0x1c5   :  { %1024 = vmatpush.msrb.mxu2 %v4788_v62  ;;  %1044 = vmatpush.msrb.mxu3 %v4794_v49 }
 0x1c6   :  { %985 = vmatpush.msrb.mxu0 %v4800_v58  ;;  %1005 = vmatpush.msrb.mxu1 %v4806_v46 }
 0x1c7   :  { %1025 = vmatpush.msrb.mxu2 %v4812_v48  ;;  %1045 = vmatpush.msrb.mxu3 %v4818_v54  ;;  %v4836_v48 = vld [vmem:[%s6874_s2 + $0xf0] sm:$0xff]  ;;  %v4842_v54 = vld [vmem:[%s6874_s2 + $0xf8] sm:$0xff] }
 0x1c8   :  { %986 = vmatpush.msrb.mxu0 %v4824_v61  ;;  %1006 = vmatpush.msrb.mxu1 %v4830_v26  ;;  %7245 = vst [vmem:[#allocation8_spill] sm:$0xff] %v4842_v54  ;;  %v4848_v61 = vld [vmem:[%s6874_s2 + $0xc0] sm:$0xff]  ;;  %v4854_v26 = vld [vmem:[%s6874_s2 + $0xc8] sm:$0xff] }
 0x1c9   :  { %1026 = vmatpush.msrb.mxu2 %v4836_v48  ;;  %1046 = vmatpush.msrb.mxu3 %v4842_v54  ;;  %v4861_v54 = vld [vmem:[%s6874_s2 + $0xd8] sm:$0xff] }
 0x1ca   :  { %987 = vmatpush.msrb.mxu0 %v4848_v61  ;;  %1007 = vmatpush.msrb.mxu1 %v4854_v26  ;;  %7246 = vst [vmem:[#allocation10_spill] sm:$0xff] %v4861_v54 }
 0x1cb   :  { %1027 = vmatpush.msrb.mxu2 %v7206_v1  ;;  %1047 = vmatpush.msrb.mxu3 %v4861_v54  ;;  %v7247_v1 = vld [vmem:[#allocation34_spill] sm:$0xff] }
 0x1cc   :  { %988 = vmatpush.msrb.mxu0 %v7208_v3  ;;  %1008 = vmatpush.msrb.mxu1 %v7209_v4  ;;  %v187_v3 = vadd.f32 %v7247_v1, %v7232_v29  ;;  %v7248_v4 = vld [vmem:[#allocation35_spill] sm:$0xff] }
 0x1cd   :  { %1028 = vmatpush.msrb.mxu2 %v7210_v5  ;;  %1048 = vmatpush.msrb.mxu3 %v7211_v6  ;;  %v228_v5 = vadd.f32 %v7248_v4, %v7234_v32 }
 0x1ce   :  { %989 = vmatpush.msrb.mxu0 %v7212_v7  ;;  %1009 = vmatpush.msrb.mxu1 %v7213_v8 }
 0x1cf   :  { %1029 = vmatpush.msrb.mxu2 %v7214_v9  ;;  %1049 = vmatpush.msrb.mxu3 %v7215_v10 }
 0x1d0   :  { %990 = vmatpush.msrb.mxu0 %v7216_v11  ;;  %1010 = vmatpush.msrb.mxu1 %v7217_v12  ;;  %v7249_v12 = vld [vmem:[#allocation37_spill] sm:$0xff] }
 0x1d1   :  { %1030 = vmatpush.msrb.mxu2 %v7218_v14  ;;  %1050 = vmatpush.msrb.mxu3 %v7219_v15  ;;  %v310_v14 = vadd.f32 %v7249_v12, %v7236_v42 }
 0x1d2   :  { %991 = vmatpush.msrb.mxu0 %v7220_v16  ;;  %1011 = vmatpush.msrb.mxu1 %v7221_v17 }
 0x1d3   :  { %1031 = vmatpush.msrb.mxu2 %v7222_v18  ;;  %1051 = vmatpush.msrb.mxu3 %v7223_v19 }
 0x1d4   :  { %992 = vmatpush.msrb.mxu0 %v7224_v20  ;;  %1012 = vmatpush.msrb.mxu1 %v7225_v21 }
 0x1d5   :  { %1032 = vmatpush.msrb.mxu2 %v7226_v22  ;;  %1052 = vmatpush.msrb.mxu3 %v7227_v23 }
 0x1d6   :  { %993 = vmatpush.msrb.mxu0 %v7228_v24  ;;  %1013 = vmatpush.msrb.mxu1 %v7229_v25  ;;  %v7250_v24 = vld [vmem:[#allocation36_spill] sm:$0xff] }
 0x1d7   :  { %1033 = vmatpush.msrb.mxu2 %v7230_v27  ;;  %1053 = vmatpush.msrb.mxu3 %v7231_v28  ;;  %v269_v25 = vadd.f32 %v7250_v24, %v7238_v13 }
 0x233   :  { %v687_v6 = vpop.f32.mrf.mxu0  ;;  %v707_v7 = vpop.f32.mrf.mxu1 }
 0x234   :  { %v750_v8 = vadd.f32 %v687_v6, %v187_v3  ;;  %v751_v9 = vadd.f32 %v707_v7, %v228_v5 }
 0x236   :  { %v3153_v10 = vmul.f32 -1.442695, %v750_v8  ;;  %v3154_v11 = vmul.f32 -1.442695, %v751_v9 }
 0x238   :  { %3357 = vpow2.f32 %v3153_v10 }
 0x239   :  { %3359 = vpow2.f32 %v3154_v11 }
 0x23a   :  { %v747_v15 = vpop.f32.mrf.mxu3  ;;  %v727_v22 = vpop.f32.mrf.mxu2 }
 0x23b   :  { %v753_v16 = vadd.f32 %v747_v15, %v310_v14  ;;  %v752_v1 = vadd.f32 %v727_v22, %v269_v25 }
 0x23d   :  { %v3155_v17 = vmul.f32 -1.442695, %v753_v16 }
 0x23e   :  { %v3358_v18 = vpop.eup %3357 }
 0x23f   :  { %v3360_v19 = vpop.eup %3359  ;;  %v757_v20 = vadd.f32 1.0, %v3358_v18  ;;  %3361 = vpow2.f32 %v3155_v17 }
 0x240   :  { %v776_v21 = vadd.f32 1.0, %v3360_v19 }
 0x241   :  { %3363 = vrcp.f32 %v757_v20  ;;  %v769_v8 = vand.u32 2147483648, %v757_v20  ;;  %v767_v11 = vand.u32 2147483647, %v757_v20  ;;  %vm763_vm10 = vweird.f32 %v757_v20 }
 0x242   :  { %3365 = vrcp.f32 %v776_v21  ;;  %v788_v9 = vand.u32 2147483648, %v776_v21  ;;  %v786_v14 = vand.u32 2147483647, %v776_v21  ;;  %vm782_vm11 = vweird.f32 %v776_v21 }
 0x243   :  { %v770_v17 = vor.u32 1.1754944e-38, %v769_v8  ;;  %vm768_vm14 = vcmp.eq.f32.partialorder %v767_v11, 8.507059e+37 }
 0x244   :  { %v789_v22 = vor.u32 1.1754944e-38, %v788_v9  ;;  %vm787_vm15 = vcmp.eq.f32.partialorder %v786_v14, 8.507059e+37 }
 0x245   :  { %v3362_v23 = vpop.eup %3361 }
 0x246   :  { %v796_v27 = vadd.f32 1.0, %v3362_v23 }
 0x247   :  { %v3364_v28 = vpop.eup %3363 }
 0x248   :  { %v3366_v3 = vpop.eup %3365  ;;  %v759_v4 = vmul.f32 %v3364_v28, %v757_v20  ;;  %3367 = vrcp.f32 %v796_v27  ;;  %vm764_vm8 = vweird.f32 %v3364_v28  ;;  %v808_v8 = vand.u32 2147483648, %v796_v27 }
 0x249   :  { %v778_v5 = vmul.f32 %v3366_v3, %v776_v21  ;;  %3369 = vtanh.f32 %v752_v1  ;;  %vm783_vm9 = vweird.f32 %v3366_v3  ;;  %vm765_vm12 = vmor %vm763_vm10, %vm764_vm8  ;;  %vm802_vm1 = vweird.f32 %v796_v27 }
 0x24a   :  { %v760_v6 = vsub.f32 1.0, %v759_v4  ;;  %vm784_vm13 = vmor %vm782_vm11, %vm783_vm9  ;;  %v809_v11 = vor.u32 1.1754944e-38, %v808_v8  ;;  %v5026_v8 = vld [vmem:[%s6874_s2 + $0x40] sm:$0xff] }
 0x24b   :  { %v779_v7 = vsub.f32 1.0, %v778_v5  ;;  %7270 = vst [vmem:[#allocation25_spill] sm:$0xff] %v5026_v8 }
 0x24c   :  { %v761_v10 = vmul.f32 %v3364_v28, %v760_v6 }
 0x24d   :  { %v780_v12 = vmul.f32 %v3366_v3, %v779_v7 }
 0x24e   :  { %v3368_v15 = vpop.eup %3367  ;;  %v762_v16 = vadd.f32 %v3364_v28, %v761_v10 }
 0x24f   :  { %v781_v18 = vadd.f32 %v3366_v3, %v780_v12  ;;  %v798_v19 = vmul.f32 %v3368_v15, %v796_v27  ;;  %v3370_v24 = vpop.eup %3369  ;;  %vm803_vm0 = vweird.f32 %v3368_v15 }
 0x250   :  { %v766_v23 = vsel %vm765_vm12, %v3364_v28, %v762_v16  ;;  %v806_v28 = vand.u32 2147483647, %v796_v27  ;;  %vm804_vm2 = vmor %vm802_vm1, %vm803_vm0  ;;  %v7253_v27 = vld [vmem:[#allocation6_spill] sm:$0xff]  ;;  %v7255_v16 = vld [vmem:[#allocation9_spill] sm:$0xff] }
 0x251   :  { %v771_v25 = vsel %vm768_vm14, %v770_v17, %v766_v23  ;;  %v785_v1 = vsel %vm784_vm13, %v3366_v3, %v781_v18  ;;  %v799_v4 = vsub.f32 1.0, %v798_v19  ;;  %v7256_v17 = vld [vmem:[#allocation8_spill] sm:$0xff]  ;;  %v4947_v18 = vld [vmem:[%s6874_s2 + $0xd0] sm:$0xff] }
 0x252   :  { %v790_v5 = vsel %vm787_vm15, %v789_v22, %v785_v1  ;;  %v813_v6 = vmul.f32 %v3370_v24, %v771_v25  ;;  %vm807_vm3 = vcmp.eq.f32.partialorder %v806_v28, 8.507059e+37  ;;  %7257 = vst [vmem:[#allocation13_spill] sm:$0xff] %v4947_v18  ;;  %v4954_v19 = vld [vmem:[%s6874_s2 + $0xa0] sm:$0xff]  ;;  %v4960_v22 = vld [vmem:[%s6874_s2 + $0xa8] sm:$0xff]  ;;  %v4966_v23 = vld [vmem:[%s6874_s2 + $0xb0] sm:$0xff] }
 0x253   :  { %v812_v7 = vmul.f32 %v790_v5, %v4620_v57  ;;  %v800_v10 = vmul.f32 %v3368_v15, %v799_v4  ;;  %v7252_v57 = vld [vmem:[#allocation4_spill] sm:$0xff]  ;;  %7258 = vst [vmem:[#allocation12_spill] sm:$0xff] %v4954_v19  ;;  %v4972_v24 = vld [vmem:[%s6874_s2 + $0xb8] sm:$0xff]  ;;  %v4984_v1 = vld [vmem:[%s6874_s2 + $0x88] sm:$0xff] }
 0x254   :  { %7259 = vst [vmem:[#allocation14_spill] sm:$0xff] %v4960_v22  ;;  %v4978_v25 = vld [vmem:[%s6874_s2 + $0x80] sm:$0xff]  ;;  %v4990_v4 = vld [vmem:[%s6874_s2 + $0x90] sm:$0xff]  ;;  %v4996_v5 = vld [vmem:[%s6874_s2 + $0x98] sm:$0xff] }
 0x255   :  { %v4897_v20 = vadd.f32 %v813_v6, %v812_v7  ;;  %v801_v21 = vadd.f32 %v3368_v15, %v800_v10  ;;  %7260 = vst [vmem:[#allocation15_spill] sm:$0xff] %v4966_v23  ;;  %v5002_v6 = vld [vmem:[%s6874_s2 + $0x60] sm:$0xff]  ;;  %v5008_v7 = vld [vmem:[%s6874_s2 + $0x68] sm:$0xff]  ;;  %v5014_v10 = vld [vmem:[%s6874_s2 + $0x70] sm:$0xff] }
 0x256   :  { %7261 = vst [vmem:[#allocation17_spill] sm:$0xff] %v4972_v24  ;;  %v5032_v28 = vld [vmem:[%s6874_s2 + $0x48] sm:$0xff] }
 0x257   :  { %3371 = vtanh.f32 %v4897_v20  ;;  %v805_v9 = vsel %vm804_vm2, %v3368_v15, %v801_v21  ;;  %v7254_v15 = vld [vmem:[#allocation7_spill] sm:$0xff]  ;;  %7262 = vst [vmem:[#allocation16_spill] sm:$0xff] %v4978_v25 }
 0x258   :  { %v810_v12 = vsel %vm807_vm3, %v809_v11, %v805_v9  ;;  %7263 = vst [vmem:[#allocation18_spill] sm:$0xff] %v4984_v1  ;;  %v5020_v21 = vld [vmem:[%s6874_s2 + $0x78] sm:$0xff]  ;;  %v5038_v9 = vld [vmem:[%s6874_s2 + $0x50] sm:$0xff] }
 0x259   :  { %7264 = vst [vmem:[#allocation19_spill] sm:$0xff] %v4990_v4  ;;  %v5044_v11 = vld [vmem:[%s6874_s2 + $0x58] sm:$0xff] }
 0x25a   :  { %7265 = vst [vmem:[#allocation21_spill] sm:$0xff] %v4996_v5 }
 0x25b   :  { %7266 = vst [vmem:[#allocation20_spill] sm:$0xff] %v5002_v6 }
 0x25c   :  { %7267 = vst [vmem:[#allocation22_spill] sm:$0xff] %v5008_v7 }
 0x25d   :  { %v3372_v3 = vpop.eup %3371  ;;  %7268 = vst [vmem:[#allocation23_spill] sm:$0xff] %v5014_v10 }
 0x25e   :  { %v4900_v14 = vmul.f32 %v3372_v3, %v810_v12  ;;  %7269 = vst [vmem:[#allocation24_spill] sm:$0xff] %v5020_v21  ;;  %v5050_v3 = vld [vmem:[%s6874_s2 + $0x20] sm:$0xff]  ;;  %v5056_v12 = vld [vmem:[%s6874_s2 + $0x28] sm:$0xff] }
 0x25f   :  { %7271 = vst [vmem:[#allocation26_spill] sm:$0xff] %v5032_v28 }
 0x260   :  { %7251 = vst [vmem:[#allocation11_spill] sm:$0xff] %v4900_v14  ;;  %840 = vmatmul.f32.vlgmr.msra.gmra.mxu0 %v4900_v14  ;;  %860 = vmatmul.f32.vlgmr.msra.gmra.mxu1 %v4900_v14 }
 0x261   :  { %880 = vmatmul.f32.vlgmr.msra.gmra.mxu2 %v4900_v14  ;;  %900 = vmatmul.f32.vlgmr.msra.gmra.mxu3 %v4900_v14  ;;  %7272 = vst [vmem:[#allocation27_spill] sm:$0xff] %v5038_v9  ;;  %v5062_v14 = vld [vmem:[%s6874_s2 + $0x30] sm:$0xff] }
 0x262   :  { %1132 = vmatpush.msra.mxu0 %v4632_v63  ;;  %1152 = vmatpush.msra.mxu1 %v4638_v52  ;;  %7273 = vst [vmem:[#allocation28_spill] sm:$0xff] %v5044_v11 }
 0x263   :  { %1172 = vmatpush.msra.mxu2 %v4644_v60  ;;  %1192 = vmatpush.msra.mxu3 %v4650_v0  ;;  %7274 = vst [vmem:[#allocation29_spill] sm:$0xff] %v5050_v3 }
 0x264   :  { %1133 = vmatpush.msra.mxu0 %v4656_v51  ;;  %1153 = vmatpush.msra.mxu1 %v4662_v2  ;;  %7275 = vst [vmem:[#allocation30_spill] sm:$0xff] %v5056_v12 }
 0x265   :  { %1173 = vmatpush.msra.mxu2 %v4668_v30  ;;  %1193 = vmatpush.msra.mxu3 %v4674_v31  ;;  %7276 = vst [vmem:[#allocation31_spill] sm:$0xff] %v5062_v14 }
 0x266   :  { %1134 = vmatpush.msra.mxu0 %v4680_v33  ;;  %1154 = vmatpush.msra.mxu1 %v4686_v34 }
 0x267   :  { %1174 = vmatpush.msra.mxu2 %v4692_v35  ;;  %1194 = vmatpush.msra.mxu3 %v4698_v36 }
 0x268   :  { %1135 = vmatpush.msra.mxu0 %v4704_v37  ;;  %1155 = vmatpush.msra.mxu1 %v4710_v38 }
 0x269   :  { %1175 = vmatpush.msra.mxu2 %v4716_v40  ;;  %1195 = vmatpush.msra.mxu3 %v4722_v41 }
 0x26a   :  { %1136 = vmatpush.msra.mxu0 %v4728_v43  ;;  %1156 = vmatpush.msra.mxu1 %v4734_v44 }
 0x26b   :  { %1176 = vmatpush.msra.mxu2 %v4740_v45  ;;  %1196 = vmatpush.msra.mxu3 %v4746_v47 }
 0x26c   :  { %1137 = vmatpush.msra.mxu0 %v4752_v55  ;;  %1157 = vmatpush.msra.mxu1 %v4758_v59 }
 0x26d   :  { %1177 = vmatpush.msra.mxu2 %v4764_v39  ;;  %1197 = vmatpush.msra.mxu3 %v4770_v50 }
 0x26e   :  { %1138 = vmatpush.msra.mxu0 %v4776_v56  ;;  %1158 = vmatpush.msra.mxu1 %v4782_v53 }
 0x26f   :  { %1178 = vmatpush.msra.mxu2 %v4788_v62  ;;  %1198 = vmatpush.msra.mxu3 %v4794_v49 }
 0x270   :  { %1139 = vmatpush.msra.mxu0 %v4800_v58  ;;  %1159 = vmatpush.msra.mxu1 %v4806_v46 }
 0x271   :  { %1179 = vmatpush.msra.mxu2 %v7252_v57  ;;  %1199 = vmatpush.msra.mxu3 %v7253_v27 }
 0x272   :  { %1140 = vmatpush.msra.mxu0 %v7254_v15  ;;  %1160 = vmatpush.msra.mxu1 %v7255_v16 }
 0x273   :  { %1180 = vmatpush.msra.mxu2 %v4836_v48  ;;  %1200 = vmatpush.msra.mxu3 %v7256_v17 }
 0x274   :  { %1141 = vmatpush.msra.mxu0 %v4848_v61  ;;  %1161 = vmatpush.msra.mxu1 %v4854_v26 }
 0x275   :  { %1181 = vmatpush.msra.mxu2 %v4947_v18  ;;  %1201 = vmatpush.msra.mxu3 %v4861_v54 }
 0x276   :  { %1142 = vmatpush.msra.mxu0 %v4954_v19  ;;  %1162 = vmatpush.msra.mxu1 %v4960_v22 }
 0x277   :  { %1182 = vmatpush.msra.mxu2 %v4966_v23  ;;  %1202 = vmatpush.msra.mxu3 %v4972_v24 }
 0x278   :  { %1143 = vmatpush.msra.mxu0 %v4978_v25  ;;  %1163 = vmatpush.msra.mxu1 %v4984_v1 }
 0x279   :  { %1183 = vmatpush.msra.mxu2 %v4990_v4  ;;  %1203 = vmatpush.msra.mxu3 %v4996_v5 }
 0x27a   :  { %1144 = vmatpush.msra.mxu0 %v5002_v6  ;;  %1164 = vmatpush.msra.mxu1 %v5008_v7 }
 0x27b   :  { %1184 = vmatpush.msra.mxu2 %v5014_v10  ;;  %1204 = vmatpush.msra.mxu3 %v5020_v21 }
 0x27c   :  { %1145 = vmatpush.msra.mxu0 %v5026_v8  ;;  %1165 = vmatpush.msra.mxu1 %v5032_v28  ;;  %v7283_v28 = vld [vmem:[#allocation39_spill] sm:$0xff] }
 0x27d   :  { %1185 = vmatpush.msra.mxu2 %v5038_v9  ;;  %1205 = vmatpush.msra.mxu3 %v5044_v11  ;;  %v5068_v11 = vld [vmem:[%s6874_s2 + $0x38] sm:$0xff] }
 0x27e   :  { %1146 = vmatpush.msra.mxu0 %v5050_v3  ;;  %1166 = vmatpush.msra.mxu1 %v5056_v12  ;;  %7277 = vst [vmem:[#allocation33_spill] sm:$0xff] %v5068_v11  ;;  %v5074_v3 = vld [vmem:[%s6874_s2] sm:$0xff]  ;;  %v5080_v12 = vld [vmem:[%s6874_s2 + $0x8] sm:$0xff] }
 0x27f   :  { %1186 = vmatpush.msra.mxu2 %v5062_v14  ;;  %1206 = vmatpush.msra.mxu3 %v5068_v11  ;;  %7278 = vst [vmem:[#allocation32_spill] sm:$0xff] %v5074_v3  ;;  %v5086_v14 = vld [vmem:[%s6874_s2 + $0x10] sm:$0xff]  ;;  %v5092_v11 = vld [vmem:[%s6874_s2 + $0x18] sm:$0xff] }
 0x280   :  { %1147 = vmatpush.msra.mxu0 %v5074_v3  ;;  %7279 = vst [vmem:[#allocation34_spill] sm:$0xff] %v5080_v12  ;;  %1167 = vmatpush.msra.mxu1 %v5080_v12  ;;  %v7282_v3 = vld [vmem:[#allocation38_spill] sm:$0xff]  ;;  %v231_v12 = vadd.f32 %v7283_v28, %v7234_v32 }
 0x281   :  { %7280 = vst [vmem:[#allocation35_spill] sm:$0xff] %v5086_v14  ;;  %1187 = vmatpush.msra.mxu2 %v5086_v14  ;;  %1207 = vmatpush.msra.mxu3 %v5092_v11  ;;  %v190_v9 = vadd.f32 %v7282_v3, %v7232_v29  ;;  %v7284_v14 = vld [vmem:[#allocation41_spill] sm:$0xff] }
 0x282   :  { %7281 = vst [vmem:[#allocation37_spill] sm:$0xff] %v5092_v11  ;;  %v313_v4 = vadd.f32 %v7284_v14, %v7236_v42 }
 0x2dd   :  { %v841_v8 = vpop.f32.mrf.mxu0  ;;  %v861_v21 = vpop.f32.mrf.mxu1 }
 0x2de   :  { %v904_v10 = vadd.f32 %v841_v8, %v190_v9  ;;  %v905_v7 = vadd.f32 %v861_v21, %v231_v12 }
 0x2e0   :  { %v3156_v6 = vmul.f32 -1.442695, %v904_v10  ;;  %v3157_v5 = vmul.f32 -1.442695, %v905_v7  ;;  %v7285_v10 = vld [vmem:[#allocation40_spill] sm:$0xff] }
 0x2e1   :  { %v272_v7 = vadd.f32 %v7285_v10, %v7238_v13 }
 0x2e2   :  { %3373 = vpow2.f32 %v3156_v6 }
 0x2e3   :  { %3375 = vpow2.f32 %v3157_v5 }
 0x2e4   :  { %v901_v1 = vpop.f32.mrf.mxu3  ;;  %v881_v28 = vpop.f32.mrf.mxu2 }
 0x2e5   :  { %v907_v25 = vadd.f32 %v901_v1, %v313_v4  ;;  %v906_v9 = vadd.f32 %v881_v28, %v272_v7 }
 0x2e7   :  { %v3158_v11 = vmul.f32 -1.442695, %v907_v25 }
 0x2e8   :  { %v3374_v24 = vpop.eup %3373 }
 0x2e9   :  { %v3376_v23 = vpop.eup %3375  ;;  %v911_v3 = vadd.f32 1.0, %v3374_v24  ;;  %3377 = vpow2.f32 %v3158_v11 }
 0x2ea   :  { %v930_v29 = vadd.f32 1.0, %v3376_v23 }
 0x2eb   :  { %3379 = vrcp.f32 %v911_v3  ;;  %v923_v12 = vand.u32 2147483648, %v911_v3  ;;  %v921_v11 = vand.u32 2147483647, %v911_v3  ;;  %vm917_vm6 = vweird.f32 %v911_v3 }
 0x2ec   :  { %3381 = vrcp.f32 %v930_v29  ;;  %v942_v24 = vand.u32 2147483648, %v930_v29  ;;  %v940_v32 = vand.u32 2147483647, %v930_v29  ;;  %vm936_vm7 = vweird.f32 %v930_v29 }
 0x2ed   :  { %v924_v28 = vor.u32 1.1754944e-38, %v923_v12  ;;  %vm922_vm10 = vcmp.eq.f32.partialorder %v921_v11, 8.507059e+37 }
 0x2ee   :  { %vm941_vm11 = vcmp.eq.f32.partialorder %v940_v32, 8.507059e+37 }
 0x2ef   :  { %v3378_v8 = vpop.eup %3377 }
 0x2f0   :  { %v950_v6 = vadd.f32 1.0, %v3378_v8 }
 0x2f1   :  { %v3380_v21 = vpop.eup %3379 }
 0x2f2   :  { %v3382_v14 = vpop.eup %3381  ;;  %v913_v5 = vmul.f32 %v3380_v21, %v911_v3  ;;  %3383 = vrcp.f32 %v950_v6  ;;  %vm918_vm4 = vweird.f32 %v3380_v21  ;;  %vm956_vm13 = vweird.f32 %v950_v6 }
 0x2f3   :  { %v932_v1 = vmul.f32 %v3382_v14, %v930_v29  ;;  %3385 = vtanh.f32 %v906_v9  ;;  %vm937_vm5 = vweird.f32 %v3382_v14  ;;  %vm919_vm8 = vmor %vm917_vm6, %vm918_vm4 }
 0x2f4   :  { %v914_v25 = vsub.f32 1.0, %v913_v5  ;;  %vm938_vm9 = vmor %vm936_vm7, %vm937_vm5  ;;  %v943_v5 = vor.u32 1.1754944e-38, %v942_v24 }
 0x2f5   :  { %v933_v4 = vsub.f32 1.0, %v932_v1 }
 0x2f6   :  { %v915_v23 = vmul.f32 %v3380_v21, %v914_v25 }
 0x2f7   :  { %v934_v42 = vmul.f32 %v3382_v14, %v933_v4 }
 0x2f8   :  { %v3384_v22 = vpop.eup %3383  ;;  %v916_v10 = vadd.f32 %v3380_v21, %v915_v23 }
 0x2f9   :  { %v935_v8 = vadd.f32 %v3382_v14, %v934_v42  ;;  %v952_v7 = vmul.f32 %v3384_v22, %v950_v6  ;;  %v3386_v9 = vpop.eup %3385  ;;  %vm957_vm12 = vweird.f32 %v3384_v22  ;;  %v962_v42 = vand.u32 2147483648, %v950_v6 }
 0x2fa   :  { %v920_v1 = vsel %vm919_vm8, %v3380_v21, %v916_v10  ;;  %v960_v21 = vand.u32 2147483647, %v950_v6  ;;  %vm958_vm14 = vmor %vm956_vm13, %vm957_vm12  ;;  %v7293_v6 = vld [vmem:[#allocation16_spill] sm:$0xff]  ;;  %v7294_v10 = vld [vmem:[#allocation18_spill] sm:$0xff] }
 0x2fb   :  { %v925_v13 = vsel %vm922_vm10, %v924_v28, %v920_v1  ;;  %v939_v25 = vsel %vm938_vm9, %v3382_v14, %v935_v8  ;;  %v953_v19 = vsub.f32 1.0, %v952_v7  ;;  %v963_v24 = vor.u32 1.1754944e-38, %v962_v42  ;;  %v7295_v28 = vld [vmem:[#allocation19_spill] sm:$0xff]  ;;  %v7296_v8 = vld [vmem:[#allocation21_spill] sm:$0xff]  ;;  %v7297_v7 = vld [vmem:[#allocation20_spill] sm:$0xff] }
 0x2fc   :  { %v944_v4 = vsel %vm941_vm11, %v943_v5, %v939_v25  ;;  %v967_v54 = vmul.f32 %v3386_v9, %v925_v13  ;;  %vm961_vm15 = vcmp.eq.f32.partialorder %v960_v21, 8.507059e+37  ;;  %v7287_v13 = vld [vmem:[#allocation13_spill] sm:$0xff]  ;;  %v7298_v5 = vld [vmem:[#allocation22_spill] sm:$0xff]  ;;  %v7299_v1 = vld [vmem:[#allocation23_spill] sm:$0xff] }
 0x2fd   :  { %v966_v18 = vmul.f32 %v944_v4, %v4897_v20  ;;  %v954_v23 = vmul.f32 %v3384_v22, %v953_v19  ;;  %v7289_v20 = vld [vmem:[#allocation12_spill] sm:$0xff]  ;;  %v7291_v19 = vld [vmem:[#allocation15_spill] sm:$0xff]  ;;  %v7301_v25 = vld [vmem:[#allocation25_spill] sm:$0xff] }
 0x2fe   :  { %v7300_v9 = vld [vmem:[#allocation24_spill] sm:$0xff]  ;;  %v7302_v4 = vld [vmem:[#allocation26_spill] sm:$0xff]  ;;  %v7305_v42 = vld [vmem:[#allocation29_spill] sm:$0xff] }
 0x2ff   :  { %v5104_v3 = vadd.f32 %v967_v54, %v966_v18  ;;  %v955_v29 = vadd.f32 %v3384_v22, %v954_v23  ;;  %v7288_v54 = vld [vmem:[#allocation10_spill] sm:$0xff]  ;;  %v7303_v23 = vld [vmem:[#allocation27_spill] sm:$0xff] }
 0x300   :  { %v7290_v18 = vld [vmem:[#allocation14_spill] sm:$0xff] }
 0x301   :  { %3387 = vtanh.f32 %v5104_v3  ;;  %v959_v12 = vsel %vm958_vm14, %v3384_v22, %v955_v29  ;;  %v7292_v22 = vld [vmem:[#allocation17_spill] sm:$0xff]  ;;  %v7304_v29 = vld [vmem:[#allocation28_spill] sm:$0xff]  ;;  %v7306_v21 = vld [vmem:[#allocation30_spill] sm:$0xff] }
 0x302   :  { %v964_v14 = vsel %vm961_vm15, %v963_v24, %v959_v12  ;;  %v7307_v12 = vld [vmem:[#allocation31_spill] sm:$0xff]  ;;  %v7308_v24 = vld [vmem:[#allocation33_spill] sm:$0xff] }
 0x307   :  { %v3388_v32 = vpop.eup %3387 }
 0x308   :  { %v5107_v11 = vmul.f32 %v3388_v32, %v964_v14  ;;  %v7309_v32 = vld [vmem:[#allocation32_spill] sm:$0xff]  ;;  %v7310_v14 = vld [vmem:[#allocation34_spill] sm:$0xff] }
 0x30a   :  { %7286 = vst [vmem:[#allocation36_spill] sm:$0xff] %v5107_v11  ;;  %994 = vmatmul.f32.vlgmr.msrb.gmra.mxu0 %v5107_v11  ;;  %1014 = vmatmul.f32.vlgmr.msrb.gmra.mxu1 %v5107_v11 }
 0x30b   :  { %1034 = vmatmul.f32.vlgmr.msrb.gmra.mxu2 %v5107_v11  ;;  %1054 = vmatmul.f32.vlgmr.msrb.gmra.mxu3 %v5107_v11  ;;  %v7311_v11 = vld [vmem:[#allocation35_spill] sm:$0xff] }
 0x30c   :  { %1286 = vmatpush.msrb.mxu0 %v4632_v63  ;;  %1306 = vmatpush.msrb.mxu1 %v4638_v52 }
 0x30d   :  { %1326 = vmatpush.msrb.mxu2 %v4644_v60  ;;  %1346 = vmatpush.msrb.mxu3 %v4650_v0 }
 0x30e   :  { %1287 = vmatpush.msrb.mxu0 %v4656_v51  ;;  %1307 = vmatpush.msrb.mxu1 %v4662_v2 }
 0x30f   :  { %1327 = vmatpush.msrb.mxu2 %v4668_v30  ;;  %1347 = vmatpush.msrb.mxu3 %v4674_v31 }
 0x310   :  { %1288 = vmatpush.msrb.mxu0 %v4680_v33  ;;  %1308 = vmatpush.msrb.mxu1 %v4686_v34 }
 0x311   :  { %1328 = vmatpush.msrb.mxu2 %v4692_v35  ;;  %1348 = vmatpush.msrb.mxu3 %v4698_v36 }
 0x312   :  { %1289 = vmatpush.msrb.mxu0 %v4704_v37  ;;  %1309 = vmatpush.msrb.mxu1 %v4710_v38 }
 0x313   :  { %1329 = vmatpush.msrb.mxu2 %v4716_v40  ;;  %1349 = vmatpush.msrb.mxu3 %v4722_v41 }
 0x314   :  { %1290 = vmatpush.msrb.mxu0 %v4728_v43  ;;  %1310 = vmatpush.msrb.mxu1 %v4734_v44 }
 0x315   :  { %1330 = vmatpush.msrb.mxu2 %v4740_v45  ;;  %1350 = vmatpush.msrb.mxu3 %v4746_v47 }
 0x316   :  { %1291 = vmatpush.msrb.mxu0 %v4752_v55  ;;  %1311 = vmatpush.msrb.mxu1 %v4758_v59 }
 0x317   :  { %1331 = vmatpush.msrb.mxu2 %v4764_v39  ;;  %1351 = vmatpush.msrb.mxu3 %v4770_v50 }
 0x318   :  { %1292 = vmatpush.msrb.mxu0 %v4776_v56  ;;  %1312 = vmatpush.msrb.mxu1 %v4782_v53 }
 0x319   :  { %1332 = vmatpush.msrb.mxu2 %v4788_v62  ;;  %1352 = vmatpush.msrb.mxu3 %v4794_v49 }
 0x31a   :  { %1293 = vmatpush.msrb.mxu0 %v4800_v58  ;;  %1313 = vmatpush.msrb.mxu1 %v4806_v46 }
 0x31b   :  { %1333 = vmatpush.msrb.mxu2 %v7252_v57  ;;  %1353 = vmatpush.msrb.mxu3 %v7253_v27 }
 0x31c   :  { %1294 = vmatpush.msrb.mxu0 %v7254_v15  ;;  %1314 = vmatpush.msrb.mxu1 %v7255_v16 }
 0x31d   :  { %1334 = vmatpush.msrb.mxu2 %v4836_v48  ;;  %1354 = vmatpush.msrb.mxu3 %v7256_v17 }
 0x31e   :  { %1295 = vmatpush.msrb.mxu0 %v4848_v61  ;;  %1315 = vmatpush.msrb.mxu1 %v4854_v26 }
 0x31f   :  { %1335 = vmatpush.msrb.mxu2 %v7287_v13  ;;  %1355 = vmatpush.msrb.mxu3 %v7288_v54 }
 0x320   :  { %1296 = vmatpush.msrb.mxu0 %v7289_v20  ;;  %1316 = vmatpush.msrb.mxu1 %v7290_v18 }
 0x321   :  { %1336 = vmatpush.msrb.mxu2 %v7291_v19  ;;  %1356 = vmatpush.msrb.mxu3 %v7292_v22 }
 0x322   :  { %1297 = vmatpush.msrb.mxu0 %v7293_v6  ;;  %1317 = vmatpush.msrb.mxu1 %v7294_v10 }
 0x323   :  { %1337 = vmatpush.msrb.mxu2 %v7295_v28  ;;  %1357 = vmatpush.msrb.mxu3 %v7296_v8  ;;  %v7318_v28 = vld [vmem:[#allocation44_spill] sm:$0xff] }
 0x324   :  { %1298 = vmatpush.msrb.mxu0 %v7297_v7  ;;  %1318 = vmatpush.msrb.mxu1 %v7298_v5 }
 0x325   :  { %1338 = vmatpush.msrb.mxu2 %v7299_v1  ;;  %1358 = vmatpush.msrb.mxu3 %v7300_v9  ;;  %v7316_v1 = vld [vmem:[#allocation43_spill] sm:$0xff] }
 0x326   :  { %1299 = vmatpush.msrb.mxu0 %v7301_v25  ;;  %1319 = vmatpush.msrb.mxu1 %v7302_v4  ;;  %v7312_v25 = vld [vmem:[#allocation37_spill] sm:$0xff]  ;;  %v7313_v4 = vld [vmem:[#allocation55_spill] sm:$0xff] }
 0x327   :  { %1339 = vmatpush.msrb.mxu2 %v7303_v23  ;;  %1359 = vmatpush.msrb.mxu3 %v7304_v29  ;;  %v7314_v23 = vld [vmem:[#allocation42_spill] sm:$0xff]  ;;  %v7315_v29 = vld [vmem:[#allocation56_spill] sm:$0xff] }
 0x328   :  { %1300 = vmatpush.msrb.mxu0 %v7305_v42  ;;  %1320 = vmatpush.msrb.mxu1 %v7306_v21  ;;  %v193_v9 = vadd.f32 %v7314_v23, %v7313_v4  ;;  %v234_v42 = vadd.f32 %v7316_v1, %v7315_v29 }
 0x329   :  { %1340 = vmatpush.msrb.mxu2 %v7307_v12  ;;  %1360 = vmatpush.msrb.mxu3 %v7308_v24 }
 0x32a   :  { %1301 = vmatpush.msrb.mxu0 %v7309_v32  ;;  %1321 = vmatpush.msrb.mxu1 %v7310_v14  ;;  %v7317_v32 = vld [vmem:[#allocation59_spill] sm:$0xff] }
 0x32b   :  { %1341 = vmatpush.msrb.mxu2 %v7311_v11  ;;  %1361 = vmatpush.msrb.mxu3 %v7312_v25  ;;  %v316_v14 = vadd.f32 %v7318_v28, %v7317_v32 }
 0x387   :  { %v995_v5 = vpop.f32.mrf.mxu0  ;;  %v1015_v21 = vpop.f32.mrf.mxu1 }
 0x388   :  { %v1058_v7 = vadd.f32 %v995_v5, %v193_v9  ;;  %v1059_v12 = vadd.f32 %v1015_v21, %v234_v42  ;;  %v7319_v9 = vld [vmem:[#allocation61_spill] sm:$0xff] }
 0x38a   :  { %v3159_v8 = vmul.f32 -1.442695, %v1058_v7  ;;  %v3160_v24 = vmul.f32 -1.442695, %v1059_v12  ;;  %v7320_v7 = vld [vmem:[#allocation47_spill] sm:$0xff] }
 0x38b   :  { %v275_v42 = vadd.f32 %v7320_v7, %v7319_v9 }
 0x38c   :  { %3389 = vpow2.f32 %v3159_v8 }
 0x38d   :  { %3391 = vpow2.f32 %v3160_v24 }
 0x38e   :  { %v1055_v11 = vpop.f32.mrf.mxu3  ;;  %v1035_v1 = vpop.f32.mrf.mxu2 }
 0x38f   :  { %v1061_v10 = vadd.f32 %v1055_v11, %v316_v14  ;;  %v1060_v12 = vadd.f32 %v1035_v1, %v275_v42 }
 0x391   :  { %v3161_v25 = vmul.f32 -1.442695, %v1061_v10 }
 0x392   :  { %v3390_v6 = vpop.eup %3389 }
 0x393   :  { %v3392_v22 = vpop.eup %3391  ;;  %v1065_v23 = vadd.f32 1.0, %v3390_v6  ;;  %3393 = vpow2.f32 %v3161_v25 }
 0x394   :  { %v1084_v4 = vadd.f32 1.0, %v3392_v22 }
 0x395   :  { %3395 = vrcp.f32 %v1065_v23  ;;  %v1077_v32 = vand.u32 2147483648, %v1065_v23  ;;  %v1075_v25 = vand.u32 2147483647, %v1065_v23  ;;  %vm1071_vm2 = vweird.f32 %v1065_v23 }
 0x396   :  { %3397 = vrcp.f32 %v1084_v4  ;;  %v1096_v6 = vand.u32 2147483648, %v1084_v4  ;;  %v1094_v19 = vand.u32 2147483647, %v1084_v4  ;;  %vm1090_vm3 = vweird.f32 %v1084_v4 }
 0x397   :  { %v1078_v1 = vor.u32 1.1754944e-38, %v1077_v32  ;;  %vm1076_vm6 = vcmp.eq.f32.partialorder %v1075_v25, 8.507059e+37 }
 0x398   :  { %vm1095_vm7 = vcmp.eq.f32.partialorder %v1094_v19, 8.507059e+37 }
 0x399   :  { %v3394_v5 = vpop.eup %3393 }
 0x39a   :  { %v1104_v8 = vadd.f32 1.0, %v3394_v5 }
 0x39b   :  { %v3396_v21 = vpop.eup %3395 }
 0x39c   :  { %v3398_v28 = vpop.eup %3397  ;;  %v1067_v24 = vmul.f32 %v3396_v21, %v1065_v23  ;;  %3399 = vrcp.f32 %v1104_v8  ;;  %vm1072_vm0 = vweird.f32 %v3396_v21  ;;  %vm1110_vm9 = vweird.f32 %v1104_v8 }
 0x39d   :  { %v1086_v11 = vmul.f32 %v3398_v28, %v1084_v4  ;;  %3401 = vtanh.f32 %v1060_v12  ;;  %vm1091_vm1 = vweird.f32 %v3398_v28  ;;  %vm1073_vm4 = vmor %vm1071_vm2, %vm1072_vm0  ;;  %v1114_v32 = vand.u32 2147483647, %v1104_v8 }
 0x39e   :  { %v1068_v10 = vsub.f32 1.0, %v1067_v24  ;;  %vm1092_vm5 = vmor %vm1090_vm3, %vm1091_vm1  ;;  %v1097_v24 = vor.u32 1.1754944e-38, %v1096_v6 }
 0x39f   :  { %v1087_v14 = vsub.f32 1.0, %v1086_v11  ;;  %vm1115_vm11 = vcmp.eq.f32.partialorder %v1114_v32, 8.507059e+37 }
 0x3a0   :  { %v1069_v22 = vmul.f32 %v3396_v21, %v1068_v10 }
 0x3a1   :  { %v1088_v29 = vmul.f32 %v3398_v28, %v1087_v14 }
 0x3a2   :  { %v3400_v18 = vpop.eup %3399  ;;  %v1070_v7 = vadd.f32 %v3396_v21, %v1069_v22 }
 0x3a3   :  { %v1089_v5 = vadd.f32 %v3398_v28, %v1088_v29  ;;  %v1106_v42 = vmul.f32 %v3400_v18, %v1104_v8  ;;  %v3402_v12 = vpop.eup %3401  ;;  %vm1111_vm8 = vweird.f32 %v3400_v18  ;;  %v1116_v29 = vand.u32 2147483648, %v1104_v8 }
 0x3a4   :  { %v1074_v11 = vsel %vm1073_vm4, %v3396_v21, %v1070_v7  ;;  %vm1112_vm10 = vmor %vm1110_vm9, %vm1111_vm8 }
 0x3a5   :  { %v1079_v9 = vsel %vm1076_vm6, %v1078_v1, %v1074_v11  ;;  %v1093_v10 = vsel %vm1092_vm5, %v3398_v28, %v1089_v5  ;;  %v1107_v20 = vsub.f32 1.0, %v1106_v42  ;;  %v1117_v6 = vor.u32 1.1754944e-38, %v1116_v29  ;;  %v7353_v11 = vld [vmem:[#allocation61_spill] sm:$0xff] }
 0x3a6   :  { %v1098_v14 = vsel %vm1095_vm7, %v1097_v24, %v1093_v10  ;;  %v1121_v54 = vmul.f32 %v3402_v12, %v1079_v9  ;;  %v7354_v12 = vld [vmem:[#allocation51_spill] sm:$0xff] }
 0x3a7   :  { %v1120_v13 = vmul.f32 %v1098_v14, %v5104_v3  ;;  %v1108_v22 = vmul.f32 %v3400_v18, %v1107_v20  ;;  %v7351_v3 = vld [vmem:[#allocation59_spill] sm:$0xff]  ;;  %v278_v10 = vadd.f32 %v7354_v12, %v7353_v11  ;;  %v7355_v12 = vld [vmem:[#allocation49_spill] sm:$0xff] }
 0x3a9   :  { %v5186_v23 = vadd.f32 %v1121_v54, %v1120_v13  ;;  %v1109_v4 = vadd.f32 %v3400_v18, %v1108_v22  ;;  %v7352_v13 = vld [vmem:[#allocation48_spill] sm:$0xff] }
 0x3aa   :  { %v319_v54 = vadd.f32 %v7352_v13, %v7351_v3  ;;  %v3288_v13 = vld [vmem:[%s6872_s1 + $0x3a0] sm:$0xff] }
 0x3ab   :  { %3403 = vtanh.f32 %v5186_v23  ;;  %v1113_v21 = vsel %vm1112_vm10, %v3400_v18, %v1109_v4 }
 0x3ac   :  { %v1118_v28 = vsel %vm1115_vm11, %v1117_v6, %v1113_v21 }
 0x3b1   :  { %v3404_v19 = vpop.eup %3403 }
 0x3b2   :  { %v5189_v25 = vmul.f32 %v3404_v19, %v1118_v28 }
 0x3b4   :  { %1148 = vmatmul.f32.vlgmr.msra.gmra.mxu0 %v5189_v25  ;;  %1168 = vmatmul.f32.vlgmr.msra.gmra.mxu1 %v5189_v25 }
 0x3b5   :  { %1188 = vmatmul.f32.vlgmr.msra.gmra.mxu2 %v5189_v25  ;;  %1208 = vmatmul.f32.vlgmr.msra.gmra.mxu3 %v5189_v25 }
 0x3b6   :  { %1440 = vmatpush.msra.mxu0 %v4632_v63  ;;  %1460 = vmatpush.msra.mxu1 %v4638_v52  ;;  %v7321_v63 = vld [vmem:[#allocation13_spill] sm:$0xff]  ;;  %v7322_v52 = vld [vmem:[#allocation10_spill] sm:$0xff] }
 0x3b7   :  { %1480 = vmatpush.msra.mxu2 %v4644_v60  ;;  %1500 = vmatpush.msra.mxu3 %v4650_v0  ;;  %v7323_v60 = vld [vmem:[#allocation12_spill] sm:$0xff]  ;;  %v7324_v0 = vld [vmem:[#allocation14_spill] sm:$0xff] }
 0x3b8   :  { %1441 = vmatpush.msra.mxu0 %v4656_v51  ;;  %1461 = vmatpush.msra.mxu1 %v4662_v2  ;;  %v7325_v51 = vld [vmem:[#allocation15_spill] sm:$0xff]  ;;  %v7326_v2 = vld [vmem:[#allocation17_spill] sm:$0xff] }
 0x3b9   :  { %1481 = vmatpush.msra.mxu2 %v4668_v30  ;;  %1501 = vmatpush.msra.mxu3 %v4674_v31  ;;  %v7327_v30 = vld [vmem:[#allocation16_spill] sm:$0xff]  ;;  %v7328_v31 = vld [vmem:[#allocation18_spill] sm:$0xff] }
 0x3ba   :  { %1442 = vmatpush.msra.mxu0 %v4680_v33  ;;  %1462 = vmatpush.msra.mxu1 %v4686_v34  ;;  %v7329_v33 = vld [vmem:[#allocation19_spill] sm:$0xff]  ;;  %v7332_v34 = vld [vmem:[#allocation22_spill] sm:$0xff] }
 0x3bb   :  { %1482 = vmatpush.msra.mxu2 %v4692_v35  ;;  %1502 = vmatpush.msra.mxu3 %v4698_v36  ;;  %v7333_v35 = vld [vmem:[#allocation23_spill] sm:$0xff]  ;;  %v7334_v36 = vld [vmem:[#allocation24_spill] sm:$0xff] }
 0x3bc   :  { %1443 = vmatpush.msra.mxu0 %v4704_v37  ;;  %1463 = vmatpush.msra.mxu1 %v4710_v38  ;;  %v7335_v37 = vld [vmem:[#allocation25_spill] sm:$0xff]  ;;  %v7336_v38 = vld [vmem:[#allocation26_spill] sm:$0xff] }
 0x3bd   :  { %1483 = vmatpush.msra.mxu2 %v4716_v40  ;;  %1503 = vmatpush.msra.mxu3 %v4722_v41  ;;  %v7337_v40 = vld [vmem:[#allocation27_spill] sm:$0xff]  ;;  %v7338_v41 = vld [vmem:[#allocation28_spill] sm:$0xff] }
 0x3be   :  { %1444 = vmatpush.msra.mxu0 %v4728_v43  ;;  %1464 = vmatpush.msra.mxu1 %v4734_v44  ;;  %v7339_v43 = vld [vmem:[#allocation29_spill] sm:$0xff]  ;;  %v7340_v44 = vld [vmem:[#allocation30_spill] sm:$0xff] }
 0x3bf   :  { %1484 = vmatpush.msra.mxu2 %v4740_v45  ;;  %1504 = vmatpush.msra.mxu3 %v4746_v47  ;;  %v7341_v45 = vld [vmem:[#allocation31_spill] sm:$0xff]  ;;  %v7342_v47 = vld [vmem:[#allocation33_spill] sm:$0xff] }
 0x3c0   :  { %1445 = vmatpush.msra.mxu0 %v4752_v55  ;;  %1465 = vmatpush.msra.mxu1 %v4758_v59  ;;  %v7343_v55 = vld [vmem:[#allocation32_spill] sm:$0xff]  ;;  %v7344_v59 = vld [vmem:[#allocation34_spill] sm:$0xff] }
 0x3c1   :  { %1485 = vmatpush.msra.mxu2 %v4764_v39  ;;  %1505 = vmatpush.msra.mxu3 %v4770_v50  ;;  %v7345_v39 = vld [vmem:[#allocation35_spill] sm:$0xff]  ;;  %v7346_v50 = vld [vmem:[#allocation37_spill] sm:$0xff] }
 0x3c2   :  { %1446 = vmatpush.msra.mxu0 %v4776_v56  ;;  %1466 = vmatpush.msra.mxu1 %v4782_v53  ;;  %v7347_v56 = vld [vmem:[#allocation55_spill] sm:$0xff]  ;;  %v7348_v53 = vld [vmem:[#allocation45_spill] sm:$0xff] }
 0x3c3   :  { %1486 = vmatpush.msra.mxu2 %v4788_v62  ;;  %1506 = vmatpush.msra.mxu3 %v4794_v49  ;;  %v196_v62 = vadd.f32 %v7348_v53, %v7347_v56  ;;  %v7349_v49 = vld [vmem:[#allocation56_spill] sm:$0xff] }
 0x3c4   :  { %1447 = vmatpush.msra.mxu0 %v4800_v58  ;;  %1467 = vmatpush.msra.mxu1 %v4806_v46  ;;  %v7350_v58 = vld [vmem:[#allocation46_spill] sm:$0xff] }
 0x3c5   :  { %1487 = vmatpush.msra.mxu2 %v7252_v57  ;;  %1507 = vmatpush.msra.mxu3 %v7253_v27  ;;  %v237_v46 = vadd.f32 %v7350_v58, %v7349_v49 }
 0x3c6   :  { %1448 = vmatpush.msra.mxu0 %v7254_v15  ;;  %1468 = vmatpush.msra.mxu1 %v7255_v16 }
 0x3c7   :  { %1488 = vmatpush.msra.mxu2 %v4836_v48  ;;  %1508 = vmatpush.msra.mxu3 %v7256_v17 }
 0x3c8   :  { %1449 = vmatpush.msra.mxu0 %v4848_v61  ;;  %1469 = vmatpush.msra.mxu1 %v4854_v26  ;;  %v7330_v61 = vld [vmem:[#allocation21_spill] sm:$0xff]  ;;  %v7331_v26 = vld [vmem:[#allocation20_spill] sm:$0xff] }
 0x3c9   :  { %1489 = vmatpush.msra.mxu2 %v7321_v63  ;;  %1509 = vmatpush.msra.mxu3 %v7322_v52 }
 0x3ca   :  { %1450 = vmatpush.msra.mxu0 %v7323_v60  ;;  %1470 = vmatpush.msra.mxu1 %v7324_v0 }
 0x3cb   :  { %1490 = vmatpush.msra.mxu2 %v7325_v51  ;;  %1510 = vmatpush.msra.mxu3 %v7326_v2 }
 0x3cc   :  { %1451 = vmatpush.msra.mxu0 %v7327_v30  ;;  %1471 = vmatpush.msra.mxu1 %v7328_v31 }
 0x3cd   :  { %1491 = vmatpush.msra.mxu2 %v7329_v33  ;;  %1511 = vmatpush.msra.mxu3 %v7330_v61 }
 0x3ce   :  { %1452 = vmatpush.msra.mxu0 %v7331_v26  ;;  %1472 = vmatpush.msra.mxu1 %v7332_v34 }
 0x3cf   :  { %1492 = vmatpush.msra.mxu2 %v7333_v35  ;;  %1512 = vmatpush.msra.mxu3 %v7334_v36 }
 0x3d0   :  { %1453 = vmatpush.msra.mxu0 %v7335_v37  ;;  %1473 = vmatpush.msra.mxu1 %v7336_v38 }
 0x3d1   :  { %1493 = vmatpush.msra.mxu2 %v7337_v40  ;;  %1513 = vmatpush.msra.mxu3 %v7338_v41 }
 0x3d2   :  { %1454 = vmatpush.msra.mxu0 %v7339_v43  ;;  %1474 = vmatpush.msra.mxu1 %v7340_v44 }
 0x3d3   :  { %1494 = vmatpush.msra.mxu2 %v7341_v45  ;;  %1514 = vmatpush.msra.mxu3 %v7342_v47 }
 0x3d4   :  { %1455 = vmatpush.msra.mxu0 %v7343_v55  ;;  %1475 = vmatpush.msra.mxu1 %v7344_v59 }
 0x3d5   :  { %1495 = vmatpush.msra.mxu2 %v7345_v39  ;;  %1515 = vmatpush.msra.mxu3 %v7346_v50 }
 0x431   :  { %v1149_v48 = vpop.f32.mrf.mxu0  ;;  %v1169_v57 = vpop.f32.mrf.mxu1 }
 0x432   :  { %v1212_v27 = vadd.f32 %v1149_v48, %v196_v62  ;;  %v1213_v15 = vadd.f32 %v1169_v57, %v237_v46  ;;  %v3297_v46 = vld [vmem:[%s6872_s1 + $0x3e8] sm:$0xff]  ;;  %v3298_v48 = vld [vmem:[%s6872_s1 + $0x3f0] sm:$0xff]  ;;  %v3299_v57 = vld [vmem:[%s6872_s1 + $0x3f8] sm:$0xff] }
 0x434   :  { %v3162_v16 = vmul.f32 -1.442695, %v1212_v27  ;;  %v3163_v17 = vmul.f32 -1.442695, %v1213_v15  ;;  %v3292_v27 = vld [vmem:[%s6872_s1 + $0x3c0] sm:$0xff]  ;;  %v3293_v15 = vld [vmem:[%s6872_s1 + $0x3c8] sm:$0xff] }
 0x436   :  { %3405 = vpow2.f32 %v3162_v16  ;;  %v3294_v16 = vld [vmem:[%s6872_s1 + $0x3d0] sm:$0xff] }
 0x437   :  { %3407 = vpow2.f32 %v3163_v17  ;;  %v3295_v17 = vld [vmem:[%s6872_s1 + $0x3d8] sm:$0xff] }
 0x438   :  { %v1209_v20 = vpop.f32.mrf.mxu3  ;;  %v1189_v42 = vpop.f32.mrf.mxu2 }
 0x439   :  { %v1215_v18 = vadd.f32 %v1209_v20, %v319_v54  ;;  %v1214_v4 = vadd.f32 %v1189_v42, %v278_v10  ;;  %v3289_v54 = vld [vmem:[%s6872_s1 + $0x3a8] sm:$0xff]  ;;  %v3290_v20 = vld [vmem:[%s6872_s1 + $0x3b0] sm:$0xff]  ;;  %v199_v10 = vadd.f32 %v7355_v12, %v7347_v56 }
 0x43a   :  { %v3281_v42 = vld [vmem:[%s6872_s1 + $0x368] sm:$0xff] }
 0x43b   :  { %v3164_v9 = vmul.f32 -1.442695, %v1215_v18  ;;  %v3291_v18 = vld [vmem:[%s6872_s1 + $0x3b8] sm:$0xff] }
 0x43c   :  { %v3406_v8 = vpop.eup %3405 }
 0x43d   :  { %v3408_v7 = vpop.eup %3407  ;;  %v1219_v1 = vadd.f32 1.0, %v3406_v8  ;;  %3409 = vpow2.f32 %v3164_v9  ;;  %v3284_v9 = vld [vmem:[%s6872_s1 + $0x380] sm:$0xff]  ;;  %v3285_v8 = vld [vmem:[%s6872_s1 + $0x388] sm:$0xff] }
 0x43e   :  { %v1238_v5 = vadd.f32 1.0, %v3408_v7  ;;  %v3286_v7 = vld [vmem:[%s6872_s1 + $0x390] sm:$0xff] }
 0x43f   :  { %3411 = vrcp.f32 %v1219_v1  ;;  %v1231_v28 = vand.u32 2147483648, %v1219_v1  ;;  %v1229_v60 = vand.u32 2147483647, %v1219_v1  ;;  %vm1225_vm14 = vweird.f32 %v1219_v1 }
 0x440   :  { %3413 = vrcp.f32 %v1238_v5  ;;  %v1250_v63 = vand.u32 2147483648, %v1238_v5  ;;  %v1248_v51 = vand.u32 2147483647, %v1238_v5  ;;  %vm1244_vm15 = vweird.f32 %v1238_v5 }
 0x441   :  { %v1232_v31 = vor.u32 1.1754944e-38, %v1231_v28  ;;  %vm1230_vm2 = vcmp.eq.f32.partialorder %v1229_v60, 8.507059e+37  ;;  %v3272_v60 = vld [vmem:[%s6872_s1 + $0x320] sm:$0xff] }
 0x442   :  { %v1251_v26 = vor.u32 1.1754944e-38, %v1250_v63  ;;  %vm1249_vm3 = vcmp.eq.f32.partialorder %v1248_v51, 8.507059e+37  ;;  %v3274_v51 = vld [vmem:[%s6872_s1 + $0x330] sm:$0xff] }
 0x443   :  { %v3410_v24 = vpop.eup %3409 }
 0x444   :  { %v1258_v14 = vadd.f32 1.0, %v3410_v24  ;;  %v3282_v24 = vld [vmem:[%s6872_s1 + $0x370] sm:$0xff] }
 0x445   :  { %v3412_v22 = vpop.eup %3411 }
 0x446   :  { %v3414_v29 = vpop.eup %3413  ;;  %v1221_v32 = vmul.f32 %v3412_v22, %v1219_v1  ;;  %3415 = vrcp.f32 %v1258_v14  ;;  %vm1226_vm12 = vweird.f32 %v3412_v22  ;;  %v1270_v55 = vand.u32 2147483648, %v1258_v14  ;;  %v3287_v1 = vld [vmem:[%s6872_s1 + $0x398] sm:$0xff] }
 0x447   :  { %v1240_v21 = vmul.f32 %v3414_v29, %v1238_v5  ;;  %3417 = vtanh.f32 %v1214_v4  ;;  %vm1245_vm13 = vweird.f32 %v3414_v29  ;;  %vm1227_vm0 = vmor %vm1225_vm14, %vm1226_vm12  ;;  %vm1264_vm5 = vweird.f32 %v1258_v14  ;;  %v3280_v5 = vld [vmem:[%s6872_s1 + $0x360] sm:$0xff]  ;;  %v3283_v4 = vld [vmem:[%s6872_s1 + $0x378] sm:$0xff] }
 0x448   :  { %v1222_v6 = vsub.f32 1.0, %v1221_v32  ;;  %vm1246_vm1 = vmor %vm1244_vm15, %vm1245_vm13  ;;  %v1268_v59 = vand.u32 2147483647, %v1258_v14  ;;  %v1271_v50 = vor.u32 1.1754944e-38, %v1270_v55  ;;  %v3261_v55 = vld [vmem:[%s6872_s1 + $0x2c8] sm:$0xff] }
 0x449   :  { %v1241_v19 = vsub.f32 1.0, %v1240_v21  ;;  %v3276_v21 = vld [vmem:[%s6872_s1 + $0x340] sm:$0xff] }
 0x44a   :  { %v1223_v52 = vmul.f32 %v3412_v22, %v1222_v6  ;;  %vm1269_vm7 = vcmp.eq.f32.partialorder %v1268_v59, 8.507059e+37  ;;  %v3277_v6 = vld [vmem:[%s6872_s1 + $0x348] sm:$0xff]  ;;  %v3262_v59 = vld [vmem:[%s6872_s1 + $0x2d0] sm:$0xff] }
 0x44b   :  { %v1242_v0 = vmul.f32 %v3414_v29, %v1241_v19  ;;  %v3278_v19 = vld [vmem:[%s6872_s1 + $0x350] sm:$0xff] }
 0x44c   :  { %v3416_v2 = vpop.eup %3415  ;;  %v1224_v30 = vadd.f32 %v3412_v22, %v1223_v52  ;;  %v3279_v52 = vld [vmem:[%s6872_s1 + $0x358] sm:$0xff] }
 0x44d   :  { %v1243_v33 = vadd.f32 %v3414_v29, %v1242_v0  ;;  %v1260_v61 = vmul.f32 %v3416_v2, %v1258_v14  ;;  %v3418_v35 = vpop.eup %3417  ;;  %vm1265_vm4 = vweird.f32 %v3416_v2  ;;  %v7356_v14 = vld [vmem:[#allocation50_spill] sm:$0xff]  ;;  %v3273_v0 = vld [vmem:[%s6872_s1 + $0x328] sm:$0xff] }
 0x44e   :  { %v1228_v34 = vsel %vm1227_vm0, %v3412_v22, %v1224_v30  ;;  %vm1266_vm6 = vmor %vm1264_vm5, %vm1265_vm4  ;;  %v240_v22 = vadd.f32 %v7356_v14, %v7349_v49  ;;  %v3242_v14 = vld [vmem:[%s6872_s1 + $0x230] sm:$0xff] }
 0x44f   :  { %v1233_v36 = vsel %vm1230_vm2, %v1232_v31, %v1228_v34  ;;  %v1247_v37 = vsel %vm1246_vm1, %v3414_v29, %v1243_v33  ;;  %v1261_v38 = vsub.f32 1.0, %v1260_v61  ;;  %v3275_v31 = vld [vmem:[%s6872_s1 + $0x338] sm:$0xff]  ;;  %v3268_v33 = vld [vmem:[%s6872_s1 + $0x300] sm:$0xff]  ;;  %v3269_v61 = vld [vmem:[%s6872_s1 + $0x308] sm:$0xff] }
 0x450   :  { %v1252_v40 = vsel %vm1249_vm3, %v1251_v26, %v1247_v37  ;;  %v1275_v41 = vmul.f32 %v3418_v35, %v1233_v36  ;;  %v3270_v26 = vld [vmem:[%s6872_s1 + $0x310] sm:$0xff]  ;;  %v3271_v34 = vld [vmem:[%s6872_s1 + $0x318] sm:$0xff]  ;;  %v7357_v35 = vld [vmem:[#allocation52_spill] sm:$0xff] }
 0x451   :  { %v1274_v43 = vmul.f32 %v1252_v40, %v5186_v23  ;;  %v1262_v44 = vmul.f32 %v3416_v2, %v1261_v38  ;;  %v3296_v23 = vld [vmem:[%s6872_s1 + $0x3e0] sm:$0xff]  ;;  %v322_v36 = vadd.f32 %v7357_v35, %v7351_v3  ;;  %v3265_v38 = vld [vmem:[%s6872_s1 + $0x2e8] sm:$0xff]  ;;  %v3266_v40 = vld [vmem:[%s6872_s1 + $0x2f0] sm:$0xff] }
 0x452   :  { %v3264_v37 = vld [vmem:[%s6872_s1 + $0x2e0] sm:$0xff] }
 0x453   :  { %v5268_v45 = vadd.f32 %v1275_v41, %v1274_v43  ;;  %v1263_v47 = vadd.f32 %v3416_v2, %v1262_v44  ;;  %v3267_v43 = vld [vmem:[%s6872_s1 + $0x2f8] sm:$0xff] }
 0x455   :  { %3419 = vtanh.f32 %v5268_v45  ;;  %v1267_v39 = vsel %vm1266_vm6, %v3416_v2, %v1263_v47  ;;  %v3260_v47 = vld [vmem:[%s6872_s1 + $0x2c0] sm:$0xff] }
 0x456   :  { %v1272_v62 = vsel %vm1269_vm7, %v1271_v50, %v1267_v39  ;;  %v3263_v39 = vld [vmem:[%s6872_s1 + $0x2d8] sm:$0xff] }
 0x45b   :  { %v3420_v53 = vpop.eup %3419 }
 0x45c   :  { %v5271_v58 = vmul.f32 %v3420_v53, %v1272_v62  ;;  %v3256_v53 = vld [vmem:[%s6872_s1 + $0x2a0] sm:$0xff]  ;;  %v3257_v62 = vld [vmem:[%s6872_s1 + $0x2a8] sm:$0xff] }
 0x45e   :  { %1302 = vmatmul.f32.vlgmr.msrb.gmra.mxu0 %v5271_v58  ;;  %1322 = vmatmul.f32.vlgmr.msrb.gmra.mxu1 %v5271_v58 }
 0x45f   :  { %1342 = vmatmul.f32.vlgmr.msrb.gmra.mxu2 %v5271_v58  ;;  %1362 = vmatmul.f32.vlgmr.msrb.gmra.mxu3 %v5271_v58 }
 0x460   :  { %1738 = vmatpush.msrb.mxu0 %v3296_v23  ;;  %1779 = vmatpush.msrb.mxu1 %v3297_v46  ;;  %v3258_v23 = vld [vmem:[%s6872_s1 + $0x2b0] sm:$0xff] }
 0x461   :  { %1820 = vmatpush.msrb.mxu2 %v3298_v48  ;;  %1861 = vmatpush.msrb.mxu3 %v3299_v57  ;;  %v3259_v48 = vld [vmem:[%s6872_s1 + $0x2b8] sm:$0xff]  ;;  %v3252_v57 = vld [vmem:[%s6872_s1 + $0x280] sm:$0xff] }
 0x462   :  { %1739 = vmatpush.msrb.mxu0 %v3292_v27  ;;  %1780 = vmatpush.msrb.mxu1 %v3293_v15  ;;  %v3253_v27 = vld [vmem:[%s6872_s1 + $0x288] sm:$0xff] }
 0x463   :  { %1821 = vmatpush.msrb.mxu2 %v3294_v16  ;;  %1862 = vmatpush.msrb.mxu3 %v3295_v17  ;;  %v3254_v17 = vld [vmem:[%s6872_s1 + $0x290] sm:$0xff] }
 0x464   :  { %1740 = vmatpush.msrb.mxu0 %v3288_v13  ;;  %1781 = vmatpush.msrb.mxu1 %v3289_v54  ;;  %v3255_v13 = vld [vmem:[%s6872_s1 + $0x298] sm:$0xff] }
 0x465   :  { %1822 = vmatpush.msrb.mxu2 %v3290_v20  ;;  %1863 = vmatpush.msrb.mxu3 %v3291_v18  ;;  %v3248_v20 = vld [vmem:[%s6872_s1 + $0x260] sm:$0xff]  ;;  %v3249_v18 = vld [vmem:[%s6872_s1 + $0x268] sm:$0xff] }
 0x466   :  { %1741 = vmatpush.msrb.mxu0 %v3284_v9  ;;  %1782 = vmatpush.msrb.mxu1 %v3285_v8  ;;  %v3250_v9 = vld [vmem:[%s6872_s1 + $0x270] sm:$0xff]  ;;  %v3251_v8 = vld [vmem:[%s6872_s1 + $0x278] sm:$0xff] }
 0x467   :  { %1823 = vmatpush.msrb.mxu2 %v3286_v7  ;;  %1864 = vmatpush.msrb.mxu3 %v3287_v1  ;;  %v3244_v7 = vld [vmem:[%s6872_s1 + $0x240] sm:$0xff]  ;;  %v3245_v1 = vld [vmem:[%s6872_s1 + $0x248] sm:$0xff] }
 0x468   :  { %1742 = vmatpush.msrb.mxu0 %v3280_v5  ;;  %1783 = vmatpush.msrb.mxu1 %v3281_v42  ;;  %v3246_v5 = vld [vmem:[%s6872_s1 + $0x250] sm:$0xff]  ;;  %v3247_v42 = vld [vmem:[%s6872_s1 + $0x258] sm:$0xff] }
 0x469   :  { %1824 = vmatpush.msrb.mxu2 %v3282_v24  ;;  %1865 = vmatpush.msrb.mxu3 %v3283_v4  ;;  %v3240_v24 = vld [vmem:[%s6872_s1 + $0x220] sm:$0xff] }
 0x46a   :  { %1743 = vmatpush.msrb.mxu0 %v3276_v21  ;;  %1784 = vmatpush.msrb.mxu1 %v3277_v6  ;;  %v3236_v21 = vld [vmem:[%s6872_s1 + $0x200] sm:$0xff]  ;;  %v3237_v6 = vld [vmem:[%s6872_s1 + $0x208] sm:$0xff] }
 0x46b   :  { %1825 = vmatpush.msrb.mxu2 %v3278_v19  ;;  %1866 = vmatpush.msrb.mxu3 %v3279_v52 }
 0x46c   :  { %1744 = vmatpush.msrb.mxu0 %v3272_v60  ;;  %1785 = vmatpush.msrb.mxu1 %v3273_v0 }
 0x46d   :  { %1826 = vmatpush.msrb.mxu2 %v3274_v51  ;;  %1867 = vmatpush.msrb.mxu3 %v3275_v31 }
 0x46e   :  { %1745 = vmatpush.msrb.mxu0 %v3268_v33  ;;  %1786 = vmatpush.msrb.mxu1 %v3269_v61 }
 0x46f   :  { %1827 = vmatpush.msrb.mxu2 %v3270_v26  ;;  %1868 = vmatpush.msrb.mxu3 %v3271_v34 }
 0x470   :  { %1746 = vmatpush.msrb.mxu0 %v3264_v37  ;;  %1787 = vmatpush.msrb.mxu1 %v3265_v38 }
 0x471   :  { %1828 = vmatpush.msrb.mxu2 %v3266_v40  ;;  %1869 = vmatpush.msrb.mxu3 %v3267_v43 }
 0x472   :  { %1747 = vmatpush.msrb.mxu0 %v3260_v47  ;;  %1788 = vmatpush.msrb.mxu1 %v3261_v55 }
 0x473   :  { %1829 = vmatpush.msrb.mxu2 %v3262_v59  ;;  %1870 = vmatpush.msrb.mxu3 %v3263_v39 }
 0x474   :  { %1748 = vmatpush.msrb.mxu0 %v3256_v53  ;;  %1789 = vmatpush.msrb.mxu1 %v3257_v62 }
 0x475   :  { %1830 = vmatpush.msrb.mxu2 %v3258_v23  ;;  %1871 = vmatpush.msrb.mxu3 %v3259_v48 }
 0x476   :  { %1749 = vmatpush.msrb.mxu0 %v3252_v57  ;;  %1790 = vmatpush.msrb.mxu1 %v3253_v27 }
 0x477   :  { %1831 = vmatpush.msrb.mxu2 %v3254_v17  ;;  %1872 = vmatpush.msrb.mxu3 %v3255_v13 }
 0x478   :  { %1750 = vmatpush.msrb.mxu0 %v3248_v20  ;;  %1791 = vmatpush.msrb.mxu1 %v3249_v18  ;;  %v7360_v18 = vld [vmem:[#allocation5_spill] sm:$0xff] }
 0x479   :  { %1832 = vmatpush.msrb.mxu2 %v3250_v9  ;;  %1873 = vmatpush.msrb.mxu3 %v3251_v8  ;;  %v7361_v9 = vld [vmem:[#allocation11_spill] sm:$0xff]  ;;  %v5510_v8 = vld [vmem:[%s6874_s2 + $0x3e0] sm:$0xff] }
 0x47a   :  { %1751 = vmatpush.msrb.mxu0 %v3244_v7  ;;  %1792 = vmatpush.msrb.mxu1 %v3245_v1  ;;  %7362 = vst [vmem:[#allocation4_spill] sm:$0xff] %v5510_v8  ;;  %v5515_v7 = vld [vmem:[%s6874_s2 + $0x3e8] sm:$0xff]  ;;  %v5520_v1 = vld [vmem:[%s6874_s2 + $0x3c0] sm:$0xff] }
 0x47b   :  { %1833 = vmatpush.msrb.mxu2 %v3246_v5  ;;  %1874 = vmatpush.msrb.mxu3 %v3247_v42  ;;  %v5527_v5 = vld [vmem:[%s6874_s2 + $0x3c8] sm:$0xff]  ;;  %v5532_v42 = vld [vmem:[%s6874_s2 + $0x3f8] sm:$0xff] }
 0x47c   :  { %1752 = vmatpush.msrb.mxu0 %v3240_v24  ;;  %7363 = vst [vmem:[#allocation6_spill] sm:$0xff] %v5527_v5  ;;  %v5538_v24 = vld [vmem:[%s6874_s2 + $0x3a0] sm:$0xff] }
 0x47d   :  { %1834 = vmatpush.msrb.mxu2 %v3242_v14  ;;  %v7366_v14 = vld [vmem:[#allocation36_spill] sm:$0xff] }
 0x47e   :  { %1753 = vmatpush.msrb.mxu0 %v3236_v21  ;;  %v5603_v21 = vld [vmem:[%s6874_s2 + $0x360] sm:$0xff] }
 0x4db   :  { %v1303_v29 = vpop.f32.mrf.mxu0  ;;  %v1323_v32 = vpop.f32.mrf.mxu1 }
 0x4dc   :  { %v1366_v28 = vadd.f32 %v1303_v29, %v199_v10  ;;  %v1367_v63 = vadd.f32 %v1323_v32, %v240_v22  ;;  %v3241_v10 = vld [vmem:[%s6872_s1 + $0x228] sm:$0xff]  ;;  %v3243_v22 = vld [vmem:[%s6872_s1 + $0x238] sm:$0xff] }
 0x4dd   :  { %v7358_v29 = vld [vmem:[#allocation57_spill] sm:$0xff]  ;;  %1793 = vmatpush.msrb.mxu1 %v3241_v10  ;;  %1875 = vmatpush.msrb.mxu3 %v3243_v22  ;;  %v5548_v10 = vld [vmem:[%s6874_s2 + $0x3d8] sm:$0xff]  ;;  %v5570_v22 = vld [vmem:[%s6874_s2 + $0x3f0] sm:$0xff] }
 0x4de   :  { %v3165_v2 = vmul.f32 -1.442695, %v1366_v28  ;;  %v3166_v30 = vmul.f32 -1.442695, %v1367_v63  ;;  %v281_v32 = vadd.f32 %v7358_v29, %v7353_v11  ;;  %v3238_v28 = vld [vmem:[%s6872_s1 + $0x210] sm:$0xff]  ;;  %v3239_v63 = vld [vmem:[%s6872_s1 + $0x218] sm:$0xff] }
 0x4df   :  { %1794 = vmatpush.msrb.mxu1 %v3237_v6  ;;  %1835 = vmatpush.msrb.mxu2 %v3238_v28  ;;  %7365 = vst [vmem:[#allocation9_spill] sm:$0xff] %v5548_v10  ;;  %v5592_v29 = vld [vmem:[%s6874_s2 + $0x380] sm:$0xff]  ;;  %v5611_v6 = vld [vmem:[%s6874_s2 + $0x368] sm:$0xff]  ;;  %v5621_v28 = vld [vmem:[%s6874_s2 + $0x390] sm:$0xff] }
 0x4e0   :  { %3421 = vpow2.f32 %v3165_v2  ;;  %1876 = vmatpush.msrb.mxu3 %v3239_v63  ;;  %7368 = vst [vmem:[#allocation38_spill] sm:$0xff] %v5592_v29  ;;  %v5630_v63 = vld [vmem:[%s6874_s2 + $0x378] sm:$0xff] }
 0x4e1   :  { %3423 = vpow2.f32 %v3166_v30 }
 0x4e2   :  { %v1363_v41 = vpop.f32.mrf.mxu3  ;;  %v1343_v12 = vpop.f32.mrf.mxu2 }
 0x4e3   :  { %v1369_v44 = vadd.f32 %v1363_v41, %v322_v36  ;;  %v1368_v60 = vadd.f32 %v1343_v12, %v281_v32  ;;  %v5543_v12 = vld [vmem:[%s6874_s2 + $0x3a8] sm:$0xff] }
 0x4e4   :  { %7364 = vst [vmem:[#allocation7_spill] sm:$0xff] %v5543_v12  ;;  %v5597_v32 = vld [vmem:[%s6874_s2 + $0x388] sm:$0xff] }
 0x4e5   :  { %v3167_v50 = vmul.f32 -1.442695, %v1369_v44 }
 0x4e6   :  { %v3422_v46 = vpop.eup %3421 }
 0x4e7   :  { %v3424_v15 = vpop.eup %3423  ;;  %v5421_v16 = vadd.f32 1.0, %v3422_v46  ;;  %3425 = vpow2.f32 %v3167_v50 }
 0x4e8   :  { %v5429_v54 = vadd.f32 1.0, %v3424_v15 }
 0x4e9   :  { %3427 = vrcp.f32 %v5421_v16  ;;  %v1385_v33 = vand.u32 2147483648, %v5421_v16  ;;  %v1383_v34 = vand.u32 2147483647, %v5421_v16  ;;  %vm1379_vm10 = vweird.f32 %v5421_v16 }
 0x4ea   :  { %3429 = vrcp.f32 %v5429_v54  ;;  %v1404_v61 = vand.u32 2147483648, %v5429_v54  ;;  %v1402_v36 = vand.u32 2147483647, %v5429_v54  ;;  %vm1398_vm11 = vweird.f32 %v5429_v54 }
 0x4eb   :  { %v1386_v40 = vor.u32 1.1754944e-38, %v1385_v33  ;;  %vm1384_vm14 = vcmp.eq.f32.partialorder %v1383_v34, 8.507059e+37  ;;  %v5656_v33 = vld [vmem:[%s6874_s2 + $0x358] sm:$0xff] }
 0x4ec   :  { %v1405_v44 = vor.u32 1.1754944e-38, %v1404_v61  ;;  %vm1403_vm15 = vcmp.eq.f32.partialorder %v1402_v36, 8.507059e+37  ;;  %v5673_v36 = vld [vmem:[%s6874_s2 + $0x328] sm:$0xff] }
 0x4ed   :  { %v3426_v4 = vpop.eup %3425 }
 0x4ee   :  { %v1412_v19 = vadd.f32 1.0, %v3426_v4  ;;  %v5587_v4 = vld [vmem:[%s6874_s2 + $0x3b0] sm:$0xff] }
 0x4ef   :  { %v3428_v52 = vpop.eup %3427 }
 0x4f0   :  { %v3430_v0 = vpop.eup %3429  ;;  %v1375_v51 = vmul.f32 %v3428_v52, %v5421_v16  ;;  %3431 = vrcp.f32 %v1412_v19  ;;  %vm1380_vm8 = vweird.f32 %v3428_v52  ;;  %v1424_v27 = vand.u32 2147483648, %v1412_v19 }
 0x4f1   :  { %v1394_v2 = vmul.f32 %v3430_v0, %v5429_v54  ;;  %3433 = vtanh.f32 %v1368_v60  ;;  %vm1399_vm9 = vweird.f32 %v3430_v0  ;;  %vm1381_vm12 = vmor %vm1379_vm10, %vm1380_vm8  ;;  %vm1418_vm1 = vweird.f32 %v1412_v19  ;;  %v7369_v60 = vld [vmem:[#allocation53_spill] sm:$0xff] }
 0x4f2   :  { %v1376_v30 = vsub.f32 1.0, %v1375_v51  ;;  %vm1400_vm13 = vmor %vm1398_vm11, %vm1399_vm9  ;;  %v1422_v15 = vand.u32 2147483647, %v1412_v19  ;;  %v1425_v17 = vor.u32 1.1754944e-38, %v1424_v27  ;;  %v7370_v51 = vld [vmem:[#allocation54_spill] sm:$0xff]  ;;  %v5747_v27 = vld [vmem:[%s6874_s2 + $0x2a0] sm:$0xff] }
 0x4f3   :  { %v1395_v31 = vsub.f32 1.0, %v1394_v2  ;;  %v243_v2 = vadd.f32 %v7370_v51, %v7349_v49  ;;  %v5663_v49 = vld [vmem:[%s6874_s2 + $0x350] sm:$0xff]  ;;  %7373 = vst [vmem:[#allocation41_spill] sm:$0xff] %v5747_v27 }
 0x4f4   :  { %v1377_v26 = vmul.f32 %v3428_v52, %v1376_v30  ;;  %vm1423_vm3 = vcmp.eq.f32.partialorder %v1422_v15, 8.507059e+37  ;;  %v5646_v30 = vld [vmem:[%s6874_s2 + $0x340] sm:$0xff]  ;;  %v5757_v15 = vld [vmem:[%s6874_s2 + $0x310] sm:$0xff] }
 0x4f5   :  { %v1396_v35 = vmul.f32 %v3430_v0, %v1395_v31  ;;  %v5651_v31 = vld [vmem:[%s6874_s2 + $0x348] sm:$0xff] }
 0x4f6   :  { %v3432_v37 = vpop.eup %3431  ;;  %v1378_v38 = vadd.f32 %v3428_v52, %v1377_v26 }
 0x4f7   :  { %v1397_v41 = vadd.f32 %v3430_v0, %v1396_v35  ;;  %v1414_v43 = vmul.f32 %v3432_v37, %v1412_v19  ;;  %v3434_v55 = vpop.eup %3433  ;;  %vm1419_vm0 = vweird.f32 %v3432_v37  ;;  %v5616_v19 = vld [vmem:[%s6874_s2 + $0x398] sm:$0xff]  ;;  %v5668_v35 = vld [vmem:[%s6874_s2 + $0x320] sm:$0xff] }
 0x4f8   :  { %v1382_v47 = vsel %vm1381_vm12, %v3428_v52, %v1378_v38  ;;  %vm1420_vm2 = vmor %vm1418_vm1, %vm1419_vm0  ;;  %v5635_v52 = vld [vmem:[%s6874_s2 + $0x370] sm:$0xff] }
 0x4f9   :  { %v1387_v59 = vsel %vm1384_vm14, %v1386_v40, %v1382_v47  ;;  %v1401_v39 = vsel %vm1400_vm13, %v3430_v0, %v1397_v41  ;;  %v1415_v50 = vsub.f32 1.0, %v1414_v43  ;;  %v202_v0 = vadd.f32 %v7369_v60, %v7347_v56  ;;  %v5687_v38 = vld [vmem:[%s6874_s2 + $0x330] sm:$0xff]  ;;  %v5692_v43 = vld [vmem:[%s6874_s2 + $0x300] sm:$0xff] }
 0x4fa   :  { %v1406_v53 = vsel %vm1403_vm15, %v1405_v44, %v1401_v39  ;;  %v1429_v62 = vmul.f32 %v3434_v55, %v1387_v59  ;;  %v5697_v44 = vld [vmem:[%s6874_s2 + $0x308] sm:$0xff]  ;;  %v5706_v47 = vld [vmem:[%s6874_s2 + $0x2e0] sm:$0xff]  ;;  %v5716_v59 = vld [vmem:[%s6874_s2 + $0x318] sm:$0xff] }
 0x4fb   :  { %v1428_v23 = vmul.f32 %v1406_v53, %v5268_v45  ;;  %v1416_v46 = vmul.f32 %v3432_v37, %v1415_v50  ;;  %v7359_v45 = vld [vmem:[#allocation62_spill] sm:$0xff]  ;;  %v5711_v55 = vld [vmem:[%s6874_s2 + $0x2e8] sm:$0xff]  ;;  %v5722_v39 = vld [vmem:[%s6874_s2 + $0x2c0] sm:$0xff] }
 0x4fc   :  { %v5727_v50 = vld [vmem:[%s6874_s2 + $0x2c8] sm:$0xff]  ;;  %v5732_v53 = vld [vmem:[%s6874_s2 + $0x2f8] sm:$0xff]  ;;  %v5800_v60 = vld [vmem:[%s6874_s2 + $0x260] sm:$0xff] }
 0x4fd   :  { %v5492_v48 = vadd.f32 %v1429_v62, %v1428_v23  ;;  %v1417_v57 = vadd.f32 %v3432_v37, %v1416_v46  ;;  %v7371_v62 = vld [vmem:[#allocation58_spill] sm:$0xff]  ;;  %v5741_v46 = vld [vmem:[%s6874_s2 + $0x2d8] sm:$0xff]  ;;  %7380 = vst [vmem:[#allocation10_spill] sm:$0xff] %v5800_v60 }
 0x4fe   :  { %v325_v23 = vadd.f32 %v7371_v62, %v7351_v3  ;;  %7372 = vst [vmem:[#allocation39_spill] sm:$0xff] %v5741_v46  ;;  %v5752_v3 = vld [vmem:[%s6874_s2 + $0x2a8] sm:$0xff]  ;;  %v5849_v62 = vld [vmem:[%s6874_s2 + $0x220] sm:$0xff] }
 0x4ff   :  { %3435 = vtanh.f32 %v5492_v48  ;;  %v1421_v16 = vsel %vm1420_vm2, %v3432_v37, %v1417_v57  ;;  %v5679_v37 = vld [vmem:[%s6874_s2 + $0x338] sm:$0xff]  ;;  %7374 = vst [vmem:[#allocation40_spill] sm:$0xff] %v5752_v3 }
 0x500   :  { %v1426_v54 = vsel %vm1423_vm3, %v1425_v17, %v1421_v16  ;;  %v5764_v17 = vld [vmem:[%s6874_s2 + $0x2b8] sm:$0xff]  ;;  %7387 = vst [vmem:[#allocation19_spill] sm:$0xff] %v5849_v62 }
 0x501   :  { %7375 = vst [vmem:[#allocation42_spill] sm:$0xff] %v5764_v17 }
 0x505   :  { %v3436_v13 = vpop.eup %3435 }
 0x506   :  { %v1432_v20 = vmul.f32 %v3436_v13, %v1426_v54  ;;  %v5769_v13 = vld [vmem:[%s6874_s2 + $0x2f0] sm:$0xff]  ;;  %v5776_v54 = vld [vmem:[%s6874_s2 + $0x280] sm:$0xff] }
 0x507   :  { %7376 = vst [vmem:[#allocation43_spill] sm:$0xff] %v5776_v54 }
 0x508   :  { %1456 = vmatmul.f32.vlgmr.msra.gmra.mxu0 %v1432_v20  ;;  %1476 = vmatmul.f32.vlgmr.msra.gmra.mxu1 %v1432_v20 }
 0x509   :  { %1496 = vmatmul.f32.vlgmr.msra.gmra.mxu2 %v1432_v20  ;;  %1516 = vmatmul.f32.vlgmr.msra.gmra.mxu3 %v1432_v20 }
 0x50a   :  { %1938 = vmatpush.msra.mxu0 %v5510_v8  ;;  %1958 = vmatpush.msra.mxu1 %v5515_v7 }
 0x50b   :  { %1998 = vmatpush.msra.mxu3 %v5532_v42  ;;  %1978 = vmatpush.msra.mxu2 %v5570_v22 }
 0x50c   :  { %1939 = vmatpush.msra.mxu0 %v5520_v1  ;;  %1959 = vmatpush.msra.mxu1 %v5527_v5 }
 0x50d   :  { %1999 = vmatpush.msra.mxu3 %v5548_v10 }
 0x50e   :  { %1940 = vmatpush.msra.mxu0 %v5538_v24  ;;  %1960 = vmatpush.msra.mxu1 %v5543_v12 }
 0x510   :  { %1754 = vmatmul.f32.vlgmr.msrb.gmra.mxu0 %v7359_v45  ;;  %1795 = vmatmul.f32.vlgmr.msrb.gmra.mxu1 %v7359_v45 }
 0x511   :  { %1836 = vmatmul.f32.vlgmr.msrb.gmra.mxu2 %v7359_v45  ;;  %1877 = vmatmul.f32.vlgmr.msrb.gmra.mxu3 %v7359_v45 }
 0x512   :  { %1941 = vmatpush.msra.mxu0 %v5592_v29  ;;  %1961 = vmatpush.msra.mxu1 %v5597_v32 }
 0x514   :  { %1942 = vmatpush.msra.mxu0 %v5603_v21  ;;  %1962 = vmatpush.msra.mxu1 %v5611_v6 }
 0x516   :  { %1943 = vmatpush.msra.mxu0 %v5646_v30  ;;  %1963 = vmatpush.msra.mxu1 %v5651_v31 }
 0x518   :  { %1757 = vmatmul.f32.gmra.mxu0 %v7360_v18  ;;  %1798 = vmatmul.f32.gmra.mxu1 %v7360_v18 }
 0x519   :  { %1839 = vmatmul.f32.gmra.mxu2 %v7360_v18  ;;  %1880 = vmatmul.f32.gmra.mxu3 %v7360_v18  ;;  %v5788_v18 = vld [vmem:[%s6874_s2 + $0x298] sm:$0xff] }
 0x51a   :  { %1944 = vmatpush.msra.mxu0 %v5668_v35  ;;  %1964 = vmatpush.msra.mxu1 %v5673_v36  ;;  %7378 = vst [vmem:[#allocation47_spill] sm:$0xff] %v5788_v18 }
 0x51c   :  { %1945 = vmatpush.msra.mxu0 %v5692_v43  ;;  %1965 = vmatpush.msra.mxu1 %v5697_v44 }
 0x51e   :  { %1946 = vmatpush.msra.mxu0 %v5706_v47  ;;  %1966 = vmatpush.msra.mxu1 %v5711_v55 }
 0x520   :  { %1760 = vmatmul.f32.gmra.mxu0 %v7361_v9  ;;  %1801 = vmatmul.f32.gmra.mxu1 %v7361_v9 }
 0x521   :  { %1842 = vmatmul.f32.gmra.mxu2 %v7361_v9  ;;  %1883 = vmatmul.f32.gmra.mxu3 %v7361_v9  ;;  %v5793_v9 = vld [vmem:[%s6874_s2 + $0x2d0] sm:$0xff] }
 0x522   :  { %1947 = vmatpush.msra.mxu0 %v5722_v39  ;;  %1967 = vmatpush.msra.mxu1 %v5727_v50  ;;  %7379 = vst [vmem:[#allocation13_spill] sm:$0xff] %v5793_v9 }
 0x524   :  { %1948 = vmatpush.msra.mxu0 %v5747_v27  ;;  %1968 = vmatpush.msra.mxu1 %v5752_v3 }
 0x526   :  { %1949 = vmatpush.msra.mxu0 %v5776_v54 }
 0x528   :  { %1763 = vmatmul.f32.gmra.mxu0 %v7366_v14  ;;  %1804 = vmatmul.f32.gmra.mxu1 %v7366_v14 }
 0x529   :  { %1845 = vmatmul.f32.gmra.mxu2 %v7366_v14  ;;  %1886 = vmatmul.f32.gmra.mxu3 %v7366_v14 }
 0x52a   :  { %1950 = vmatpush.msra.mxu0 %v5800_v60  ;;  %v5897_v60 = vld [vmem:[%s6874_s2 + $0x218] sm:$0xff] }
 0x52b   :  { %7396 = vst [vmem:[#allocation27_spill] sm:$0xff] %v5897_v60 }
 0x530   :  { %1766 = vmatmul.f32.gmra.mxu0 %v5189_v25  ;;  %1807 = vmatmul.f32.gmra.mxu1 %v5189_v25 }
 0x531   :  { %1848 = vmatmul.f32.gmra.mxu2 %v5189_v25  ;;  %1889 = vmatmul.f32.gmra.mxu3 %v5189_v25  ;;  %v5576_v25 = vld [vmem:[%s6874_s2 + $0x3d0] sm:$0xff] }
 0x532   :  { %1979 = vmatpush.msra.mxu2 %v5576_v25 }
 0x534   :  { %1980 = vmatpush.msra.mxu2 %v5587_v4 }
 0x536   :  { %1981 = vmatpush.msra.mxu2 %v5621_v28 }
 0x538   :  { %1769 = vmatmul.f32.gmra.mxu0 %v5271_v58  ;;  %1810 = vmatmul.f32.gmra.mxu1 %v5271_v58 }
 0x539   :  { %1851 = vmatmul.f32.gmra.mxu2 %v5271_v58  ;;  %1892 = vmatmul.f32.gmra.mxu3 %v5271_v58  ;;  %v5582_v58 = vld [vmem:[%s6874_s2 + $0x3b8] sm:$0xff] }
 0x53a   :  { %7367 = vst [vmem:[#allocation8_spill] sm:$0xff] %v5582_v58  ;;  %2000 = vmatpush.msra.mxu3 %v5582_v58  ;;  %1982 = vmatpush.msra.mxu2 %v5635_v52 }
 0x53c   :  { %2001 = vmatpush.msra.mxu3 %v5616_v19  ;;  %1983 = vmatpush.msra.mxu2 %v5663_v49 }
 0x53e   :  { %2002 = vmatpush.msra.mxu3 %v5630_v63  ;;  %1984 = vmatpush.msra.mxu2 %v5687_v38 }
 0x540   :  { %1772 = vmatmul.f32.gmra.mxu0 %v1432_v20  ;;  %1813 = vmatmul.f32.gmra.mxu1 %v1432_v20 }
 0x541   :  { %1854 = vmatmul.f32.gmra.mxu2 %v1432_v20  ;;  %1895 = vmatmul.f32.gmra.mxu3 %v1432_v20  ;;  %v5781_v20 = vld [vmem:[%s6874_s2 + $0x288] sm:$0xff] }
 0x542   :  { %2003 = vmatpush.msra.mxu3 %v5656_v33  ;;  %1985 = vmatpush.msra.mxu2 %v5757_v15  ;;  %7377 = vst [vmem:[#allocation44_spill] sm:$0xff] %v5781_v20 }
 0x543   :  { %1969 = vmatpush.msra.mxu1 %v5781_v20 }
 0x544   :  { %2004 = vmatpush.msra.mxu3 %v5679_v37  ;;  %1986 = vmatpush.msra.mxu2 %v5769_v13 }
 0x546   :  { %2005 = vmatpush.msra.mxu3 %v5716_v59  ;;  %1987 = vmatpush.msra.mxu2 %v5793_v9 }
 0x548   :  { %2006 = vmatpush.msra.mxu3 %v5732_v53 }
 0x54a   :  { %2007 = vmatpush.msra.mxu3 %v5741_v46 }
 0x54c   :  { %2008 = vmatpush.msra.mxu3 %v5764_v17 }
 0x54e   :  { %2009 = vmatpush.msra.mxu3 %v5788_v18 }
 0x585   :  { %v1457_v61 = vpop.f32.mrf.mxu0  ;;  %v1477_v56 = vpop.f32.mrf.mxu1 }
 0x586   :  { %v1520_v26 = vadd.f32 %v1457_v61, %v202_v0  ;;  %v1521_v34 = vadd.f32 %v1477_v56, %v243_v2  ;;  %v5805_v0 = vld [vmem:[%s6874_s2 + $0x268] sm:$0xff]  ;;  %v5814_v61 = vld [vmem:[%s6874_s2 + $0x2b0] sm:$0xff]  ;;  %v5819_v56 = vld [vmem:[%s6874_s2 + $0x278] sm:$0xff] }
 0x587   :  { %7381 = vst [vmem:[#allocation12_spill] sm:$0xff] %v5805_v0  ;;  %1970 = vmatpush.msra.mxu1 %v5805_v0  ;;  %1988 = vmatpush.msra.mxu2 %v5814_v61  ;;  %v5892_v0 = vld [vmem:[%s6874_s2 + $0x238] sm:$0xff] }
 0x588   :  { %v3168_v40 = vmul.f32 -1.442695, %v1520_v26  ;;  %v3169_v41 = vmul.f32 -1.442695, %v1521_v34  ;;  %7382 = vst [vmem:[#allocation14_spill] sm:$0xff] %v5814_v61  ;;  %v5828_v34 = vld [vmem:[%s6874_s2 + $0x240] sm:$0xff]  ;;  %2010 = vmatpush.msra.mxu3 %v5819_v56 }
 0x589   :  { %7383 = vst [vmem:[#allocation15_spill] sm:$0xff] %v5819_v56  ;;  %1951 = vmatpush.msra.mxu0 %v5828_v34 }
 0x58a   :  { %3437 = vpow2.f32 %v3168_v40  ;;  %7384 = vst [vmem:[#allocation17_spill] sm:$0xff] %v5828_v34  ;;  %v5833_v40 = vld [vmem:[%s6874_s2 + $0x248] sm:$0xff]  ;;  %v7393_v34 = vld [vmem:[#allocation60_spill] sm:$0xff] }
 0x58b   :  { %3439 = vpow2.f32 %v3169_v41  ;;  %7385 = vst [vmem:[#allocation16_spill] sm:$0xff] %v5833_v40  ;;  %v5841_v41 = vld [vmem:[%s6874_s2 + $0x290] sm:$0xff]  ;;  %1971 = vmatpush.msra.mxu1 %v5833_v40  ;;  %v284_v56 = vadd.f32 %v7393_v34, %v7353_v11  ;;  %1952 = vmatpush.msra.mxu0 %v5849_v62 }
 0x58c   :  { %v1517_v57 = vpop.f32.mrf.mxu3  ;;  %7386 = vst [vmem:[#allocation18_spill] sm:$0xff] %v5841_v41  ;;  %1989 = vmatpush.msra.mxu2 %v5841_v41  ;;  %v5908_v62 = vld [vmem:[%s6874_s2 + $0x230] sm:$0xff] }
 0x58d   :  { %v1523_v16 = vadd.f32 %v1517_v57, %v325_v23  ;;  %v5854_v23 = vld [vmem:[%s6874_s2 + $0x228] sm:$0xff]  ;;  %v5859_v57 = vld [vmem:[%s6874_s2 + $0x258] sm:$0xff]  ;;  %7395 = vst [vmem:[#allocation26_spill] sm:$0xff] %v5892_v0 }
 0x58e   :  { %7388 = vst [vmem:[#allocation21_spill] sm:$0xff] %v5854_v23  ;;  %2011 = vmatpush.msra.mxu3 %v5859_v57  ;;  %1972 = vmatpush.msra.mxu1 %v5854_v23 }
 0x58f   :  { %v3170_v45 = vmul.f32 -1.442695, %v1523_v16  ;;  %7389 = vst [vmem:[#allocation20_spill] sm:$0xff] %v5859_v57  ;;  %v5866_v16 = vld [vmem:[%s6874_s2 + $0x270] sm:$0xff] }
 0x590   :  { %v3438_v14 = vpop.eup %3437  ;;  %7390 = vst [vmem:[#allocation22_spill] sm:$0xff] %v5866_v16  ;;  %v5887_v57 = vld [vmem:[%s6874_s2 + $0x250] sm:$0xff]  ;;  %1990 = vmatpush.msra.mxu2 %v5866_v16  ;;  %2012 = vmatpush.msra.mxu3 %v5892_v0 }
 0x591   :  { %v3440_v51 = vpop.eup %3439  ;;  %v5807_v2 = vadd.f32 1.0, %v3438_v14  ;;  %3441 = vpow2.f32 %v3170_v45  ;;  %v1497_v45 = vpop.f32.mrf.mxu2  ;;  %v5873_v14 = vld [vmem:[%s6874_s2 + $0x200] sm:$0xff]  ;;  %7394 = vst [vmem:[#allocation25_spill] sm:$0xff] %v5887_v57 }
 0x592   :  { %v5821_v26 = vadd.f32 1.0, %v3440_v51  ;;  %7391 = vst [vmem:[#allocation23_spill] sm:$0xff] %v5873_v14  ;;  %v5878_v51 = vld [vmem:[%s6874_s2 + $0x208] sm:$0xff]  ;;  %v1522_v23 = vadd.f32 %v1497_v45, %v284_v56  ;;  %1953 = vmatpush.msra.mxu0 %v5873_v14  ;;  %1991 = vmatpush.msra.mxu2 %v5887_v57 }
 0x593   :  { %3443 = vrcp.f32 %v5807_v2  ;;  %7392 = vst [vmem:[#allocation24_spill] sm:$0xff] %v5878_v51  ;;  %1973 = vmatpush.msra.mxu1 %v5878_v51  ;;  %2013 = vmatpush.msra.mxu3 %v5897_v60  ;;  %v1539_v14 = vand.u32 2147483648, %v5807_v2  ;;  %vm1533_vm6 = vweird.f32 %v5807_v2 }
 0x594   :  { %3445 = vrcp.f32 %v5821_v26  ;;  %7397 = vst [vmem:[#allocation28_spill] sm:$0xff] %v5908_v62  ;;  %2089 = vmatpush.msrb.mxu0 %v5510_v8  ;;  %1992 = vmatpush.msra.mxu2 %v5908_v62  ;;  %v1558_v60 = vand.u32 2147483648, %v5821_v26  ;;  %v1537_v8 = vand.u32 2147483647, %v5807_v2  ;;  %vm1552_vm7 = vweird.f32 %v5821_v26 }
 0x595   :  { %2109 = vmatpush.msrb.mxu1 %v5515_v7  ;;  %2149 = vmatpush.msrb.mxu3 %v5532_v42 }
 0x596   :  { %2090 = vmatpush.msrb.mxu0 %v5520_v1  ;;  %vm1538_vm10 = vcmp.eq.f32.partialorder %v1537_v8, 8.507059e+37 }
 0x597   :  { %v3442_v40 = vpop.eup %3441  ;;  %2110 = vmatpush.msrb.mxu1 %v5527_v5  ;;  %2150 = vmatpush.msrb.mxu3 %v5548_v10 }
 0x598   :  { %v5899_v11 = vadd.f32 1.0, %v3442_v40  ;;  %v5918_v40 = vld [vmem:[%s6874_s2 + $0x210] sm:$0xff]  ;;  %2091 = vmatpush.msrb.mxu0 %v5538_v24 }
 0x599   :  { %v3444_v34 = vpop.eup %3443  ;;  %7398 = vst [vmem:[#allocation29_spill] sm:$0xff] %v5918_v40  ;;  %1993 = vmatpush.msra.mxu2 %v5918_v40  ;;  %2111 = vmatpush.msrb.mxu1 %v5543_v12 }
 0x59a   :  { %v3446_v41 = vpop.eup %3445  ;;  %v1529_v18 = vmul.f32 %v3444_v34, %v5807_v2  ;;  %3447 = vrcp.f32 %v5899_v11  ;;  %vm1534_vm4 = vweird.f32 %v3444_v34  ;;  %2151 = vmatpush.msrb.mxu3 %v5582_v58  ;;  %2092 = vmatpush.msrb.mxu0 %v5592_v29  ;;  %vm1572_vm13 = vweird.f32 %v5899_v11 }
 0x59b   :  { %v1548_v56 = vmul.f32 %v3446_v41, %v5821_v26  ;;  %3449 = vtanh.f32 %v1522_v23  ;;  %vm1553_vm5 = vweird.f32 %v3446_v41  ;;  %2129 = vmatpush.msrb.mxu2 %v5570_v22  ;;  %vm1535_vm8 = vmor %vm1533_vm6, %vm1534_vm4  ;;  %2112 = vmatpush.msrb.mxu1 %v5597_v32 }
 0x59c   :  { %v1530_v45 = vsub.f32 1.0, %v1529_v18  ;;  %vm1554_vm9 = vmor %vm1552_vm7, %vm1553_vm5  ;;  %2152 = vmatpush.msrb.mxu3 %v5616_v19  ;;  %2093 = vmatpush.msrb.mxu0 %v5603_v21 }
 0x59d   :  { %v1549_v51 = vsub.f32 1.0, %v1548_v56  ;;  %v1556_v56 = vand.u32 2147483647, %v5821_v26  ;;  %2130 = vmatpush.msrb.mxu2 %v5576_v25  ;;  %2113 = vmatpush.msrb.mxu1 %v5611_v6 }
 0x59e   :  { %v1531_v0 = vmul.f32 %v3444_v34, %v1530_v45  ;;  %2153 = vmatpush.msrb.mxu3 %v5630_v63  ;;  %2094 = vmatpush.msrb.mxu0 %v5646_v30 }
 0x59f   :  { %v1550_v18 = vmul.f32 %v3446_v41, %v1549_v51  ;;  %v1540_v51 = vor.u32 1.1754944e-38, %v1539_v14  ;;  %vm1557_vm11 = vcmp.eq.f32.partialorder %v1556_v56, 8.507059e+37  ;;  %2131 = vmatpush.msrb.mxu2 %v5587_v4  ;;  %2114 = vmatpush.msrb.mxu1 %v5651_v31  ;;  %v7399_v56 = vld [vmem:[#allocation47_spill] sm:$0xff] }
 0x5a0   :  { %v5934_v23 = vpop.eup %3447  ;;  %v1532_v5 = vadd.f32 %v3444_v34, %v1531_v0  ;;  %v1559_v0 = vor.u32 1.1754944e-38, %v1558_v60  ;;  %2154 = vmatpush.msrb.mxu3 %v5656_v33  ;;  %2095 = vmatpush.msrb.mxu0 %v5668_v35 }
 0x5a1   :  { %v1551_v45 = vadd.f32 %v3446_v41, %v1550_v18  ;;  %v1568_v10 = vmul.f32 %v5934_v23, %v5899_v11  ;;  %v3450_v26 = vpop.eup %3449  ;;  %2132 = vmatpush.msrb.mxu2 %v5621_v28  ;;  %vm1573_vm12 = vweird.f32 %v5934_v23  ;;  %2115 = vmatpush.msrb.mxu1 %v5673_v36 }
 0x5a2   :  { %v1536_v2 = vsel %vm1535_vm8, %v3444_v34, %v1532_v5  ;;  %2155 = vmatpush.msrb.mxu3 %v5679_v37  ;;  %2096 = vmatpush.msrb.mxu0 %v5692_v43  ;;  %vm1574_vm14 = vmor %vm1572_vm13, %vm1573_vm12 }
 0x5a3   :  { %v1541_v58 = vsel %vm1538_vm10, %v1540_v51, %v1536_v2  ;;  %v1555_v14 = vsel %vm1554_vm9, %v3446_v41, %v1551_v45  ;;  %v1569_v18 = vsub.f32 1.0, %v1568_v10  ;;  %2133 = vmatpush.msrb.mxu2 %v5635_v52  ;;  %2116 = vmatpush.msrb.mxu1 %v5697_v44  ;;  %v7401_v51 = vld [vmem:[#allocation10_spill] sm:$0xff]  ;;  %v7402_v45 = vld [vmem:[#allocation12_spill] sm:$0xff]  ;;  %v7404_v2 = vld [vmem:[#allocation17_spill] sm:$0xff] }
 0x5a4   :  { %v1560_v12 = vsel %vm1557_vm11, %v1559_v0, %v1555_v14  ;;  %v1583_v29 = vmul.f32 %v3450_v26, %v1541_v58  ;;  %2156 = vmatpush.msrb.mxu3 %v5716_v59  ;;  %2097 = vmatpush.msrb.mxu0 %v5706_v47  ;;  %v7403_v0 = vld [vmem:[#allocation15_spill] sm:$0xff]  ;;  %v7405_v26 = vld [vmem:[#allocation16_spill] sm:$0xff] }
 0x5a5   :  { %v1582_v8 = vmul.f32 %v1560_v12, %v5492_v48  ;;  %v1570_v5 = vmul.f32 %v5934_v23, %v1569_v18  ;;  %v1578_v48 = vand.u32 2147483648, %v5899_v11  ;;  %2134 = vmatpush.msrb.mxu2 %v5663_v49  ;;  %v1576_v12 = vand.u32 2147483647, %v5899_v11  ;;  %2117 = vmatpush.msrb.mxu1 %v5711_v55  ;;  %v7406_v14 = vld [vmem:[#allocation20_spill] sm:$0xff] }
 0x5a6   :  { %2157 = vmatpush.msrb.mxu3 %v5732_v53  ;;  %2098 = vmatpush.msrb.mxu0 %v5722_v39  ;;  %v7407_v18 = vmov 0.0  }
 0x5a7   :  { %v1584_v10 = vadd.f32 %v1583_v29, %v1582_v8  ;;  %v1571_v58 = vadd.f32 %v5934_v23, %v1570_v5  ;;  %2135 = vmatpush.msrb.mxu2 %v5687_v38  ;;  %v1579_v60 = vor.u32 1.1754944e-38, %v1578_v48  ;;  %vm1577_vm15 = vcmp.eq.f32.partialorder %v1576_v12, 8.507059e+37  ;;  %2118 = vmatpush.msrb.mxu1 %v5727_v50  ;;  %v7408_v8 = vld [vmem:[#allocation19_spill] sm:$0xff]  ;;  %v7409_v5 = vld [vmem:[#allocation21_spill] sm:$0xff]  ;;  %v7412_v48 = vld [vmem:[#allocation24_spill] sm:$0xff] }
 0x5a8   :  { %2158 = vmatpush.msrb.mxu3 %v5741_v46  ;;  %2099 = vmatpush.msrb.mxu0 %v5747_v27  ;;  %v7413_v12 = vld [vmem:[#allocation27_spill] sm:$0xff] }
 0x5a9   :  { %3451 = vtanh.f32 %v1584_v10  ;;  %v1575_v29 = vsel %vm1574_vm14, %v5934_v23, %v1571_v58  ;;  %2136 = vmatpush.msrb.mxu2 %v5757_v15  ;;  %2119 = vmatpush.msrb.mxu1 %v5752_v3  ;;  %v7400_v23 = vld [vmem:[#allocation18_spill] sm:$0xff]  ;;  %v7411_v58 = vld [vmem:[#allocation23_spill] sm:$0xff] }
 0x5aa   :  { %v1580_v11 = vsel %vm1577_vm15, %v1579_v60, %v1575_v29  ;;  %2159 = vmatpush.msrb.mxu3 %v5764_v17  ;;  %2100 = vmatpush.msrb.mxu0 %v5776_v54  ;;  %v7410_v10 = vld [vmem:[#allocation26_spill] sm:$0xff]  ;;  %v7414_v29 = vld [vmem:[#allocation4_spill] sm:$0xff] }
 0x5ab   :  { %2137 = vmatpush.msrb.mxu2 %v5769_v13  ;;  %2120 = vmatpush.msrb.mxu1 %v5781_v20  ;;  %v7415_v60 = vld [vmem:[#allocation6_spill] sm:$0xff] }
 0x5ac   :  { %2160 = vmatpush.msrb.mxu3 %v7399_v56  ;;  %2101 = vmatpush.msrb.mxu0 %v7401_v51 }
 0x5ad   :  { %2138 = vmatpush.msrb.mxu2 %v5793_v9  ;;  %2121 = vmatpush.msrb.mxu1 %v7402_v45 }
 0x5ae   :  { %2161 = vmatpush.msrb.mxu3 %v7403_v0  ;;  %2102 = vmatpush.msrb.mxu0 %v7404_v2 }
 0x5af   :  { %v3452_v41 = vpop.eup %3451  ;;  %2139 = vmatpush.msrb.mxu2 %v5814_v61  ;;  %2122 = vmatpush.msrb.mxu1 %v7405_v26 }
 0x5b0   :  { %v1586_v34 = vmul.f32 %v3452_v41, %v1580_v11  ;;  %2162 = vmatpush.msrb.mxu3 %v7406_v14  ;;  %2103 = vmatpush.msrb.mxu0 %v7408_v8  ;;  %v7416_v41 = vld [vmem:[#allocation9_spill] sm:$0xff]  ;;  %v7417_v11 = vld [vmem:[#allocation7_spill] sm:$0xff] }
 0x5b1   :  { %2140 = vmatpush.msrb.mxu2 %v7400_v23  ;;  %2123 = vmatpush.msrb.mxu1 %v7409_v5 }
 0x5b2   :  { %1775 = vmatmul.f32.gmra.mxu0 %v1586_v34  ;;  %1816 = vmatmul.f32.gmra.mxu1 %v1586_v34 }
 0x5b3   :  { %1857 = vmatmul.f32.gmra.mxu2 %v1586_v34  ;;  %1898 = vmatmul.f32.gmra.mxu3 %v1586_v34  ;;  %v7418_v34 = vld [vmem:[#allocation8_spill] sm:$0xff] }
 0x5b4   :  { %2141 = vmatpush.msrb.mxu2 %v5866_v16  ;;  %2163 = vmatpush.msrb.mxu3 %v7410_v10 }
 0x5b5   :  { %2104 = vmatpush.msrb.mxu0 %v7411_v58  ;;  %2124 = vmatpush.msrb.mxu1 %v7412_v48 }
 0x5b6   :  { %2142 = vmatpush.msrb.mxu2 %v5887_v57  ;;  %2164 = vmatpush.msrb.mxu3 %v7413_v12 }
 0x5b8   :  { %2143 = vmatpush.msrb.mxu2 %v5908_v62 }
 0x5ba   :  { %1954 = vmatmul.f32.vlgmr.msra.gmra.mxu0 %v7407_v18  ;;  %1974 = vmatmul.f32.vlgmr.msra.gmra.mxu1 %v7407_v18 }
 0x5bb   :  { %1994 = vmatmul.f32.vlgmr.msra.gmra.mxu2 %v7407_v18  ;;  %2014 = vmatmul.f32.vlgmr.msra.gmra.mxu3 %v7407_v18  ;;  %v7419_v18 = vld [vmem:[#allocation38_spill] sm:$0xff] }
 0x5bc   :  { %2144 = vmatpush.msrb.mxu2 %v5918_v40  ;;  %2240 = vmatpush.msra.mxu0 %v7414_v29 }
 0x5bd   :  { %2260 = vmatpush.msra.mxu1 %v5515_v7  ;;  %2300 = vmatpush.msra.mxu3 %v5532_v42 }
 0x5be   :  { %2280 = vmatpush.msra.mxu2 %v5570_v22  ;;  %2241 = vmatpush.msra.mxu0 %v5520_v1 }
 0x5bf   :  { %2261 = vmatpush.msra.mxu1 %v7415_v60  ;;  %2301 = vmatpush.msra.mxu3 %v7416_v41 }
 0x5c0   :  { %2281 = vmatpush.msra.mxu2 %v5576_v25  ;;  %2242 = vmatpush.msra.mxu0 %v5538_v24 }
 0x5c1   :  { %2262 = vmatpush.msra.mxu1 %v7417_v11  ;;  %2302 = vmatpush.msra.mxu3 %v7418_v34 }
 0x5c2   :  { %2282 = vmatpush.msra.mxu2 %v5587_v4  ;;  %2243 = vmatpush.msra.mxu0 %v7419_v18 }
 0x5c3   :  { %2263 = vmatpush.msra.mxu1 %v5597_v32  ;;  %2303 = vmatpush.msra.mxu3 %v5616_v19 }
 0x5c4   :  { %2283 = vmatpush.msra.mxu2 %v5621_v28  ;;  %2244 = vmatpush.msra.mxu0 %v5603_v21 }
 0x5c5   :  { %2264 = vmatpush.msra.mxu1 %v5611_v6  ;;  %2304 = vmatpush.msra.mxu3 %v5630_v63 }
 0x5c6   :  { %2284 = vmatpush.msra.mxu2 %v5635_v52  ;;  %2245 = vmatpush.msra.mxu0 %v5646_v30 }
 0x5c7   :  { %2265 = vmatpush.msra.mxu1 %v5651_v31  ;;  %2305 = vmatpush.msra.mxu3 %v5656_v33 }
 0x5c8   :  { %2285 = vmatpush.msra.mxu2 %v5663_v49  ;;  %2246 = vmatpush.msra.mxu0 %v5668_v35 }
 0x5c9   :  { %2266 = vmatpush.msra.mxu1 %v5673_v36  ;;  %2306 = vmatpush.msra.mxu3 %v5679_v37 }
 0x5ca   :  { %2286 = vmatpush.msra.mxu2 %v5687_v38  ;;  %2247 = vmatpush.msra.mxu0 %v5692_v43 }
 0x5cb   :  { %2267 = vmatpush.msra.mxu1 %v5697_v44  ;;  %2307 = vmatpush.msra.mxu3 %v5716_v59 }
 0x5cc   :  { %2287 = vmatpush.msra.mxu2 %v5757_v15  ;;  %2248 = vmatpush.msra.mxu0 %v5706_v47 }
 0x5cd   :  { %2268 = vmatpush.msra.mxu1 %v5711_v55  ;;  %2308 = vmatpush.msra.mxu3 %v5732_v53 }
 0x5ce   :  { %2288 = vmatpush.msra.mxu2 %v5769_v13  ;;  %2249 = vmatpush.msra.mxu0 %v5722_v39 }
 0x5cf   :  { %2269 = vmatpush.msra.mxu1 %v5727_v50  ;;  %2309 = vmatpush.msra.mxu3 %v5741_v46 }
 0x5d0   :  { %2289 = vmatpush.msra.mxu2 %v5793_v9  ;;  %2250 = vmatpush.msra.mxu0 %v5747_v27 }
 0x5d1   :  { %2270 = vmatpush.msra.mxu1 %v5752_v3  ;;  %2310 = vmatpush.msra.mxu3 %v5764_v17 }
 0x5d2   :  { %2290 = vmatpush.msra.mxu2 %v5814_v61  ;;  %2251 = vmatpush.msra.mxu0 %v5776_v54 }
 0x5d3   :  { %2271 = vmatpush.msra.mxu1 %v5781_v20  ;;  %2311 = vmatpush.msra.mxu3 %v7399_v56 }
 0x5d4   :  { %2291 = vmatpush.msra.mxu2 %v7400_v23  ;;  %2252 = vmatpush.msra.mxu0 %v7401_v51 }
 0x5d5   :  { %2272 = vmatpush.msra.mxu1 %v7402_v45  ;;  %2312 = vmatpush.msra.mxu3 %v7403_v0 }
 0x5d6   :  { %2292 = vmatpush.msra.mxu2 %v5866_v16  ;;  %2253 = vmatpush.msra.mxu0 %v7404_v2  ;;  %v1878_v2 = vpop.f32.mrf.mxu3 }
 0x5d7   :  { %2273 = vmatpush.msra.mxu1 %v7405_v26  ;;  %2313 = vmatpush.msra.mxu3 %v7406_v14  ;;  %v1755_v26 = vpop.f32.mrf.mxu0 }
 0x5d8   :  { %2293 = vmatpush.msra.mxu2 %v5887_v57  ;;  %2254 = vmatpush.msra.mxu0 %v7408_v8  ;;  %v1796_v57 = vpop.f32.mrf.mxu1 }
 0x5d9   :  { %2274 = vmatpush.msra.mxu1 %v7409_v5  ;;  %2314 = vmatpush.msra.mxu3 %v7410_v10  ;;  %v1837_v5 = vpop.f32.mrf.mxu2 }
 0x5da   :  { %2294 = vmatpush.msra.mxu2 %v5908_v62  ;;  %2255 = vmatpush.msra.mxu0 %v7411_v58 }
 0x5db   :  { %2275 = vmatpush.msra.mxu1 %v7412_v48  ;;  %2315 = vmatpush.msra.mxu3 %v7413_v12 }
 0x5dc   :  { %2295 = vmatpush.msra.mxu2 %v5918_v40 }
 0x5de   :  { %v6078_v0 = vpop.f32.mrf.mxu3 }
 0x5df   :  { %v6074_v14 = vpop.f32.mrf.mxu0  ;;  %7422 = vst [vmem:[#allocation33_spill] sm:$0xff] %v6078_v0 }
 0x5e0   :  { %7420 = vst [vmem:[#allocation30_spill] sm:$0xff] %v6074_v14  ;;  %v6076_v8 = vpop.f32.mrf.mxu1 }
 0x5e1   :  { %7421 = vst [vmem:[#allocation31_spill] sm:$0xff] %v6076_v8  ;;  %v6084_v58 = vpop.f32.mrf.mxu2 }
 0x5e2   :  { %7425 = vst [vmem:[#allocation35_spill] sm:$0xff] %v6084_v58 }
 0x5e6   :  { %v6086_v48 = vpop.f32.mrf.mxu3 }
 0x5e7   :  { %v6080_v62 = vpop.f32.mrf.mxu0  ;;  %7426 = vst [vmem:[#allocation37_spill] sm:$0xff] %v6086_v48 }
 0x5e8   :  { %7423 = vst [vmem:[#allocation32_spill] sm:$0xff] %v6080_v62  ;;  %v6082_v10 = vpop.f32.mrf.mxu1 }
 0x5e9   :  { %7424 = vst [vmem:[#allocation34_spill] sm:$0xff] %v6082_v10  ;;  %v6092_v16 = vpop.f32.mrf.mxu2 }
 0x5ea   :  { %7429 = vst [vmem:[#allocation56_spill] sm:$0xff] %v6092_v16 }
 0x5ee   :  { %v6094_v14 = vpop.f32.mrf.mxu3 }
 0x5ef   :  { %v6088_v40 = vpop.f32.mrf.mxu0  ;;  %7430 = vst [vmem:[#allocation46_spill] sm:$0xff] %v6094_v14 }
 0x5f0   :  { %7427 = vst [vmem:[#allocation55_spill] sm:$0xff] %v6088_v40  ;;  %v6090_v12 = vpop.f32.mrf.mxu1 }
 0x5f1   :  { %7428 = vst [vmem:[#allocation45_spill] sm:$0xff] %v6090_v12  ;;  %v6100_v0 = vpop.f32.mrf.mxu2 }
 0x5f2   :  { %7433 = vst [vmem:[#allocation61_spill] sm:$0xff] %v6100_v0 }
 0x5f6   :  { %v6102_v62 = vpop.f32.mrf.mxu3 }
 0x5f7   :  { %v6096_v8 = vpop.f32.mrf.mxu0  ;;  %7434 = vst [vmem:[#allocation51_spill] sm:$0xff] %v6102_v62  ;;  %v3235_v62 = vld [vmem:[%s6875_s3 + $0x4] sm:$0xf] }
 0x5f8   :  { %7431 = vst [vmem:[#allocation59_spill] sm:$0xff] %v6096_v8  ;;  %v6098_v45 = vpop.f32.mrf.mxu1  ;;  %v6137_v23 = vperm.slane %v3235_v62, 3 }
 0x5f9   :  { %7432 = vst [vmem:[#allocation48_spill] sm:$0xff] %v6098_v45  ;;  %v6108_v48 = vpop.f32.mrf.mxu2 }
 0x5fa   :  { %7437 = vst [vmem:[#allocation52_spill] sm:$0xff] %v6108_v48  ;;  %v6129_v48 = vperm.slane %v3235_v62, 1  ;;  %v1879_v20 = vadd.f32 %v1878_v2, %v6137_v23 }
 0x5fb   :  { %7449 = vst [vmem:[#allocation9_spill] sm:$0xff] %v6137_v23 }
 0x5fc   :  { %7446 = vst [vmem:[#allocation60_spill] sm:$0xff] %v6129_v48 }
 0x5fe   :  { %v6110_v40 = vpop.f32.mrf.mxu3 }
 0x5ff   :  { %v6104_v10 = vpop.f32.mrf.mxu0  ;;  %7438 = vst [vmem:[#allocation57_spill] sm:$0xff] %v6110_v40 }
 0x600   :  { %7435 = vst [vmem:[#allocation49_spill] sm:$0xff] %v6104_v10  ;;  %v6106_v58 = vpop.f32.mrf.mxu1 }
 0x601   :  { %7436 = vst [vmem:[#allocation50_spill] sm:$0xff] %v6106_v58  ;;  %v6116_v14 = vpop.f32.mrf.mxu2  ;;  %v6127_v58 = vperm.slane %v3235_v62, 0 }
 0x602   :  { %7441 = vst [vmem:[#allocation11_spill] sm:$0xff] %v6116_v14 }
 0x603   :  { %7445 = vst [vmem:[#allocation58_spill] sm:$0xff] %v6127_v58 }
 0x606   :  { %v6118_v8 = vpop.f32.mrf.mxu3 }
 0x607   :  { %v6112_v12 = vpop.f32.mrf.mxu0  ;;  %7442 = vst [vmem:[#allocation36_spill] sm:$0xff] %v6118_v8 }
 0x608   :  { %7439 = vst [vmem:[#allocation62_spill] sm:$0xff] %v6112_v12  ;;  %v6114_v16 = vpop.f32.mrf.mxu1  ;;  %v1756_v12 = vadd.f32 %v1755_v26, %v6127_v58 }
 0x609   :  { %7440 = vst [vmem:[#allocation5_spill] sm:$0xff] %v6114_v16  ;;  %v1797_v16 = vadd.f32 %v1796_v57, %v6129_v48  ;;  %v6133_v40 = vpop.f32.mrf.mxu2 }
 0x60a   :  { %7447 = vst [vmem:[#allocation4_spill] sm:$0xff] %v6133_v40 }
 0x62f   :  { %v6123_v45 = vpop.f32.mrf.mxu0  ;;  %v6125_v10 = vpop.f32.mrf.mxu1 }
 0x630   :  { %7443 = vst [vmem:[#allocation53_spill] sm:$0xff] %v6123_v45 }
 0x631   :  { %7444 = vst [vmem:[#allocation54_spill] sm:$0xff] %v6125_v10 }
 0x636   :  { %v6135_v14 = vpop.f32.mrf.mxu3  ;;  %v6140_v54 = vpop.f32.mrf.mxu2 }
 0x637   :  { %7448 = vst [vmem:[#allocation6_spill] sm:$0xff] %v6135_v14  ;;  %v1955_v8 = vpop.f32.mrf.mxu0  ;;  %v1975_v0 = vpop.f32.mrf.mxu1 }
 0x638   :  { %v2018_v51 = vadd.f32 %v1955_v8, %v1756_v12  ;;  %v2019_v56 = vadd.f32 %v1975_v0, %v1797_v16  ;;  %7450 = vst [vmem:[#allocation7_spill] sm:$0xff] %v6140_v54  ;;  %v6142_v8 = vperm.slane %v3235_v62, 2 }
 0x63a   :  { %v3300_v45 = vmul.f32 -1.442695, %v2018_v51  ;;  %v3301_v10 = vmul.f32 -1.442695, %v2019_v56  ;;  %7451 = vst [vmem:[#allocation8_spill] sm:$0xff] %v6142_v8  ;;  %v1838_v51 = vadd.f32 %v1837_v5, %v6142_v8 }
 0x63c   :  { %3453 = vpow2.f32 %v3300_v45 }
 0x63d   :  { %3455 = vpow2.f32 %v3301_v10 }
 0x63e   :  { %v2015_v26 = vpop.f32.mrf.mxu3  ;;  %v1995_v16 = vpop.f32.mrf.mxu2 }
 0x63f   :  { %v2021_v57 = vadd.f32 %v2015_v26, %v1879_v20  ;;  %v2020_v2 = vadd.f32 %v1995_v16, %v1838_v51 }
 0x641   :  { %v3302_v48 = vmul.f32 -1.442695, %v2021_v57 }
 0x642   :  { %v3454_v40 = vpop.eup %3453 }
 0x643   :  { %v3456_v58 = vpop.eup %3455  ;;  %v2025_v14 = vadd.f32 1.0, %v3454_v40  ;;  %3457 = vpow2.f32 %v3302_v48 }
 0x644   :  { %v2044_v17 = vadd.f32 1.0, %v3456_v58 }
 0x645   :  { %3459 = vrcp.f32 %v2025_v14  ;;  %v2037_v40 = vand.u32 2147483648, %v2025_v14  ;;  %v2035_v48 = vand.u32 2147483647, %v2025_v14  ;;  %vm2031_vm2 = vweird.f32 %v2025_v14 }
 0x646   :  { %3461 = vrcp.f32 %v2044_v17  ;;  %v2056_v58 = vand.u32 2147483648, %v2044_v17  ;;  %v2054_v23 = vand.u32 2147483647, %v2044_v17  ;;  %vm2050_vm3 = vweird.f32 %v2044_v17 }
 0x647   :  { %v2038_v16 = vor.u32 1.1754944e-38, %v2037_v40  ;;  %vm2036_vm5 = vcmp.eq.f32.partialorder %v2035_v48, 8.507059e+37 }
 0x648   :  { %v2057_v8 = vor.u32 1.1754944e-38, %v2056_v58  ;;  %vm2055_vm7 = vcmp.eq.f32.partialorder %v2054_v23, 8.507059e+37 }
 0x649   :  { %v3458_v56 = vpop.eup %3457 }
 0x64a   :  { %v2064_v45 = vadd.f32 1.0, %v3458_v56 }
 0x64b   :  { %v3460_v0 = vpop.eup %3459 }
 0x64c   :  { %v3462_v10 = vpop.eup %3461  ;;  %v2027_v12 = vmul.f32 %v3460_v0, %v2025_v14  ;;  %3463 = vrcp.f32 %v2064_v45  ;;  %vm2032_vm0 = vweird.f32 %v3460_v0  ;;  %vm2070_vm9 = vweird.f32 %v2064_v45 }
 0x64d   :  { %v2046_v20 = vmul.f32 %v3462_v10, %v2044_v17  ;;  %3465 = vtanh.f32 %v2020_v2  ;;  %vm2051_vm1 = vweird.f32 %v3462_v10  ;;  %vm2033_vm4 = vmor %vm2031_vm2, %vm2032_vm0  ;;  %v2074_v14 = vand.u32 2147483647, %v2064_v45 }
 0x64e   :  { %v2028_v26 = vsub.f32 1.0, %v2027_v12  ;;  %vm2052_vm6 = vmor %vm2050_vm3, %vm2051_vm1 }
 0x64f   :  { %v2047_v57 = vsub.f32 1.0, %v2046_v20  ;;  %vm2075_vm11 = vcmp.eq.f32.partialorder %v2074_v14, 8.507059e+37 }
 0x650   :  { %v2029_v62 = vmul.f32 %v3460_v0, %v2028_v26 }
 0x651   :  { %v2048_v54 = vmul.f32 %v3462_v10, %v2047_v57 }
 0x652   :  { %v3464_v61 = vpop.eup %3463  ;;  %v2030_v5 = vadd.f32 %v3460_v0, %v2029_v62 }
 0x653   :  { %v2049_v56 = vadd.f32 %v3462_v10, %v2048_v54  ;;  %v2066_v51 = vmul.f32 %v3464_v61, %v2064_v45  ;;  %v3466_v2 = vpop.eup %3465  ;;  %vm2071_vm8 = vweird.f32 %v3464_v61  ;;  %v2076_v54 = vand.u32 2147483648, %v2064_v45 }
 0x654   :  { %v2034_v12 = vsel %vm2033_vm4, %v3460_v0, %v2030_v5  ;;  %vm2072_vm10 = vmor %vm2070_vm9, %vm2071_vm8 }
 0x655   :  { %v2039_v20 = vsel %vm2036_vm5, %v2038_v16, %v2034_v12  ;;  %v2053_v26 = vsel %vm2052_vm6, %v3462_v10, %v2049_v56  ;;  %v2067_v3 = vsub.f32 1.0, %v2066_v51  ;;  %v2077_v40 = vor.u32 1.1754944e-38, %v2076_v54  ;;  %v7484_v12 = vld [vmem:[#allocation8_spill] sm:$0xff] }
 0x656   :  { %v2058_v57 = vsel %vm2055_vm7, %v2057_v8, %v2053_v26  ;;  %v2081_v27 = vmul.f32 %v3466_v2, %v2039_v20  ;;  %v7485_v2 = vld [vmem:[#allocation35_spill] sm:$0xff] }
 0x657   :  { %v2080_v46 = vmul.f32 0.0, %v2058_v57  ;;  %v2068_v9 = vmul.f32 %v3464_v61, %v2067_v3  ;;  %v1841_v20 = vadd.f32 %v7485_v2, %v7484_v12  ;;  %v6341_v2 = vld [vmem:[%s6874_s2 + $0x378] sm:$0xff] }
 0x659   :  { %v6145_v62 = vadd.f32 %v2081_v27, %v2080_v46  ;;  %v2069_v17 = vadd.f32 %v3464_v61, %v2068_v9  ;;  %v7481_v46 = vld [vmem:[#allocation31_spill] sm:$0xff] }
 0x65b   :  { %3467 = vtanh.f32 %v6145_v62  ;;  %v2073_v0 = vsel %vm2072_vm10, %v3464_v61, %v2069_v17 }
 0x65c   :  { %v2078_v23 = vsel %vm2075_vm11, %v2077_v40, %v2073_v0 }
 0x661   :  { %v3468_v10 = vpop.eup %3467 }
 0x662   :  { %v2084_v58 = vmul.f32 %v3468_v10, %v2078_v23 }
 0x664   :  { %2105 = vmatmul.f32.vlgmr.msrb.gmra.mxu0 %v2084_v58  ;;  %2125 = vmatmul.f32.vlgmr.msrb.gmra.mxu1 %v2084_v58 }
 0x665   :  { %2145 = vmatmul.f32.vlgmr.msrb.gmra.mxu2 %v2084_v58  ;;  %2165 = vmatmul.f32.vlgmr.msrb.gmra.mxu3 %v2084_v58 }
 0x666   :  { %2391 = vmatpush.msrb.mxu0 %v7414_v29  ;;  %2411 = vmatpush.msrb.mxu1 %v5515_v7  ;;  %v7452_v7 = vld [vmem:[#allocation13_spill] sm:$0xff] }
 0x667   :  { %2431 = vmatpush.msrb.mxu2 %v5570_v22  ;;  %2451 = vmatpush.msrb.mxu3 %v5532_v42  ;;  %v7454_v42 = vld [vmem:[#allocation41_spill] sm:$0xff]  ;;  %v7456_v22 = vld [vmem:[#allocation14_spill] sm:$0xff] }
 0x668   :  { %2392 = vmatpush.msrb.mxu0 %v5520_v1  ;;  %2412 = vmatpush.msrb.mxu1 %v7415_v60  ;;  %v7453_v1 = vld [vmem:[#allocation39_spill] sm:$0xff]  ;;  %v7482_v60 = vld [vmem:[#allocation9_spill] sm:$0xff] }
 0x669   :  { %2432 = vmatpush.msrb.mxu2 %v5576_v25  ;;  %2452 = vmatpush.msrb.mxu3 %v7416_v41  ;;  %v7457_v25 = vld [vmem:[#allocation42_spill] sm:$0xff]  ;;  %v7483_v41 = vld [vmem:[#allocation33_spill] sm:$0xff] }
 0x66a   :  { %2393 = vmatpush.msrb.mxu0 %v5538_v24  ;;  %2413 = vmatpush.msrb.mxu1 %v7417_v11  ;;  %v7455_v24 = vld [vmem:[#allocation40_spill] sm:$0xff]  ;;  %v1882_v11 = vadd.f32 %v7483_v41, %v7482_v60 }
 0x66b   :  { %2433 = vmatpush.msrb.mxu2 %v5587_v4  ;;  %2453 = vmatpush.msrb.mxu3 %v7418_v34  ;;  %v7458_v4 = vld [vmem:[#allocation43_spill] sm:$0xff]  ;;  %v6275_v41 = vld [vmem:[%s6874_s2 + $0x3a0] sm:$0xff] }
 0x66c   :  { %2394 = vmatpush.msrb.mxu0 %v7419_v18  ;;  %2414 = vmatpush.msrb.mxu1 %v5597_v32  ;;  %v7459_v32 = vld [vmem:[#allocation44_spill] sm:$0xff] }
 0x66d   :  { %2434 = vmatpush.msrb.mxu2 %v5621_v28  ;;  %2454 = vmatpush.msrb.mxu3 %v5616_v19  ;;  %v7462_v19 = vld [vmem:[#allocation10_spill] sm:$0xff]  ;;  %v7463_v28 = vld [vmem:[#allocation12_spill] sm:$0xff] }
 0x66e   :  { %2395 = vmatpush.msrb.mxu0 %v5603_v21  ;;  %2415 = vmatpush.msrb.mxu1 %v5611_v6  ;;  %v7460_v21 = vld [vmem:[#allocation18_spill] sm:$0xff]  ;;  %v7461_v6 = vld [vmem:[#allocation47_spill] sm:$0xff] }
 0x66f   :  { %2435 = vmatpush.msrb.mxu2 %v5635_v52  ;;  %2455 = vmatpush.msrb.mxu3 %v5630_v63  ;;  %v7464_v63 = vld [vmem:[#allocation22_spill] sm:$0xff]  ;;  %v7465_v52 = vld [vmem:[#allocation15_spill] sm:$0xff] }
 0x670   :  { %2396 = vmatpush.msrb.mxu0 %v5646_v30  ;;  %2416 = vmatpush.msrb.mxu1 %v5651_v31  ;;  %v7466_v30 = vld [vmem:[#allocation17_spill] sm:$0xff]  ;;  %v7467_v31 = vld [vmem:[#allocation16_spill] sm:$0xff] }
 0x671   :  { %2436 = vmatpush.msrb.mxu2 %v5663_v49  ;;  %2456 = vmatpush.msrb.mxu3 %v5656_v33  ;;  %v7468_v33 = vld [vmem:[#allocation25_spill] sm:$0xff]  ;;  %v7469_v49 = vld [vmem:[#allocation20_spill] sm:$0xff] }
 0x672   :  { %2397 = vmatpush.msrb.mxu0 %v5668_v35  ;;  %2417 = vmatpush.msrb.mxu1 %v5673_v36  ;;  %v7470_v35 = vld [vmem:[#allocation19_spill] sm:$0xff]  ;;  %v7471_v36 = vld [vmem:[#allocation21_spill] sm:$0xff] }
 0x673   :  { %2437 = vmatpush.msrb.mxu2 %v5687_v38  ;;  %2457 = vmatpush.msrb.mxu3 %v5679_v37  ;;  %v7472_v37 = vld [vmem:[#allocation28_spill] sm:$0xff]  ;;  %v7473_v38 = vld [vmem:[#allocation26_spill] sm:$0xff] }
 0x674   :  { %2398 = vmatpush.msrb.mxu0 %v5692_v43  ;;  %2418 = vmatpush.msrb.mxu1 %v5697_v44  ;;  %v7474_v43 = vld [vmem:[#allocation23_spill] sm:$0xff]  ;;  %v7475_v44 = vld [vmem:[#allocation24_spill] sm:$0xff] }
 0x675   :  { %2438 = vmatpush.msrb.mxu2 %v5757_v15  ;;  %2458 = vmatpush.msrb.mxu3 %v5716_v59  ;;  %v7478_v59 = vld [vmem:[#allocation58_spill] sm:$0xff] }
 0x676   :  { %2399 = vmatpush.msrb.mxu0 %v5706_v47  ;;  %2419 = vmatpush.msrb.mxu1 %v5711_v55  ;;  %v7476_v47 = vld [vmem:[#allocation29_spill] sm:$0xff]  ;;  %v7477_v55 = vld [vmem:[#allocation27_spill] sm:$0xff] }
 0x677   :  { %2439 = vmatpush.msrb.mxu2 %v5769_v13  ;;  %2459 = vmatpush.msrb.mxu3 %v5732_v53  ;;  %v7480_v53 = vld [vmem:[#allocation60_spill] sm:$0xff] }
 0x678   :  { %2400 = vmatpush.msrb.mxu0 %v5722_v39  ;;  %2420 = vmatpush.msrb.mxu1 %v5727_v50  ;;  %v7479_v39 = vld [vmem:[#allocation30_spill] sm:$0xff]  ;;  %v1800_v27 = vadd.f32 %v7481_v46, %v7480_v53 }
 0x679   :  { %2440 = vmatpush.msrb.mxu2 %v7452_v7  ;;  %2460 = vmatpush.msrb.mxu3 %v7453_v1  ;;  %v1759_v50 = vadd.f32 %v7479_v39, %v7478_v59 }
 0x67a   :  { %2401 = vmatpush.msrb.mxu0 %v7454_v42  ;;  %2421 = vmatpush.msrb.mxu1 %v7455_v24 }
 0x67b   :  { %2441 = vmatpush.msrb.mxu2 %v7456_v22  ;;  %2461 = vmatpush.msrb.mxu3 %v7457_v25 }
 0x67c   :  { %2402 = vmatpush.msrb.mxu0 %v7458_v4  ;;  %2422 = vmatpush.msrb.mxu1 %v7459_v32 }
 0x67d   :  { %2442 = vmatpush.msrb.mxu2 %v7460_v21  ;;  %2462 = vmatpush.msrb.mxu3 %v7461_v6 }
 0x67e   :  { %2403 = vmatpush.msrb.mxu0 %v7462_v19  ;;  %2423 = vmatpush.msrb.mxu1 %v7463_v28 }
 0x67f   :  { %2443 = vmatpush.msrb.mxu2 %v7464_v63  ;;  %2463 = vmatpush.msrb.mxu3 %v7465_v52 }
 0x680   :  { %2404 = vmatpush.msrb.mxu0 %v7466_v30  ;;  %2424 = vmatpush.msrb.mxu1 %v7467_v31 }
 0x681   :  { %2444 = vmatpush.msrb.mxu2 %v7468_v33  ;;  %2464 = vmatpush.msrb.mxu3 %v7469_v49 }
 0x682   :  { %2405 = vmatpush.msrb.mxu0 %v7470_v35  ;;  %2425 = vmatpush.msrb.mxu1 %v7471_v36 }
 0x683   :  { %2445 = vmatpush.msrb.mxu2 %v7472_v37  ;;  %2465 = vmatpush.msrb.mxu3 %v7473_v38 }
 0x684   :  { %2406 = vmatpush.msrb.mxu0 %v7474_v43  ;;  %2426 = vmatpush.msrb.mxu1 %v7475_v44 }
 0x685   :  { %2446 = vmatpush.msrb.mxu2 %v7476_v47  ;;  %2466 = vmatpush.msrb.mxu3 %v7477_v55 }
 0x6e1   :  { %v2106_v3 = vpop.f32.mrf.mxu0  ;;  %v2126_v15 = vpop.f32.mrf.mxu1 }
 0x6e2   :  { %v2169_v13 = vadd.f32 %v2106_v3, %v1759_v50  ;;  %v2170_v9 = vadd.f32 %v2126_v15, %v1800_v27  ;;  %v6233_v27 = vld [vmem:[%s6874_s2 + $0x3e8] sm:$0xff]  ;;  %v6239_v3 = vld [vmem:[%s6874_s2 + $0x3f0] sm:$0xff]  ;;  %v6245_v15 = vld [vmem:[%s6874_s2 + $0x3f8] sm:$0xff] }
 0x6e4   :  { %v3303_v61 = vmul.f32 -1.442695, %v2169_v13  ;;  %v3304_v29 = vmul.f32 -1.442695, %v2170_v9  ;;  %v6251_v13 = vld [vmem:[%s6874_s2 + $0x3c0] sm:$0xff]  ;;  %v6257_v9 = vld [vmem:[%s6874_s2 + $0x3c8] sm:$0xff] }
 0x6e6   :  { %3469 = vpow2.f32 %v3303_v61  ;;  %v6263_v61 = vld [vmem:[%s6874_s2 + $0x3d0] sm:$0xff] }
 0x6e7   :  { %3471 = vpow2.f32 %v3304_v29  ;;  %v6269_v29 = vld [vmem:[%s6874_s2 + $0x3d8] sm:$0xff] }
 0x6e8   :  { %v2166_v34 = vpop.f32.mrf.mxu3  ;;  %v2146_v56 = vpop.f32.mrf.mxu2 }
 0x6e9   :  { %v2172_v18 = vadd.f32 %v2166_v34, %v1882_v11  ;;  %v2171_v17 = vadd.f32 %v2146_v56, %v1841_v20  ;;  %v6281_v11 = vld [vmem:[%s6874_s2 + $0x3a8] sm:$0xff]  ;;  %v6287_v34 = vld [vmem:[%s6874_s2 + $0x3b0] sm:$0xff]  ;;  %v6347_v20 = vld [vmem:[%s6874_s2 + $0x340] sm:$0xff] }
 0x6ea   :  { %v6329_v56 = vld [vmem:[%s6874_s2 + $0x368] sm:$0xff] }
 0x6eb   :  { %v3305_v8 = vmul.f32 -1.442695, %v2172_v18  ;;  %v6293_v18 = vld [vmem:[%s6874_s2 + $0x3b8] sm:$0xff] }
 0x6ec   :  { %v3470_v45 = vpop.eup %3469 }
 0x6ed   :  { %v3472_v48 = vpop.eup %3471  ;;  %v2176_v5 = vadd.f32 1.0, %v3470_v45  ;;  %3473 = vpow2.f32 %v3305_v8  ;;  %v6299_v8 = vld [vmem:[%s6874_s2 + $0x380] sm:$0xff]  ;;  %v6305_v45 = vld [vmem:[%s6874_s2 + $0x388] sm:$0xff] }
 0x6ee   :  { %v2195_v16 = vadd.f32 1.0, %v3472_v48  ;;  %v6311_v48 = vld [vmem:[%s6874_s2 + $0x390] sm:$0xff] }
 0x6ef   :  { %3475 = vrcp.f32 %v2176_v5  ;;  %v2188_v23 = vand.u32 2147483648, %v2176_v5  ;;  %v2186_v1 = vand.u32 2147483647, %v2176_v5  ;;  %vm2182_vm14 = vweird.f32 %v2176_v5 }
 0x6f0   :  { %3477 = vrcp.f32 %v2195_v16  ;;  %v2207_v58 = vand.u32 2147483648, %v2195_v16  ;;  %v2205_v24 = vand.u32 2147483647, %v2195_v16  ;;  %vm2201_vm15 = vweird.f32 %v2195_v16 }
 0x6f1   :  { %v2189_v4 = vor.u32 1.1754944e-38, %v2188_v23  ;;  %vm2187_vm2 = vcmp.eq.f32.partialorder %v2186_v1, 8.507059e+37  ;;  %v6401_v23 = vld [vmem:[%s6874_s2 + $0x308] sm:$0xff]  ;;  %v6419_v1 = vld [vmem:[%s6874_s2 + $0x2e0] sm:$0xff] }
 0x6f2   :  { %v2208_v6 = vor.u32 1.1754944e-38, %v2207_v58  ;;  %vm2206_vm3 = vcmp.eq.f32.partialorder %v2205_v24, 8.507059e+37  ;;  %v6407_v58 = vld [vmem:[%s6874_s2 + $0x310] sm:$0xff] }
 0x6f3   :  { %v3474_v51 = vpop.eup %3473  ;;  %v6431_v24 = vld [vmem:[%s6874_s2 + $0x2f0] sm:$0xff] }
 0x6f4   :  { %v2215_v26 = vadd.f32 1.0, %v3474_v51  ;;  %v6335_v51 = vld [vmem:[%s6874_s2 + $0x370] sm:$0xff] }
 0x6f5   :  { %v3476_v57 = vpop.eup %3475 }
 0x6f6   :  { %v3478_v54 = vpop.eup %3477  ;;  %v2178_v14 = vmul.f32 %v3476_v57, %v2176_v5  ;;  %3479 = vrcp.f32 %v2215_v26  ;;  %vm2183_vm12 = vweird.f32 %v3476_v57  ;;  %v2227_v38 = vand.u32 2147483648, %v2215_v26  ;;  %v6317_v5 = vld [vmem:[%s6874_s2 + $0x398] sm:$0xff] }
 0x6f7   :  { %v2197_v0 = vmul.f32 %v3478_v54, %v2195_v16  ;;  %3481 = vtanh.f32 %v2171_v17  ;;  %vm2202_vm13 = vweird.f32 %v3478_v54  ;;  %vm2184_vm0 = vmor %vm2182_vm14, %vm2183_vm12  ;;  %vm2221_vm5 = vweird.f32 %v2215_v26  ;;  %v6323_v16 = vld [vmem:[%s6874_s2 + $0x360] sm:$0xff]  ;;  %v6365_v17 = vld [vmem:[%s6874_s2 + $0x358] sm:$0xff] }
 0x6f8   :  { %v2179_v40 = vsub.f32 1.0, %v2178_v14  ;;  %vm2203_vm1 = vmor %vm2201_vm15, %vm2202_vm13  ;;  %v2225_v43 = vand.u32 2147483647, %v2215_v26  ;;  %v2228_v55 = vor.u32 1.1754944e-38, %v2227_v38  ;;  %v6377_v14 = vld [vmem:[%s6874_s2 + $0x328] sm:$0xff]  ;;  %v6533_v38 = vld [vmem:[%s6874_s2 + $0x278] sm:$0xff] }
 0x6f9   :  { %v2198_v10 = vsub.f32 1.0, %v2197_v0  ;;  %v6383_v0 = vld [vmem:[%s6874_s2 + $0x330] sm:$0xff]  ;;  %7499 = vst [vmem:[#allocation22_spill] sm:$0xff] %v6533_v38 }
 0x6fa   :  { %v2180_v7 = vmul.f32 %v3476_v57, %v2179_v40  ;;  %vm2226_vm7 = vcmp.eq.f32.partialorder %v2225_v43, 8.507059e+37  ;;  %v6389_v40 = vld [vmem:[%s6874_s2 + $0x338] sm:$0xff]  ;;  %v6539_v43 = vld [vmem:[%s6874_s2 + $0x240] sm:$0xff] }
 0x6fb   :  { %v2199_v42 = vmul.f32 %v3478_v54, %v2198_v10  ;;  %v6395_v10 = vld [vmem:[%s6874_s2 + $0x300] sm:$0xff]  ;;  %7500 = vst [vmem:[#allocation15_spill] sm:$0xff] %v6539_v43 }
 0x6fc   :  { %v3480_v22 = vpop.eup %3479  ;;  %v2181_v25 = vadd.f32 %v3476_v57, %v2180_v7  ;;  %v6413_v7 = vld [vmem:[%s6874_s2 + $0x318] sm:$0xff] }
 0x6fd   :  { %v2200_v32 = vadd.f32 %v3478_v54, %v2199_v42  ;;  %v2217_v21 = vmul.f32 %v3480_v22, %v2215_v26  ;;  %v3482_v28 = vpop.eup %3481  ;;  %vm2222_vm4 = vweird.f32 %v3480_v22  ;;  %v6353_v26 = vld [vmem:[%s6874_s2 + $0x348] sm:$0xff] }
 0x6fe   :  { %v2185_v19 = vsel %vm2184_vm0, %v3476_v57, %v2181_v25  ;;  %vm2223_vm6 = vmor %vm2221_vm5, %vm2222_vm4  ;;  %v6359_v57 = vld [vmem:[%s6874_s2 + $0x350] sm:$0xff]  ;;  %v6425_v42 = vld [vmem:[%s6874_s2 + $0x2e8] sm:$0xff] }
 0x6ff   :  { %v2190_v63 = vsel %vm2187_vm2, %v2189_v4, %v2185_v19  ;;  %v2204_v52 = vsel %vm2203_vm1, %v3478_v54, %v2200_v32  ;;  %v2218_v30 = vsub.f32 1.0, %v2217_v21  ;;  %v6371_v54 = vld [vmem:[%s6874_s2 + $0x320] sm:$0xff]  ;;  %v6449_v4 = vld [vmem:[%s6874_s2 + $0x2c8] sm:$0xff]  ;;  %v6455_v32 = vld [vmem:[%s6874_s2 + $0x2d0] sm:$0xff] }
 0x700   :  { %v2209_v31 = vsel %vm2206_vm3, %v2208_v6, %v2204_v52  ;;  %v2232_v33 = vmul.f32 %v3482_v28, %v2190_v63  ;;  %v6443_v25 = vld [vmem:[%s6874_s2 + $0x2c0] sm:$0xff]  ;;  %7486 = vst [vmem:[#allocation38_spill] sm:$0xff] %v6455_v32  ;;  %v6461_v21 = vld [vmem:[%s6874_s2 + $0x2d8] sm:$0xff]  ;;  %v6473_v19 = vld [vmem:[%s6874_s2 + $0x2a8] sm:$0xff] }
 0x701   :  { %v2231_v49 = vmul.f32 %v2209_v31, %v6145_v62  ;;  %v2219_v35 = vmul.f32 %v3480_v22, %v2218_v30  ;;  %v6227_v62 = vld [vmem:[%s6874_s2 + $0x3e0] sm:$0xff]  ;;  %7487 = vst [vmem:[#allocation13_spill] sm:$0xff] %v6461_v21  ;;  %v6479_v28 = vld [vmem:[%s6874_s2 + $0x2b0] sm:$0xff]  ;;  %v6485_v63 = vld [vmem:[%s6874_s2 + $0x2b8] sm:$0xff] }
 0x702   :  { %v6467_v6 = vld [vmem:[%s6874_s2 + $0x2a0] sm:$0xff]  ;;  %7489 = vst [vmem:[#allocation41_spill] sm:$0xff] %v6473_v19  ;;  %v6497_v30 = vld [vmem:[%s6874_s2 + $0x288] sm:$0xff]  ;;  %v6503_v31 = vld [vmem:[%s6874_s2 + $0x290] sm:$0xff] }
 0x703   :  { %v6221_v36 = vadd.f32 %v2232_v33, %v2231_v49  ;;  %v2220_v37 = vadd.f32 %v3480_v22, %v2219_v35  ;;  %7488 = vst [vmem:[#allocation39_spill] sm:$0xff] %v6467_v6  ;;  %v6491_v52 = vld [vmem:[%s6874_s2 + $0x280] sm:$0xff]  ;;  %v6509_v33 = vld [vmem:[%s6874_s2 + $0x298] sm:$0xff]  ;;  %v6521_v35 = vld [vmem:[%s6874_s2 + $0x268] sm:$0xff] }
 0x704   :  { %7490 = vst [vmem:[#allocation40_spill] sm:$0xff] %v6479_v28  ;;  %v6515_v49 = vld [vmem:[%s6874_s2 + $0x260] sm:$0xff] }
 0x705   :  { %3483 = vtanh.f32 %v6221_v36  ;;  %v2224_v44 = vsel %vm2223_vm6, %v3480_v22, %v2220_v37  ;;  %v6437_v22 = vld [vmem:[%s6874_s2 + $0x2f8] sm:$0xff]  ;;  %7491 = vst [vmem:[#allocation14_spill] sm:$0xff] %v6485_v63  ;;  %v6527_v37 = vld [vmem:[%s6874_s2 + $0x270] sm:$0xff] }
 0x706   :  { %v2229_v50 = vsel %vm2226_vm7, %v2228_v55, %v2224_v44  ;;  %7492 = vst [vmem:[#allocation42_spill] sm:$0xff] %v6491_v52  ;;  %v6545_v44 = vld [vmem:[%s6874_s2 + $0x248] sm:$0xff]  ;;  %v6551_v55 = vld [vmem:[%s6874_s2 + $0x250] sm:$0xff] }
 0x707   :  { %7493 = vst [vmem:[#allocation43_spill] sm:$0xff] %v6497_v30 }
 0x708   :  { %7494 = vst [vmem:[#allocation44_spill] sm:$0xff] %v6503_v31 }
 0x709   :  { %7495 = vst [vmem:[#allocation18_spill] sm:$0xff] %v6509_v33 }
 0x70a   :  { %7496 = vst [vmem:[#allocation47_spill] sm:$0xff] %v6515_v49 }
 0x70b   :  { %v3484_v39 = vpop.eup %3483  ;;  %7497 = vst [vmem:[#allocation10_spill] sm:$0xff] %v6521_v35 }
 0x70c   :  { %v2235_v46 = vmul.f32 %v3484_v39, %v2229_v50  ;;  %7498 = vst [vmem:[#allocation12_spill] sm:$0xff] %v6527_v37  ;;  %v6557_v39 = vld [vmem:[%s6874_s2 + $0x258] sm:$0xff]  ;;  %v6563_v50 = vld [vmem:[%s6874_s2 + $0x220] sm:$0xff] }
 0x70d   :  { %7501 = vst [vmem:[#allocation17_spill] sm:$0xff] %v6545_v44 }
 0x70e   :  { %2256 = vmatmul.f32.vlgmr.msra.gmra.mxu0 %v2235_v46  ;;  %2276 = vmatmul.f32.vlgmr.msra.gmra.mxu1 %v2235_v46  ;;  %7502 = vst [vmem:[#allocation16_spill] sm:$0xff] %v6551_v55 }
 0x70f   :  { %2296 = vmatmul.f32.vlgmr.msra.gmra.mxu2 %v2235_v46  ;;  %2316 = vmatmul.f32.vlgmr.msra.gmra.mxu3 %v2235_v46  ;;  %7503 = vst [vmem:[#allocation25_spill] sm:$0xff] %v6557_v39  ;;  %v6569_v46 = vld [vmem:[%s6874_s2 + $0x228] sm:$0xff] }
 0x710   :  { %2542 = vmatpush.msra.mxu0 %v6227_v62  ;;  %2562 = vmatpush.msra.mxu1 %v6233_v27  ;;  %7504 = vst [vmem:[#allocation20_spill] sm:$0xff] %v6563_v50 }
 0x711   :  { %2582 = vmatpush.msra.mxu2 %v6239_v3  ;;  %2602 = vmatpush.msra.mxu3 %v6245_v15  ;;  %7505 = vst [vmem:[#allocation19_spill] sm:$0xff] %v6569_v46 }
 0x712   :  { %2543 = vmatpush.msra.mxu0 %v6251_v13  ;;  %2563 = vmatpush.msra.mxu1 %v6257_v9 }
 0x713   :  { %2583 = vmatpush.msra.mxu2 %v6263_v61  ;;  %2603 = vmatpush.msra.mxu3 %v6269_v29 }
 0x714   :  { %2544 = vmatpush.msra.mxu0 %v6275_v41  ;;  %2564 = vmatpush.msra.mxu1 %v6281_v11 }
 0x715   :  { %2584 = vmatpush.msra.mxu2 %v6287_v34  ;;  %2604 = vmatpush.msra.mxu3 %v6293_v18 }
 0x716   :  { %2545 = vmatpush.msra.mxu0 %v6299_v8  ;;  %2565 = vmatpush.msra.mxu1 %v6305_v45 }
 0x717   :  { %2585 = vmatpush.msra.mxu2 %v6311_v48  ;;  %2605 = vmatpush.msra.mxu3 %v6317_v5 }
 0x718   :  { %2546 = vmatpush.msra.mxu0 %v6323_v16  ;;  %2566 = vmatpush.msra.mxu1 %v6329_v56 }
 0x719   :  { %2586 = vmatpush.msra.mxu2 %v6335_v51  ;;  %2606 = vmatpush.msra.mxu3 %v6341_v2 }
 0x71a   :  { %2547 = vmatpush.msra.mxu0 %v6347_v20  ;;  %2567 = vmatpush.msra.mxu1 %v6353_v26 }
 0x71b   :  { %2587 = vmatpush.msra.mxu2 %v6359_v57  ;;  %2607 = vmatpush.msra.mxu3 %v6365_v17 }
 0x71c   :  { %2548 = vmatpush.msra.mxu0 %v6371_v54  ;;  %2568 = vmatpush.msra.mxu1 %v6377_v14 }
 0x71d   :  { %2588 = vmatpush.msra.mxu2 %v6383_v0  ;;  %2608 = vmatpush.msra.mxu3 %v6389_v40 }
 0x71e   :  { %2549 = vmatpush.msra.mxu0 %v6395_v10  ;;  %2569 = vmatpush.msra.mxu1 %v6401_v23 }
 0x71f   :  { %2589 = vmatpush.msra.mxu2 %v6407_v58  ;;  %2609 = vmatpush.msra.mxu3 %v6413_v7 }
 0x720   :  { %2550 = vmatpush.msra.mxu0 %v6419_v1  ;;  %2570 = vmatpush.msra.mxu1 %v6425_v42 }
 0x721   :  { %2590 = vmatpush.msra.mxu2 %v6431_v24  ;;  %2610 = vmatpush.msra.mxu3 %v6437_v22 }
 0x722   :  { %2551 = vmatpush.msra.mxu0 %v6443_v25  ;;  %2571 = vmatpush.msra.mxu1 %v6449_v4 }
 0x723   :  { %2591 = vmatpush.msra.mxu2 %v6455_v32  ;;  %2611 = vmatpush.msra.mxu3 %v6461_v21 }
 0x724   :  { %2552 = vmatpush.msra.mxu0 %v6467_v6  ;;  %2572 = vmatpush.msra.mxu1 %v6473_v19 }
 0x725   :  { %2592 = vmatpush.msra.mxu2 %v6479_v28  ;;  %2612 = vmatpush.msra.mxu3 %v6485_v63 }
 0x726   :  { %2553 = vmatpush.msra.mxu0 %v6491_v52  ;;  %2573 = vmatpush.msra.mxu1 %v6497_v30 }
 0x727   :  { %2593 = vmatpush.msra.mxu2 %v6503_v31  ;;  %2613 = vmatpush.msra.mxu3 %v6509_v33 }
 0x728   :  { %2554 = vmatpush.msra.mxu0 %v6515_v49  ;;  %2574 = vmatpush.msra.mxu1 %v6521_v35 }
 0x729   :  { %2594 = vmatpush.msra.mxu2 %v6527_v37  ;;  %2614 = vmatpush.msra.mxu3 %v6533_v38 }
 0x72a   :  { %2555 = vmatpush.msra.mxu0 %v6539_v43  ;;  %2575 = vmatpush.msra.mxu1 %v6545_v44 }
 0x72b   :  { %2595 = vmatpush.msra.mxu2 %v6551_v55  ;;  %2615 = vmatpush.msra.mxu3 %v6557_v39  ;;  %v6575_v55 = vld [vmem:[%s6874_s2 + $0x230] sm:$0xff]  ;;  %v6581_v39 = vld [vmem:[%s6874_s2 + $0x238] sm:$0xff] }
 0x72c   :  { %2556 = vmatpush.msra.mxu0 %v6563_v50  ;;  %2576 = vmatpush.msra.mxu1 %v6569_v46  ;;  %7506 = vst [vmem:[#allocation21_spill] sm:$0xff] %v6575_v55  ;;  %v6587_v50 = vld [vmem:[%s6874_s2 + $0x200] sm:$0xff]  ;;  %v6593_v46 = vld [vmem:[%s6874_s2 + $0x208] sm:$0xff] }
 0x72d   :  { %2596 = vmatpush.msra.mxu2 %v6575_v55  ;;  %7507 = vst [vmem:[#allocation28_spill] sm:$0xff] %v6581_v39  ;;  %2616 = vmatpush.msra.mxu3 %v6581_v39  ;;  %v6600_v39 = vld [vmem:[%s6874_s2 + $0x218] sm:$0xff]  ;;  %v7511_v55 = vld [vmem:[#allocation32_spill] sm:$0xff] }
 0x72e   :  { %7508 = vst [vmem:[#allocation26_spill] sm:$0xff] %v6587_v50  ;;  %2557 = vmatpush.msra.mxu0 %v6587_v50  ;;  %2577 = vmatpush.msra.mxu1 %v6593_v46  ;;  %v1762_v44 = vadd.f32 %v7511_v55, %v7478_v59  ;;  %v7512_v50 = vld [vmem:[#allocation34_spill] sm:$0xff] }
 0x72f   :  { %7509 = vst [vmem:[#allocation23_spill] sm:$0xff] %v6593_v46  ;;  %2597 = vmatpush.msra.mxu2 %v7476_v47  ;;  %2617 = vmatpush.msra.mxu3 %v6600_v39  ;;  %v1803_v43 = vadd.f32 %v7512_v50, %v7480_v53  ;;  %v7513_v47 = vld [vmem:[#allocation37_spill] sm:$0xff] }
 0x730   :  { %7510 = vst [vmem:[#allocation24_spill] sm:$0xff] %v6600_v39  ;;  %v1885_v31 = vadd.f32 %v7513_v47, %v7482_v60 }
 0x78b   :  { %v2257_v38 = vpop.f32.mrf.mxu0  ;;  %v2277_v37 = vpop.f32.mrf.mxu1 }
 0x78c   :  { %v2320_v35 = vadd.f32 %v2257_v38, %v1762_v44  ;;  %v2321_v49 = vadd.f32 %v2277_v37, %v1803_v43 }
 0x78e   :  { %v3306_v46 = vmul.f32 -1.442695, %v2320_v35  ;;  %v3307_v33 = vmul.f32 -1.442695, %v2321_v49  ;;  %v7514_v35 = vld [vmem:[#allocation56_spill] sm:$0xff] }
 0x78f   :  { %v1844_v49 = vadd.f32 %v7514_v35, %v7484_v12 }
 0x790   :  { %3485 = vpow2.f32 %v3306_v46 }
 0x791   :  { %3487 = vpow2.f32 %v3307_v33 }
 0x792   :  { %v2317_v30 = vpop.f32.mrf.mxu3  ;;  %v2297_v50 = vpop.f32.mrf.mxu2 }
 0x793   :  { %v2323_v52 = vadd.f32 %v2317_v30, %v1885_v31  ;;  %v2322_v44 = vadd.f32 %v2297_v50, %v1844_v49 }
 0x795   :  { %v3308_v39 = vmul.f32 -1.442695, %v2323_v52 }
 0x796   :  { %v3486_v63 = vpop.eup %3485 }
 0x797   :  { %v3488_v28 = vpop.eup %3487  ;;  %v2327_v55 = vadd.f32 1.0, %v3486_v63  ;;  %3489 = vpow2.f32 %v3308_v39 }
 0x798   :  { %v2346_v59 = vadd.f32 1.0, %v3488_v28 }
 0x799   :  { %3491 = vrcp.f32 %v2327_v55  ;;  %v2339_v47 = vand.u32 2147483648, %v2327_v55  ;;  %v2337_v39 = vand.u32 2147483647, %v2327_v55  ;;  %vm2333_vm10 = vweird.f32 %v2327_v55 }
 0x79a   :  { %3493 = vrcp.f32 %v2346_v59  ;;  %v2358_v63 = vand.u32 2147483648, %v2346_v59  ;;  %v2356_v53 = vand.u32 2147483647, %v2346_v59  ;;  %vm2352_vm11 = vweird.f32 %v2346_v59 }
 0x79b   :  { %v2340_v50 = vor.u32 1.1754944e-38, %v2339_v47  ;;  %vm2338_vm14 = vcmp.eq.f32.partialorder %v2337_v39, 8.507059e+37 }
 0x79c   :  { %vm2357_vm15 = vcmp.eq.f32.partialorder %v2356_v53, 8.507059e+37 }
 0x79d   :  { %v3490_v38 = vpop.eup %3489 }
 0x79e   :  { %v2366_v37 = vadd.f32 1.0, %v3490_v38 }
 0x79f   :  { %v3492_v43 = vpop.eup %3491 }
 0x7a0   :  { %v3494_v46 = vpop.eup %3493  ;;  %v2329_v33 = vmul.f32 %v3492_v43, %v2327_v55  ;;  %3495 = vrcp.f32 %v2366_v37  ;;  %vm2334_vm8 = vweird.f32 %v3492_v43  ;;  %vm2372_vm1 = vweird.f32 %v2366_v37 }
 0x7a1   :  { %v2348_v30 = vmul.f32 %v3494_v46, %v2346_v59  ;;  %3497 = vtanh.f32 %v2322_v44  ;;  %vm2353_vm9 = vweird.f32 %v3494_v46  ;;  %vm2335_vm12 = vmor %vm2333_vm10, %vm2334_vm8 }
 0x7a2   :  { %v2330_v52 = vsub.f32 1.0, %v2329_v33  ;;  %vm2354_vm13 = vmor %vm2352_vm11, %vm2353_vm9  ;;  %v2359_v33 = vor.u32 1.1754944e-38, %v2358_v63 }
 0x7a3   :  { %v2349_v31 = vsub.f32 1.0, %v2348_v30 }
 0x7a4   :  { %v2331_v28 = vmul.f32 %v3492_v43, %v2330_v52 }
 0x7a5   :  { %v2350_v60 = vmul.f32 %v3494_v46, %v2349_v31 }
 0x7a6   :  { %v3496_v19 = vpop.eup %3495  ;;  %v2332_v35 = vadd.f32 %v3492_v43, %v2331_v28 }
 0x7a7   :  { %v2351_v38 = vadd.f32 %v3494_v46, %v2350_v60  ;;  %v2368_v49 = vmul.f32 %v3496_v19, %v2366_v37  ;;  %v3498_v44 = vpop.eup %3497  ;;  %vm2373_vm0 = vweird.f32 %v3496_v19  ;;  %v2378_v60 = vand.u32 2147483648, %v2366_v37 }
 0x7a8   :  { %v2336_v30 = vsel %vm2335_vm12, %v3492_v43, %v2332_v35  ;;  %v2376_v43 = vand.u32 2147483647, %v2366_v37  ;;  %vm2374_vm2 = vmor %vm2372_vm1, %vm2373_vm0  ;;  %v7521_v37 = vld [vmem:[#allocation42_spill] sm:$0xff]  ;;  %v7522_v35 = vld [vmem:[#allocation43_spill] sm:$0xff] }
 0x7a9   :  { %v2341_v12 = vsel %vm2338_vm14, %v2340_v50, %v2336_v30  ;;  %v2355_v52 = vsel %vm2354_vm13, %v3494_v46, %v2351_v38  ;;  %v2369_v6 = vsub.f32 1.0, %v2368_v49  ;;  %v2379_v63 = vor.u32 1.1754944e-38, %v2378_v60  ;;  %v7523_v50 = vld [vmem:[#allocation44_spill] sm:$0xff]  ;;  %v7524_v38 = vld [vmem:[#allocation18_spill] sm:$0xff]  ;;  %v7525_v49 = vld [vmem:[#allocation47_spill] sm:$0xff] }
 0x7aa   :  { %v2360_v31 = vsel %vm2357_vm15, %v2359_v33, %v2355_v52  ;;  %v2383_v21 = vmul.f32 %v3498_v44, %v2341_v12  ;;  %vm2377_vm3 = vcmp.eq.f32.partialorder %v2376_v43, 8.507059e+37  ;;  %v7515_v12 = vld [vmem:[#allocation38_spill] sm:$0xff]  ;;  %v7527_v30 = vld [vmem:[#allocation12_spill] sm:$0xff]  ;;  %v7529_v52 = vld [vmem:[#allocation15_spill] sm:$0xff] }
 0x7ab   :  { %v2382_v32 = vmul.f32 %v2360_v31, %v6221_v36  ;;  %v2370_v28 = vmul.f32 %v3496_v19, %v2369_v6  ;;  %v7516_v36 = vld [vmem:[#allocation13_spill] sm:$0xff]  ;;  %v7519_v6 = vld [vmem:[#allocation40_spill] sm:$0xff]  ;;  %v7526_v33 = vld [vmem:[#allocation10_spill] sm:$0xff] }
 0x7ac   :  { %v7528_v44 = vld [vmem:[#allocation22_spill] sm:$0xff]  ;;  %v7530_v31 = vld [vmem:[#allocation17_spill] sm:$0xff]  ;;  %v7533_v60 = vld [vmem:[#allocation20_spill] sm:$0xff] }
 0x7ad   :  { %v6612_v55 = vadd.f32 %v2383_v21, %v2382_v32  ;;  %v2371_v59 = vadd.f32 %v3496_v19, %v2370_v28  ;;  %v7517_v32 = vld [vmem:[#allocation39_spill] sm:$0xff]  ;;  %v7518_v21 = vld [vmem:[#allocation41_spill] sm:$0xff]  ;;  %v7531_v28 = vld [vmem:[#allocation16_spill] sm:$0xff] }
 0x7ae   :  { %v7534_v43 = vld [vmem:[#allocation19_spill] sm:$0xff] }
 0x7af   :  { %3499 = vtanh.f32 %v6612_v55  ;;  %v2375_v47 = vsel %vm2374_vm2, %v3496_v19, %v2371_v59  ;;  %v7520_v19 = vld [vmem:[#allocation14_spill] sm:$0xff]  ;;  %v7532_v59 = vld [vmem:[#allocation25_spill] sm:$0xff] }
 0x7b0   :  { %v2380_v46 = vsel %vm2377_vm3, %v2379_v63, %v2375_v47  ;;  %v7535_v47 = vld [vmem:[#allocation21_spill] sm:$0xff]  ;;  %v7536_v63 = vld [vmem:[#allocation28_spill] sm:$0xff] }
 0x7b5   :  { %v3500_v53 = vpop.eup %3499 }
 0x7b6   :  { %v2386_v39 = vmul.f32 %v3500_v53, %v2380_v46  ;;  %v7537_v53 = vld [vmem:[#allocation26_spill] sm:$0xff]  ;;  %v7538_v46 = vld [vmem:[#allocation23_spill] sm:$0xff] }
 0x7b8   :  { %2407 = vmatmul.f32.vlgmr.msrb.gmra.mxu0 %v2386_v39  ;;  %2427 = vmatmul.f32.vlgmr.msrb.gmra.mxu1 %v2386_v39 }
 0x7b9   :  { %2447 = vmatmul.f32.vlgmr.msrb.gmra.mxu2 %v2386_v39  ;;  %2467 = vmatmul.f32.vlgmr.msrb.gmra.mxu3 %v2386_v39  ;;  %v6680_v39 = vld [vmem:[%s6874_s2 + $0x210] sm:$0xff] }
 0x7ba   :  { %2693 = vmatpush.msrb.mxu0 %v6227_v62  ;;  %2713 = vmatpush.msrb.mxu1 %v6233_v27  ;;  %7539 = vst [vmem:[#allocation29_spill] sm:$0xff] %v6680_v39 }
 0x7bb   :  { %2733 = vmatpush.msrb.mxu2 %v6239_v3  ;;  %2753 = vmatpush.msrb.mxu3 %v6245_v15 }
 0x7bc   :  { %2694 = vmatpush.msrb.mxu0 %v6251_v13  ;;  %2714 = vmatpush.msrb.mxu1 %v6257_v9 }
 0x7bd   :  { %2734 = vmatpush.msrb.mxu2 %v6263_v61  ;;  %2754 = vmatpush.msrb.mxu3 %v6269_v29 }
 0x7be   :  { %2695 = vmatpush.msrb.mxu0 %v6275_v41  ;;  %2715 = vmatpush.msrb.mxu1 %v6281_v11 }
 0x7bf   :  { %2735 = vmatpush.msrb.mxu2 %v6287_v34  ;;  %2755 = vmatpush.msrb.mxu3 %v6293_v18 }
 0x7c0   :  { %2696 = vmatpush.msrb.mxu0 %v6299_v8  ;;  %2716 = vmatpush.msrb.mxu1 %v6305_v45 }
 0x7c1   :  { %2736 = vmatpush.msrb.mxu2 %v6311_v48  ;;  %2756 = vmatpush.msrb.mxu3 %v6317_v5 }
 0x7c2   :  { %2697 = vmatpush.msrb.mxu0 %v6323_v16  ;;  %2717 = vmatpush.msrb.mxu1 %v6329_v56 }
 0x7c3   :  { %2737 = vmatpush.msrb.mxu2 %v6335_v51  ;;  %2757 = vmatpush.msrb.mxu3 %v6341_v2 }
 0x7c4   :  { %2698 = vmatpush.msrb.mxu0 %v6347_v20  ;;  %2718 = vmatpush.msrb.mxu1 %v6353_v26 }
 0x7c5   :  { %2738 = vmatpush.msrb.mxu2 %v6359_v57  ;;  %2758 = vmatpush.msrb.mxu3 %v6365_v17 }
 0x7c6   :  { %2699 = vmatpush.msrb.mxu0 %v6371_v54  ;;  %2719 = vmatpush.msrb.mxu1 %v6377_v14 }
 0x7c7   :  { %2739 = vmatpush.msrb.mxu2 %v6383_v0  ;;  %2759 = vmatpush.msrb.mxu3 %v6389_v40 }
 0x7c8   :  { %2700 = vmatpush.msrb.mxu0 %v6395_v10  ;;  %2720 = vmatpush.msrb.mxu1 %v6401_v23 }
 0x7c9   :  { %2740 = vmatpush.msrb.mxu2 %v6407_v58  ;;  %2760 = vmatpush.msrb.mxu3 %v6413_v7 }
 0x7ca   :  { %2701 = vmatpush.msrb.mxu0 %v6419_v1  ;;  %2721 = vmatpush.msrb.mxu1 %v6425_v42 }
 0x7cb   :  { %2741 = vmatpush.msrb.mxu2 %v6431_v24  ;;  %2761 = vmatpush.msrb.mxu3 %v6437_v22 }
 0x7cc   :  { %2702 = vmatpush.msrb.mxu0 %v6443_v25  ;;  %2722 = vmatpush.msrb.mxu1 %v6449_v4 }
 0x7cd   :  { %2742 = vmatpush.msrb.mxu2 %v7515_v12  ;;  %2762 = vmatpush.msrb.mxu3 %v7516_v36 }
 0x7ce   :  { %2703 = vmatpush.msrb.mxu0 %v7517_v32  ;;  %2723 = vmatpush.msrb.mxu1 %v7518_v21 }
 0x7cf   :  { %2743 = vmatpush.msrb.mxu2 %v7519_v6  ;;  %2763 = vmatpush.msrb.mxu3 %v7520_v19 }
 0x7d0   :  { %2704 = vmatpush.msrb.mxu0 %v7521_v37  ;;  %2724 = vmatpush.msrb.mxu1 %v7522_v35 }
 0x7d1   :  { %2744 = vmatpush.msrb.mxu2 %v7523_v50  ;;  %2764 = vmatpush.msrb.mxu3 %v7524_v38  ;;  %v7546_v38 = vld [vmem:[#allocation46_spill] sm:$0xff] }
 0x7d2   :  { %2705 = vmatpush.msrb.mxu0 %v7525_v49  ;;  %2725 = vmatpush.msrb.mxu1 %v7526_v33  ;;  %v7545_v49 = vld [vmem:[#allocation9_spill] sm:$0xff] }
 0x7d3   :  { %2745 = vmatpush.msrb.mxu2 %v7527_v30  ;;  %2765 = vmatpush.msrb.mxu3 %v7528_v44  ;;  %v1888_v50 = vadd.f32 %v7546_v38, %v7545_v49 }
 0x7d4   :  { %2706 = vmatpush.msrb.mxu0 %v7529_v52  ;;  %2726 = vmatpush.msrb.mxu1 %v7530_v31  ;;  %v7543_v31 = vld [vmem:[#allocation60_spill] sm:$0xff] }
 0x7d5   :  { %2746 = vmatpush.msrb.mxu2 %v7531_v28  ;;  %2766 = vmatpush.msrb.mxu3 %v7532_v59  ;;  %v7540_v59 = vld [vmem:[#allocation24_spill] sm:$0xff]  ;;  %v7542_v28 = vld [vmem:[#allocation55_spill] sm:$0xff] }
 0x7d6   :  { %2707 = vmatpush.msrb.mxu0 %v7533_v60  ;;  %2727 = vmatpush.msrb.mxu1 %v7534_v43  ;;  %v7541_v60 = vld [vmem:[#allocation58_spill] sm:$0xff] }
 0x7d7   :  { %2747 = vmatpush.msrb.mxu2 %v7535_v47  ;;  %2767 = vmatpush.msrb.mxu3 %v7536_v63  ;;  %v1765_v43 = vadd.f32 %v7542_v28, %v7541_v60  ;;  %v7544_v47 = vld [vmem:[#allocation45_spill] sm:$0xff] }
 0x7d8   :  { %2708 = vmatpush.msrb.mxu0 %v7537_v53  ;;  %2728 = vmatpush.msrb.mxu1 %v7538_v46  ;;  %v1806_v52 = vadd.f32 %v7544_v47, %v7543_v31 }
 0x7d9   :  { %2748 = vmatpush.msrb.mxu2 %v6680_v39  ;;  %2768 = vmatpush.msrb.mxu3 %v7540_v59 }
 0x835   :  { %v2408_v63 = vpop.f32.mrf.mxu0  ;;  %v2428_v44 = vpop.f32.mrf.mxu1 }
 0x836   :  { %v2471_v53 = vadd.f32 %v2408_v63, %v1765_v43  ;;  %v2472_v30 = vadd.f32 %v2428_v44, %v1806_v52  ;;  %v7547_v44 = vld [vmem:[#allocation8_spill] sm:$0xff]  ;;  %v7548_v52 = vld [vmem:[#allocation61_spill] sm:$0xff] }
 0x838   :  { %v3309_v46 = vmul.f32 -1.442695, %v2471_v53  ;;  %v3310_v33 = vmul.f32 -1.442695, %v2472_v30  ;;  %v1847_v30 = vadd.f32 %v7548_v52, %v7547_v44 }
 0x83a   :  { %3501 = vpow2.f32 %v3309_v46 }
 0x83b   :  { %3503 = vpow2.f32 %v3310_v33 }
 0x83c   :  { %v2468_v39 = vpop.f32.mrf.mxu3  ;;  %v2448_v47 = vpop.f32.mrf.mxu2 }
 0x83d   :  { %v2474_v35 = vadd.f32 %v2468_v39, %v1888_v50  ;;  %v2473_v46 = vadd.f32 %v2448_v47, %v1847_v30 }
 0x83f   :  { %v3311_v59 = vmul.f32 -1.442695, %v2474_v35 }
 0x840   :  { %v3502_v37 = vpop.eup %3501 }
 0x841   :  { %v3504_v19 = vpop.eup %3503  ;;  %v2478_v28 = vadd.f32 1.0, %v3502_v37  ;;  %3505 = vpow2.f32 %v3311_v59 }
 0x842   :  { %v2497_v60 = vadd.f32 1.0, %v3504_v19 }
 0x843   :  { %3507 = vrcp.f32 %v2478_v28  ;;  %v2490_v49 = vand.u32 2147483648, %v2478_v28  ;;  %v2488_v59 = vand.u32 2147483647, %v2478_v28  ;;  %vm2484_vm6 = vweird.f32 %v2478_v28 }
 0x844   :  { %3509 = vrcp.f32 %v2497_v60  ;;  %v2509_v37 = vand.u32 2147483648, %v2497_v60  ;;  %v2507_v6 = vand.u32 2147483647, %v2497_v60  ;;  %vm2503_vm7 = vweird.f32 %v2497_v60 }
 0x845   :  { %v2491_v47 = vor.u32 1.1754944e-38, %v2490_v49  ;;  %vm2489_vm10 = vcmp.eq.f32.partialorder %v2488_v59, 8.507059e+37 }
 0x846   :  { %vm2508_vm11 = vcmp.eq.f32.partialorder %v2507_v6, 8.507059e+37 }
 0x847   :  { %v3506_v43 = vpop.eup %3505 }
 0x848   :  { %v2517_v63 = vadd.f32 1.0, %v3506_v43 }
 0x849   :  { %v3508_v53 = vpop.eup %3507 }
 0x84a   :  { %v3510_v38 = vpop.eup %3509  ;;  %v2480_v33 = vmul.f32 %v3508_v53, %v2478_v28  ;;  %3511 = vrcp.f32 %v2517_v63  ;;  %vm2485_vm4 = vweird.f32 %v3508_v53  ;;  %vm2523_vm13 = vweird.f32 %v2517_v63 }
 0x84b   :  { %v2499_v50 = vmul.f32 %v3510_v38, %v2497_v60  ;;  %3513 = vtanh.f32 %v2473_v46  ;;  %vm2504_vm5 = vweird.f32 %v3510_v38  ;;  %vm2486_vm8 = vmor %vm2484_vm6, %vm2485_vm4  ;;  %v2527_v60 = vand.u32 2147483647, %v2517_v63 }
 0x84c   :  { %v2481_v35 = vsub.f32 1.0, %v2480_v33  ;;  %vm2505_vm9 = vmor %vm2503_vm7, %vm2504_vm5  ;;  %v2510_v33 = vor.u32 1.1754944e-38, %v2509_v37 }
 0x84d   :  { %v2500_v39 = vsub.f32 1.0, %v2499_v50  ;;  %vm2528_vm15 = vcmp.eq.f32.partialorder %v2527_v60, 8.507059e+37  ;;  %v7568_v60 = vld [vmem:[#allocation19_spill] sm:$0xff] }
 0x84e   :  { %v2482_v19 = vmul.f32 %v3508_v53, %v2481_v35 }
 0x84f   :  { %v2501_v31 = vmul.f32 %v3510_v38, %v2500_v39 }
 0x850   :  { %v3512_v21 = vpop.eup %3511  ;;  %v2483_v52 = vadd.f32 %v3508_v53, %v2482_v19 }
 0x851   :  { %v2502_v43 = vadd.f32 %v3510_v38, %v2501_v31  ;;  %v2519_v30 = vmul.f32 %v3512_v21, %v2517_v63  ;;  %v3514_v46 = vpop.eup %3513  ;;  %vm2524_vm12 = vweird.f32 %v3512_v21  ;;  %v2529_v31 = vand.u32 2147483648, %v2517_v63  ;;  %v7555_v63 = vld [vmem:[#allocation42_spill] sm:$0xff] }
 0x852   :  { %v2487_v50 = vsel %vm2486_vm8, %v3508_v53, %v2483_v52  ;;  %vm2525_vm14 = vmor %vm2523_vm13, %vm2524_vm12  ;;  %v7556_v52 = vld [vmem:[#allocation43_spill] sm:$0xff] }
 0x853   :  { %v2492_v44 = vsel %vm2489_vm10, %v2491_v47, %v2487_v50  ;;  %v2506_v35 = vsel %vm2505_vm9, %v3510_v38, %v2502_v43  ;;  %v2520_v32 = vsub.f32 1.0, %v2519_v30  ;;  %v2530_v37 = vor.u32 1.1754944e-38, %v2529_v31  ;;  %v7557_v47 = vld [vmem:[#allocation44_spill] sm:$0xff]  ;;  %v7558_v43 = vld [vmem:[#allocation18_spill] sm:$0xff]  ;;  %v7559_v30 = vld [vmem:[#allocation47_spill] sm:$0xff] }
 0x854   :  { %v2511_v39 = vsel %vm2508_vm11, %v2510_v33, %v2506_v35  ;;  %v2534_v36 = vmul.f32 %v3514_v46, %v2492_v44  ;;  %v7554_v44 = vld [vmem:[#allocation14_spill] sm:$0xff]  ;;  %v7561_v50 = vld [vmem:[#allocation12_spill] sm:$0xff]  ;;  %v7563_v35 = vld [vmem:[#allocation15_spill] sm:$0xff] }
 0x855   :  { %v2533_v12 = vmul.f32 %v2511_v39, %v6612_v55  ;;  %v2521_v19 = vmul.f32 %v3512_v21, %v2520_v32  ;;  %v7549_v55 = vld [vmem:[#allocation38_spill] sm:$0xff]  ;;  %v7552_v32 = vld [vmem:[#allocation41_spill] sm:$0xff]  ;;  %v7567_v31 = vld [vmem:[#allocation20_spill] sm:$0xff] }
 0x856   :  { %v7560_v33 = vld [vmem:[#allocation10_spill] sm:$0xff]  ;;  %v7564_v39 = vld [vmem:[#allocation17_spill] sm:$0xff] }
 0x857   :  { %v6693_v28 = vadd.f32 %v2534_v36, %v2533_v12  ;;  %v2522_v49 = vadd.f32 %v3512_v21, %v2521_v19  ;;  %v7550_v12 = vld [vmem:[#allocation13_spill] sm:$0xff]  ;;  %v7551_v36 = vld [vmem:[#allocation39_spill] sm:$0xff]  ;;  %v7562_v46 = vld [vmem:[#allocation22_spill] sm:$0xff] }
 0x858   :  { %v7565_v19 = vld [vmem:[#allocation16_spill] sm:$0xff] }
 0x859   :  { %3515 = vtanh.f32 %v6693_v28  ;;  %v2526_v53 = vsel %vm2525_vm14, %v3512_v21, %v2522_v49  ;;  %v7553_v21 = vld [vmem:[#allocation40_spill] sm:$0xff]  ;;  %v7566_v49 = vld [vmem:[#allocation25_spill] sm:$0xff] }
 0x85a   :  { %v2531_v38 = vsel %vm2528_vm15, %v2530_v37, %v2526_v53  ;;  %v7569_v53 = vld [vmem:[#allocation21_spill] sm:$0xff]  ;;  %v7570_v37 = vld [vmem:[#allocation28_spill] sm:$0xff] }
 0x85f   :  { %v3516_v6 = vpop.eup %3515 }
 0x860   :  { %v2537_v59 = vmul.f32 %v3516_v6, %v2531_v38  ;;  %v7571_v6 = vld [vmem:[#allocation26_spill] sm:$0xff]  ;;  %v7572_v38 = vld [vmem:[#allocation23_spill] sm:$0xff] }
 0x862   :  { %2558 = vmatmul.f32.vlgmr.msra.gmra.mxu0 %v2537_v59  ;;  %2578 = vmatmul.f32.vlgmr.msra.gmra.mxu1 %v2537_v59 }
 0x863   :  { %2598 = vmatmul.f32.vlgmr.msra.gmra.mxu2 %v2537_v59  ;;  %2618 = vmatmul.f32.vlgmr.msra.gmra.mxu3 %v2537_v59  ;;  %v7573_v59 = vld [vmem:[#allocation29_spill] sm:$0xff] }
 0x864   :  { %2844 = vmatpush.msra.mxu0 %v6227_v62  ;;  %2864 = vmatpush.msra.mxu1 %v6233_v27 }
 0x865   :  { %2884 = vmatpush.msra.mxu2 %v6239_v3  ;;  %2904 = vmatpush.msra.mxu3 %v6245_v15 }
 0x866   :  { %2845 = vmatpush.msra.mxu0 %v6251_v13  ;;  %2865 = vmatpush.msra.mxu1 %v6257_v9 }
 0x867   :  { %2885 = vmatpush.msra.mxu2 %v6263_v61  ;;  %2905 = vmatpush.msra.mxu3 %v6269_v29 }
 0x868   :  { %2846 = vmatpush.msra.mxu0 %v6275_v41  ;;  %2866 = vmatpush.msra.mxu1 %v6281_v11 }
 0x869   :  { %2886 = vmatpush.msra.mxu2 %v6287_v34  ;;  %2906 = vmatpush.msra.mxu3 %v6293_v18 }
 0x86a   :  { %2847 = vmatpush.msra.mxu0 %v6299_v8  ;;  %2867 = vmatpush.msra.mxu1 %v6305_v45 }
 0x86b   :  { %2887 = vmatpush.msra.mxu2 %v6311_v48  ;;  %2907 = vmatpush.msra.mxu3 %v6317_v5 }
 0x86c   :  { %2848 = vmatpush.msra.mxu0 %v6323_v16  ;;  %2868 = vmatpush.msra.mxu1 %v6329_v56 }
 0x86d   :  { %2888 = vmatpush.msra.mxu2 %v6335_v51  ;;  %2908 = vmatpush.msra.mxu3 %v6341_v2 }
 0x86e   :  { %2849 = vmatpush.msra.mxu0 %v6347_v20  ;;  %2869 = vmatpush.msra.mxu1 %v6353_v26 }
 0x86f   :  { %2889 = vmatpush.msra.mxu2 %v6359_v57  ;;  %2909 = vmatpush.msra.mxu3 %v6365_v17 }
 0x870   :  { %2850 = vmatpush.msra.mxu0 %v6371_v54  ;;  %2870 = vmatpush.msra.mxu1 %v6377_v14 }
 0x871   :  { %2890 = vmatpush.msra.mxu2 %v6383_v0  ;;  %2910 = vmatpush.msra.mxu3 %v6389_v40 }
 0x872   :  { %2851 = vmatpush.msra.mxu0 %v6395_v10  ;;  %2871 = vmatpush.msra.mxu1 %v6401_v23 }
 0x873   :  { %2891 = vmatpush.msra.mxu2 %v6407_v58  ;;  %2911 = vmatpush.msra.mxu3 %v6413_v7 }
 0x874   :  { %2852 = vmatpush.msra.mxu0 %v6419_v1  ;;  %2872 = vmatpush.msra.mxu1 %v6425_v42 }
 0x875   :  { %2892 = vmatpush.msra.mxu2 %v6431_v24  ;;  %2912 = vmatpush.msra.mxu3 %v6437_v22 }
 0x876   :  { %2853 = vmatpush.msra.mxu0 %v6443_v25  ;;  %2873 = vmatpush.msra.mxu1 %v6449_v4 }
 0x877   :  { %2893 = vmatpush.msra.mxu2 %v7549_v55  ;;  %2913 = vmatpush.msra.mxu3 %v7550_v12 }
 0x878   :  { %2854 = vmatpush.msra.mxu0 %v7551_v36  ;;  %2874 = vmatpush.msra.mxu1 %v7552_v32 }
 0x879   :  { %2894 = vmatpush.msra.mxu2 %v7553_v21  ;;  %2914 = vmatpush.msra.mxu3 %v7554_v44 }
 0x87a   :  { %2855 = vmatpush.msra.mxu0 %v7555_v63  ;;  %2875 = vmatpush.msra.mxu1 %v7556_v52 }
 0x87b   :  { %2895 = vmatpush.msra.mxu2 %v7557_v47  ;;  %2915 = vmatpush.msra.mxu3 %v7558_v43  ;;  %v7580_v47 = vld [vmem:[#allocation51_spill] sm:$0xff] }
 0x87c   :  { %2856 = vmatpush.msra.mxu0 %v7559_v30  ;;  %2876 = vmatpush.msra.mxu1 %v7560_v33 }
 0x87d   :  { %2896 = vmatpush.msra.mxu2 %v7561_v50  ;;  %2916 = vmatpush.msra.mxu3 %v7562_v46  ;;  %v7578_v50 = vld [vmem:[#allocation48_spill] sm:$0xff] }
 0x87e   :  { %2857 = vmatpush.msra.mxu0 %v7563_v35  ;;  %2877 = vmatpush.msra.mxu1 %v7564_v39  ;;  %v7574_v35 = vld [vmem:[#allocation24_spill] sm:$0xff]  ;;  %v7575_v39 = vld [vmem:[#allocation58_spill] sm:$0xff] }
 0x87f   :  { %2897 = vmatpush.msra.mxu2 %v7565_v19  ;;  %2917 = vmatpush.msra.mxu3 %v7566_v49  ;;  %v7576_v19 = vld [vmem:[#allocation59_spill] sm:$0xff]  ;;  %v7577_v49 = vld [vmem:[#allocation60_spill] sm:$0xff] }
 0x880   :  { %2858 = vmatpush.msra.mxu0 %v7567_v31  ;;  %2878 = vmatpush.msra.mxu1 %v7568_v60  ;;  %v1768_v46 = vadd.f32 %v7576_v19, %v7575_v39  ;;  %v1809_v31 = vadd.f32 %v7578_v50, %v7577_v49 }
 0x881   :  { %2898 = vmatpush.msra.mxu2 %v7569_v53  ;;  %2918 = vmatpush.msra.mxu3 %v7570_v37 }
 0x882   :  { %2859 = vmatpush.msra.mxu0 %v7571_v6  ;;  %2879 = vmatpush.msra.mxu1 %v7572_v38  ;;  %v7579_v6 = vld [vmem:[#allocation9_spill] sm:$0xff] }
 0x883   :  { %2899 = vmatpush.msra.mxu2 %v7573_v59  ;;  %2919 = vmatpush.msra.mxu3 %v7574_v35  ;;  %v1891_v38 = vadd.f32 %v7580_v47, %v7579_v6 }
 0x8df   :  { %v2559_v33 = vpop.f32.mrf.mxu0  ;;  %v2579_v60 = vpop.f32.mrf.mxu1 }
 0x8e0   :  { %v2622_v30 = vadd.f32 %v2559_v33, %v1768_v46  ;;  %v2623_v53 = vadd.f32 %v2579_v60, %v1809_v31  ;;  %v7581_v46 = vld [vmem:[#allocation8_spill] sm:$0xff] }
 0x8e2   :  { %v3312_v43 = vmul.f32 -1.442695, %v2622_v30  ;;  %v3313_v37 = vmul.f32 -1.442695, %v2623_v53  ;;  %v7582_v30 = vld [vmem:[#allocation52_spill] sm:$0xff] }
 0x8e3   :  { %v1850_v31 = vadd.f32 %v7582_v30, %v7581_v46 }
 0x8e4   :  { %3517 = vpow2.f32 %v3312_v43 }
 0x8e5   :  { %3519 = vpow2.f32 %v3313_v37 }
 0x8e6   :  { %v2619_v59 = vpop.f32.mrf.mxu3  ;;  %v2599_v50 = vpop.f32.mrf.mxu2 }
 0x8e7   :  { %v2625_v52 = vadd.f32 %v2619_v59, %v1891_v38  ;;  %v2624_v53 = vadd.f32 %v2599_v50, %v1850_v31 }
 0x8e9   :  { %v3314_v35 = vmul.f32 -1.442695, %v2625_v52 }
 0x8ea   :  { %v3518_v63 = vpop.eup %3517 }
 0x8eb   :  { %v3520_v44 = vpop.eup %3519  ;;  %v2629_v19 = vadd.f32 1.0, %v3518_v63  ;;  %3521 = vpow2.f32 %v3314_v35 }
 0x8ec   :  { %v2648_v39 = vadd.f32 1.0, %v3520_v44 }
 0x8ed   :  { %3523 = vrcp.f32 %v2629_v19  ;;  %v2641_v6 = vand.u32 2147483648, %v2629_v19  ;;  %v2639_v35 = vand.u32 2147483647, %v2629_v19  ;;  %vm2635_vm2 = vweird.f32 %v2629_v19 }
 0x8ee   :  { %3525 = vrcp.f32 %v2648_v39  ;;  %v2660_v63 = vand.u32 2147483648, %v2648_v39  ;;  %v2658_v21 = vand.u32 2147483647, %v2648_v39  ;;  %vm2654_vm3 = vweird.f32 %v2648_v39 }
 0x8ef   :  { %v2642_v50 = vor.u32 1.1754944e-38, %v2641_v6  ;;  %vm2640_vm6 = vcmp.eq.f32.partialorder %v2639_v35, 8.507059e+37 }
 0x8f0   :  { %vm2659_vm7 = vcmp.eq.f32.partialorder %v2658_v21, 8.507059e+37 }
 0x8f1   :  { %v3522_v33 = vpop.eup %3521 }
 0x8f2   :  { %v2668_v43 = vadd.f32 1.0, %v3522_v33 }
 0x8f3   :  { %v3524_v60 = vpop.eup %3523 }
 0x8f4   :  { %v3526_v47 = vpop.eup %3525  ;;  %v2631_v37 = vmul.f32 %v3524_v60, %v2629_v19  ;;  %3527 = vrcp.f32 %v2668_v43  ;;  %vm2636_vm0 = vweird.f32 %v3524_v60  ;;  %vm2674_vm9 = vweird.f32 %v2668_v43 }
 0x8f5   :  { %v2650_v38 = vmul.f32 %v3526_v47, %v2648_v39  ;;  %3529 = vtanh.f32 %v2624_v53  ;;  %vm2655_vm1 = vweird.f32 %v3526_v47  ;;  %vm2637_vm4 = vmor %vm2635_vm2, %vm2636_vm0  ;;  %v2678_v6 = vand.u32 2147483647, %v2668_v43 }
 0x8f6   :  { %v2632_v52 = vsub.f32 1.0, %v2631_v37  ;;  %vm2656_vm5 = vmor %vm2654_vm3, %vm2655_vm1  ;;  %v2661_v37 = vor.u32 1.1754944e-38, %v2660_v63 }
 0x8f7   :  { %v2651_v59 = vsub.f32 1.0, %v2650_v38  ;;  %vm2679_vm11 = vcmp.eq.f32.partialorder %v2678_v6, 8.507059e+37 }
 0x8f8   :  { %v2633_v44 = vmul.f32 %v3524_v60, %v2632_v52 }
 0x8f9   :  { %v2652_v49 = vmul.f32 %v3526_v47, %v2651_v59 }
 0x8fa   :  { %v3528_v32 = vpop.eup %3527  ;;  %v2634_v30 = vadd.f32 %v3524_v60, %v2633_v44 }
 0x8fb   :  { %v2653_v33 = vadd.f32 %v3526_v47, %v2652_v49  ;;  %v2670_v31 = vmul.f32 %v3528_v32, %v2668_v43  ;;  %v3530_v53 = vpop.eup %3529  ;;  %vm2675_vm8 = vweird.f32 %v3528_v32  ;;  %v2680_v49 = vand.u32 2147483648, %v2668_v43 }
 0x8fc   :  { %v2638_v38 = vsel %vm2637_vm4, %v3524_v60, %v2634_v30  ;;  %vm2676_vm10 = vmor %vm2674_vm9, %vm2675_vm8 }
 0x8fd   :  { %v2643_v46 = vsel %vm2640_vm6, %v2642_v50, %v2638_v38  ;;  %v2657_v52 = vsel %vm2656_vm5, %v3526_v47, %v2653_v33  ;;  %v2671_v36 = vsub.f32 1.0, %v2670_v31  ;;  %v2681_v63 = vor.u32 1.1754944e-38, %v2680_v49  ;;  %v7615_v38 = vld [vmem:[#allocation8_spill] sm:$0xff] }
 0x8fe   :  { %v2662_v59 = vsel %vm2659_vm7, %v2661_v37, %v2657_v52  ;;  %v2685_v12 = vmul.f32 %v3530_v53, %v2643_v46  ;;  %v7616_v53 = vld [vmem:[#allocation11_spill] sm:$0xff] }
 0x8ff   :  { %v2684_v55 = vmul.f32 %v2662_v59, %v6693_v28  ;;  %v2672_v44 = vmul.f32 %v3528_v32, %v2671_v36  ;;  %v7613_v28 = vld [vmem:[#allocation9_spill] sm:$0xff]  ;;  %v1853_v52 = vadd.f32 %v7616_v53, %v7615_v38 }
 0x901   :  { %v6769_v19 = vadd.f32 %v2685_v12, %v2684_v55  ;;  %v2673_v39 = vadd.f32 %v3528_v32, %v2672_v44  ;;  %v7614_v55 = vld [vmem:[#allocation57_spill] sm:$0xff] }
 0x902   :  { %v1894_v12 = vadd.f32 %v7614_v55, %v7613_v28 }
 0x903   :  { %3531 = vtanh.f32 %v6769_v19  ;;  %v2677_v60 = vsel %vm2676_vm10, %v3528_v32, %v2673_v39 }
 0x904   :  { %v2682_v47 = vsel %vm2679_vm11, %v2681_v63, %v2677_v60 }
 0x909   :  { %v3532_v21 = vpop.eup %3531 }
 0x90a   :  { %v2688_v35 = vmul.f32 %v3532_v21, %v2682_v47 }
 0x90c   :  { %2709 = vmatmul.f32.vlgmr.msrb.gmra.mxu0 %v2688_v35  ;;  %2729 = vmatmul.f32.vlgmr.msrb.gmra.mxu1 %v2688_v35 }
 0x90d   :  { %2749 = vmatmul.f32.vlgmr.msrb.gmra.mxu2 %v2688_v35  ;;  %2769 = vmatmul.f32.vlgmr.msrb.gmra.mxu3 %v2688_v35 }
 0x90e   :  { %2995 = vmatpush.msrb.mxu0 %v6227_v62  ;;  %3015 = vmatpush.msrb.mxu1 %v6233_v27  ;;  %v7583_v62 = vld [vmem:[#allocation38_spill] sm:$0xff]  ;;  %v7584_v27 = vld [vmem:[#allocation13_spill] sm:$0xff] }
 0x90f   :  { %3035 = vmatpush.msrb.mxu2 %v6239_v3  ;;  %3055 = vmatpush.msrb.mxu3 %v6245_v15  ;;  %v7585_v3 = vld [vmem:[#allocation39_spill] sm:$0xff]  ;;  %v7586_v15 = vld [vmem:[#allocation41_spill] sm:$0xff] }
 0x910   :  { %2996 = vmatpush.msrb.mxu0 %v6251_v13  ;;  %3016 = vmatpush.msrb.mxu1 %v6257_v9  ;;  %v7587_v13 = vld [vmem:[#allocation40_spill] sm:$0xff]  ;;  %v7588_v9 = vld [vmem:[#allocation14_spill] sm:$0xff] }
 0x911   :  { %3036 = vmatpush.msrb.mxu2 %v6263_v61  ;;  %3056 = vmatpush.msrb.mxu3 %v6269_v29  ;;  %v7589_v61 = vld [vmem:[#allocation42_spill] sm:$0xff]  ;;  %v7590_v29 = vld [vmem:[#allocation43_spill] sm:$0xff] }
 0x912   :  { %2997 = vmatpush.msrb.mxu0 %v6275_v41  ;;  %3017 = vmatpush.msrb.mxu1 %v6281_v11  ;;  %v7591_v41 = vld [vmem:[#allocation44_spill] sm:$0xff]  ;;  %v7592_v11 = vld [vmem:[#allocation18_spill] sm:$0xff] }
 0x913   :  { %3037 = vmatpush.msrb.mxu2 %v6287_v34  ;;  %3057 = vmatpush.msrb.mxu3 %v6293_v18  ;;  %v7593_v34 = vld [vmem:[#allocation47_spill] sm:$0xff]  ;;  %v7594_v18 = vld [vmem:[#allocation10_spill] sm:$0xff] }
 0x914   :  { %2998 = vmatpush.msrb.mxu0 %v6299_v8  ;;  %3018 = vmatpush.msrb.mxu1 %v6305_v45  ;;  %v7595_v8 = vld [vmem:[#allocation12_spill] sm:$0xff]  ;;  %v7596_v45 = vld [vmem:[#allocation22_spill] sm:$0xff] }
 0x915   :  { %3038 = vmatpush.msrb.mxu2 %v6311_v48  ;;  %3058 = vmatpush.msrb.mxu3 %v6317_v5  ;;  %v7597_v48 = vld [vmem:[#allocation15_spill] sm:$0xff]  ;;  %v7598_v5 = vld [vmem:[#allocation17_spill] sm:$0xff] }
 0x916   :  { %2999 = vmatpush.msrb.mxu0 %v6323_v16  ;;  %3019 = vmatpush.msrb.mxu1 %v6329_v56  ;;  %v7599_v16 = vld [vmem:[#allocation16_spill] sm:$0xff]  ;;  %v7600_v56 = vld [vmem:[#allocation25_spill] sm:$0xff] }
 0x917   :  { %3039 = vmatpush.msrb.mxu2 %v6335_v51  ;;  %3059 = vmatpush.msrb.mxu3 %v6341_v2  ;;  %v7601_v51 = vld [vmem:[#allocation20_spill] sm:$0xff]  ;;  %v7602_v2 = vld [vmem:[#allocation19_spill] sm:$0xff] }
 0x918   :  { %3000 = vmatpush.msrb.mxu0 %v6347_v20  ;;  %3020 = vmatpush.msrb.mxu1 %v6353_v26  ;;  %v7603_v20 = vld [vmem:[#allocation21_spill] sm:$0xff]  ;;  %v7604_v26 = vld [vmem:[#allocation28_spill] sm:$0xff] }
 0x919   :  { %3040 = vmatpush.msrb.mxu2 %v6359_v57  ;;  %3060 = vmatpush.msrb.mxu3 %v6365_v17  ;;  %v7605_v57 = vld [vmem:[#allocation26_spill] sm:$0xff]  ;;  %v7606_v17 = vld [vmem:[#allocation23_spill] sm:$0xff] }
 0x91a   :  { %3001 = vmatpush.msrb.mxu0 %v6371_v54  ;;  %3021 = vmatpush.msrb.mxu1 %v6377_v14  ;;  %v7607_v54 = vld [vmem:[#allocation29_spill] sm:$0xff]  ;;  %v7608_v14 = vld [vmem:[#allocation24_spill] sm:$0xff] }
 0x91b   :  { %3041 = vmatpush.msrb.mxu2 %v6383_v0  ;;  %3061 = vmatpush.msrb.mxu3 %v6389_v40  ;;  %v7609_v0 = vld [vmem:[#allocation58_spill] sm:$0xff]  ;;  %v7610_v40 = vld [vmem:[#allocation49_spill] sm:$0xff] }
 0x91c   :  { %3002 = vmatpush.msrb.mxu0 %v6395_v10  ;;  %3022 = vmatpush.msrb.mxu1 %v6401_v23  ;;  %v1771_v10 = vadd.f32 %v7610_v40, %v7609_v0  ;;  %v7611_v23 = vld [vmem:[#allocation60_spill] sm:$0xff] }
 0x91d   :  { %3042 = vmatpush.msrb.mxu2 %v6407_v58  ;;  %3062 = vmatpush.msrb.mxu3 %v6413_v7  ;;  %v7612_v58 = vld [vmem:[#allocation50_spill] sm:$0xff] }
 0x91e   :  { %3003 = vmatpush.msrb.mxu0 %v6419_v1  ;;  %3023 = vmatpush.msrb.mxu1 %v6425_v42  ;;  %v1812_v7 = vadd.f32 %v7612_v58, %v7611_v23 }
 0x91f   :  { %3043 = vmatpush.msrb.mxu2 %v6431_v24  ;;  %3063 = vmatpush.msrb.mxu3 %v6437_v22 }
 0x920   :  { %3004 = vmatpush.msrb.mxu0 %v6443_v25  ;;  %3024 = vmatpush.msrb.mxu1 %v6449_v4 }
 0x921   :  { %3044 = vmatpush.msrb.mxu2 %v7583_v62  ;;  %3064 = vmatpush.msrb.mxu3 %v7584_v27 }
 0x922   :  { %3005 = vmatpush.msrb.mxu0 %v7585_v3  ;;  %3025 = vmatpush.msrb.mxu1 %v7586_v15 }
 0x923   :  { %3045 = vmatpush.msrb.mxu2 %v7587_v13  ;;  %3065 = vmatpush.msrb.mxu3 %v7588_v9 }
 0x924   :  { %3006 = vmatpush.msrb.mxu0 %v7589_v61  ;;  %3026 = vmatpush.msrb.mxu1 %v7590_v29 }
 0x925   :  { %3046 = vmatpush.msrb.mxu2 %v7591_v41  ;;  %3066 = vmatpush.msrb.mxu3 %v7592_v11 }
 0x926   :  { %3007 = vmatpush.msrb.mxu0 %v7593_v34  ;;  %3027 = vmatpush.msrb.mxu1 %v7594_v18 }
 0x927   :  { %3047 = vmatpush.msrb.mxu2 %v7595_v8  ;;  %3067 = vmatpush.msrb.mxu3 %v7596_v45 }
 0x928   :  { %3008 = vmatpush.msrb.mxu0 %v7597_v48  ;;  %3028 = vmatpush.msrb.mxu1 %v7598_v5 }
 0x929   :  { %3048 = vmatpush.msrb.mxu2 %v7599_v16  ;;  %3068 = vmatpush.msrb.mxu3 %v7600_v56 }
 0x92a   :  { %3009 = vmatpush.msrb.mxu0 %v7601_v51  ;;  %3029 = vmatpush.msrb.mxu1 %v7602_v2 }
 0x92b   :  { %3049 = vmatpush.msrb.mxu2 %v7603_v20  ;;  %3069 = vmatpush.msrb.mxu3 %v7604_v26 }
 0x92c   :  { %3010 = vmatpush.msrb.mxu0 %v7605_v57  ;;  %3030 = vmatpush.msrb.mxu1 %v7606_v17 }
 0x92d   :  { %3050 = vmatpush.msrb.mxu2 %v7607_v54  ;;  %3070 = vmatpush.msrb.mxu3 %v7608_v14 }
 0x989   :  { %v2710_v1 = vpop.f32.mrf.mxu0  ;;  %v2730_v42 = vpop.f32.mrf.mxu1 }
 0x98a   :  { %v2773_v24 = vadd.f32 %v2710_v1, %v1771_v10  ;;  %v2774_v22 = vadd.f32 %v2730_v42, %v1812_v7  ;;  %v7618_v7 = vld [vmem:[#allocation5_spill] sm:$0xff] }
 0x98b   :  { %v1815_v1 = vadd.f32 %v7618_v7, %v7611_v23 }
 0x98c   :  { %v3315_v25 = vmul.f32 -1.442695, %v2773_v24  ;;  %v3316_v4 = vmul.f32 -1.442695, %v2774_v22 }
 0x98e   :  { %3533 = vpow2.f32 %v3315_v25 }
 0x98f   :  { %3535 = vpow2.f32 %v3316_v4 }
 0x990   :  { %v2770_v36 = vpop.f32.mrf.mxu3  ;;  %v2750_v31 = vpop.f32.mrf.mxu2 }
 0x991   :  { %v2776_v32 = vadd.f32 %v2770_v36, %v1894_v12  ;;  %v2775_v39 = vadd.f32 %v2750_v31, %v1853_v52  ;;  %v7619_v12 = vld [vmem:[#allocation36_spill] sm:$0xff] }
 0x992   :  { %v1897_v36 = vadd.f32 %v7619_v12, %v7613_v28  ;;  %v7620_v52 = vld [vmem:[#allocation4_spill] sm:$0xff] }
 0x993   :  { %v3317_v46 = vmul.f32 -1.442695, %v2776_v32 }
 0x994   :  { %v3534_v43 = vpop.eup %3533 }
 0x995   :  { %v3536_v30 = vpop.eup %3535  ;;  %v2780_v50 = vadd.f32 1.0, %v3534_v43  ;;  %3537 = vpow2.f32 %v3317_v46 }
 0x996   :  { %v2799_v33 = vadd.f32 1.0, %v3536_v30 }
 0x997   :  { %3539 = vrcp.f32 %v2780_v50  ;;  %v2792_v47 = vand.u32 2147483648, %v2780_v50  ;;  %v2790_v27 = vand.u32 2147483647, %v2780_v50  ;;  %vm2786_vm14 = vweird.f32 %v2780_v50 }
 0x998   :  { %3541 = vrcp.f32 %v2799_v33  ;;  %v2811_v35 = vand.u32 2147483648, %v2799_v33  ;;  %v2809_v15 = vand.u32 2147483647, %v2799_v33  ;;  %vm2805_vm15 = vweird.f32 %v2799_v33 }
 0x999   :  { %v2793_v61 = vor.u32 1.1754944e-38, %v2792_v47  ;;  %vm2791_vm2 = vcmp.eq.f32.partialorder %v2790_v27, 8.507059e+37 }
 0x99a   :  { %v2812_v11 = vor.u32 1.1754944e-38, %v2811_v35  ;;  %vm2810_vm3 = vcmp.eq.f32.partialorder %v2809_v15, 8.507059e+37 }
 0x99b   :  { %v3538_v37 = vpop.eup %3537 }
 0x99c   :  { %v2819_v59 = vadd.f32 1.0, %v3538_v37 }
 0x99d   :  { %v3540_v44 = vpop.eup %3539 }
 0x99e   :  { %v3542_v49 = vpop.eup %3541  ;;  %v2782_v6 = vmul.f32 %v3540_v44, %v2780_v50  ;;  %3543 = vrcp.f32 %v2819_v59  ;;  %vm2787_vm12 = vweird.f32 %v3540_v44  ;;  %v2831_v26 = vand.u32 2147483648, %v2819_v59 }
 0x99f   :  { %v2801_v60 = vmul.f32 %v3542_v49, %v2799_v33  ;;  %3545 = vtanh.f32 %v2775_v39  ;;  %vm2806_vm13 = vweird.f32 %v3542_v49  ;;  %vm2788_vm0 = vmor %vm2786_vm14, %vm2787_vm12  ;;  %vm2825_vm5 = vweird.f32 %v2819_v59 }
 0x9a0   :  { %v2783_v63 = vsub.f32 1.0, %v2782_v6  ;;  %vm2807_vm1 = vmor %vm2805_vm15, %vm2806_vm13  ;;  %v2829_v57 = vand.u32 2147483647, %v2819_v59  ;;  %v2832_v54 = vor.u32 1.1754944e-38, %v2831_v26 }
 0x9a1   :  { %v2802_v21 = vsub.f32 1.0, %v2801_v60 }
 0x9a2   :  { %v2784_v62 = vmul.f32 %v3540_v44, %v2783_v63  ;;  %vm2830_vm7 = vcmp.eq.f32.partialorder %v2829_v57, 8.507059e+37 }
 0x9a3   :  { %v2803_v3 = vmul.f32 %v3542_v49, %v2802_v21 }
 0x9a4   :  { %v3544_v13 = vpop.eup %3543  ;;  %v2785_v9 = vadd.f32 %v3540_v44, %v2784_v62 }
 0x9a5   :  { %v2804_v29 = vadd.f32 %v3542_v49, %v2803_v3  ;;  %v2821_v41 = vmul.f32 %v3544_v13, %v2819_v59  ;;  %v3546_v18 = vpop.eup %3545  ;;  %vm2826_vm4 = vweird.f32 %v3544_v13  ;;  %v1856_v59 = vadd.f32 %v7620_v52, %v7615_v38 }
 0x9a6   :  { %v2789_v34 = vsel %vm2788_vm0, %v3540_v44, %v2785_v9  ;;  %vm2827_vm6 = vmor %vm2825_vm5, %vm2826_vm4 }
 0x9a7   :  { %v2794_v8 = vsel %vm2791_vm2, %v2793_v61, %v2789_v34  ;;  %v2808_v45 = vsel %vm2807_vm1, %v3542_v49, %v2804_v29  ;;  %v2822_v48 = vsub.f32 1.0, %v2821_v41 }
 0x9a8   :  { %v2813_v5 = vsel %vm2810_vm3, %v2812_v11, %v2808_v45  ;;  %v2836_v16 = vmul.f32 %v3546_v18, %v2794_v8 }
 0x9a9   :  { %v2835_v56 = vmul.f32 %v2813_v5, %v6769_v19  ;;  %v2823_v51 = vmul.f32 %v3544_v13, %v2822_v48  ;;  %v7617_v19 = vld [vmem:[#allocation62_spill] sm:$0xff] }
 0x9aa   :  { %v1774_v58 = vadd.f32 %v7617_v19, %v7609_v0 }
 0x9ab   :  { %v6845_v2 = vadd.f32 %v2836_v16, %v2835_v56  ;;  %v2824_v20 = vadd.f32 %v3544_v13, %v2823_v51 }
 0x9ad   :  { %3547 = vtanh.f32 %v6845_v2  ;;  %v2828_v17 = vsel %vm2827_vm6, %v3544_v13, %v2824_v20 }
 0x9ae   :  { %v2833_v40 = vsel %vm2830_vm7, %v2832_v54, %v2828_v17 }
 0x9b3   :  { %v3548_v14 = vpop.eup %3547 }
 0x9b4   :  { %v2839_v10 = vmul.f32 %v3548_v14, %v2833_v40 }
 0x9b6   :  { %2860 = vmatmul.f32.vlgmr.msra.gmra.mxu0 %v2839_v10  ;;  %2880 = vmatmul.f32.vlgmr.msra.gmra.mxu1 %v2839_v10 }
 0x9b7   :  { %2900 = vmatmul.f32.vlgmr.msra.gmra.mxu2 %v2839_v10  ;;  %2920 = vmatmul.f32.vlgmr.msra.gmra.mxu3 %v2839_v10 }
 0xa33   :  { %v2861_v42 = vpop.f32.mrf.mxu0  ;;  %v2881_v24 = vpop.f32.mrf.mxu1 }
 0xa34   :  { %v2924_v22 = vadd.f32 %v2861_v42, %v1774_v58  ;;  %v2925_v25 = vadd.f32 %v2881_v24, %v1815_v1  ;;  %v7622_v1 = vld [vmem:[#allocation54_spill] sm:$0xff] }
 0xa35   :  { %v1818_v42 = vadd.f32 %v7622_v1, %v7611_v23 }
 0xa36   :  { %v3318_v4 = vmul.f32 -1.442695, %v2924_v22  ;;  %v3319_v55 = vmul.f32 -1.442695, %v2925_v25 }
 0xa38   :  { %3549 = vpow2.f32 %v3318_v4 }
 0xa39   :  { %3551 = vpow2.f32 %v3319_v55 }
 0xa3a   :  { %v2921_v32 = vpop.f32.mrf.mxu3  ;;  %v2901_v37 = vpop.f32.mrf.mxu2 }
 0xa3b   :  { %v2927_v46 = vadd.f32 %v2921_v32, %v1897_v36  ;;  %v2926_v49 = vadd.f32 %v2901_v37, %v1856_v59  ;;  %v7623_v36 = vld [vmem:[#allocation6_spill] sm:$0xff] }
 0xa3c   :  { %v1900_v32 = vadd.f32 %v7623_v36, %v7613_v28 }
 0xa3d   :  { %v3320_v43 = vmul.f32 -1.442695, %v2927_v46 }
 0xa3e   :  { %v3550_v30 = vpop.eup %3549 }
 0xa3f   :  { %v3552_v50 = vpop.eup %3551  ;;  %v2931_v33 = vadd.f32 1.0, %v3550_v30  ;;  %3553 = vpow2.f32 %v3320_v43 }
 0xa40   :  { %v2950_v31 = vadd.f32 1.0, %v3552_v50 }
 0xa41   :  { %3555 = vrcp.f32 %v2931_v33  ;;  %v2943_v35 = vand.u32 2147483648, %v2931_v33  ;;  %v2941_v3 = vand.u32 2147483647, %v2931_v33  ;;  %vm2937_vm10 = vweird.f32 %v2931_v33 }
 0xa42   :  { %3557 = vrcp.f32 %v2950_v31  ;;  %v2962_v62 = vand.u32 2147483648, %v2950_v31  ;;  %v2960_v13 = vand.u32 2147483647, %v2950_v31  ;;  %vm2956_vm11 = vweird.f32 %v2950_v31 }
 0xa43   :  { %v2944_v29 = vor.u32 1.1754944e-38, %v2943_v35  ;;  %vm2942_vm14 = vcmp.eq.f32.partialorder %v2941_v3, 8.507059e+37 }
 0xa44   :  { %v2963_v34 = vor.u32 1.1754944e-38, %v2962_v62  ;;  %vm2961_vm15 = vcmp.eq.f32.partialorder %v2960_v13, 8.507059e+37 }
 0xa45   :  { %v3554_v53 = vpop.eup %3553 }
 0xa46   :  { %v2970_v44 = vadd.f32 1.0, %v3554_v53  ;;  %v7624_v53 = vld [vmem:[#allocation7_spill] sm:$0xff] }
 0xa47   :  { %v3556_v39 = vpop.eup %3555  ;;  %v1859_v52 = vadd.f32 %v7624_v53, %v7615_v38 }
 0xa48   :  { %v3558_v6 = vpop.eup %3557  ;;  %v2933_v60 = vmul.f32 %v3556_v39, %v2931_v33  ;;  %3559 = vrcp.f32 %v2970_v44  ;;  %vm2938_vm8 = vweird.f32 %v3556_v39  ;;  %v2982_v17 = vand.u32 2147483648, %v2970_v44 }
 0xa49   :  { %v2952_v63 = vmul.f32 %v3558_v6, %v2950_v31  ;;  %3561 = vtanh.f32 %v2926_v49  ;;  %vm2957_vm9 = vweird.f32 %v3558_v6  ;;  %vm2939_vm12 = vmor %vm2937_vm10, %vm2938_vm8  ;;  %vm2976_vm1 = vweird.f32 %v2970_v44 }
 0xa4a   :  { %v2934_v21 = vsub.f32 1.0, %v2933_v60  ;;  %vm2958_vm13 = vmor %vm2956_vm11, %vm2957_vm9  ;;  %v2980_v54 = vand.u32 2147483647, %v2970_v44  ;;  %v2983_v40 = vor.u32 1.1754944e-38, %v2982_v17 }
 0xa4b   :  { %v2953_v47 = vsub.f32 1.0, %v2952_v63 }
 0xa4c   :  { %v2935_v27 = vmul.f32 %v3556_v39, %v2934_v21  ;;  %vm2981_vm3 = vcmp.eq.f32.partialorder %v2980_v54, 8.507059e+37 }
 0xa4d   :  { %v2954_v15 = vmul.f32 %v3558_v6, %v2953_v47 }
 0xa4e   :  { %v3560_v9 = vpop.eup %3559  ;;  %v2936_v61 = vadd.f32 %v3556_v39, %v2935_v27 }
 0xa4f   :  { %v2955_v41 = vadd.f32 %v3558_v6, %v2954_v15  ;;  %v2972_v11 = vmul.f32 %v3560_v9, %v2970_v44  ;;  %v3562_v8 = vpop.eup %3561  ;;  %vm2977_vm0 = vweird.f32 %v3560_v9 }
 0xa50   :  { %v2940_v18 = vsel %vm2939_vm12, %v3556_v39, %v2936_v61  ;;  %vm2978_vm2 = vmor %vm2976_vm1, %vm2977_vm0 }
 0xa51   :  { %v2945_v45 = vsel %vm2942_vm14, %v2944_v29, %v2940_v18  ;;  %v2959_v48 = vsel %vm2958_vm13, %v3558_v6, %v2955_v41  ;;  %v2973_v5 = vsub.f32 1.0, %v2972_v11 }
 0xa52   :  { %v2964_v16 = vsel %vm2961_vm15, %v2963_v34, %v2959_v48  ;;  %v2987_v56 = vmul.f32 %v3562_v8, %v2945_v45 }
 0xa53   :  { %v2986_v51 = vmul.f32 %v2964_v16, %v6845_v2  ;;  %v2974_v20 = vmul.f32 %v3560_v9, %v2973_v5  ;;  %v7621_v2 = vld [vmem:[#allocation53_spill] sm:$0xff] }
 0xa54   :  { %v1777_v7 = vadd.f32 %v7621_v2, %v7609_v0 }
 0xa55   :  { %v6857_v26 = vadd.f32 %v2987_v56, %v2986_v51  ;;  %v2975_v57 = vadd.f32 %v3560_v9, %v2974_v20 }
 0xa57   :  { %3563 = vtanh.f32 %v6857_v26  ;;  %v2979_v14 = vsel %vm2978_vm2, %v3560_v9, %v2975_v57 }
 0xa58   :  { %v2984_v19 = vsel %vm2981_vm3, %v2983_v40, %v2979_v14 }
 0xa5d   :  { %v3564_v10 = vpop.eup %3563 }
 0xa5e   :  { %v2990_v58 = vmul.f32 %v3564_v10, %v2984_v19 }
 0xa60   :  { %3011 = vmatmul.f32.vlgmr.msrb.gmra.mxu0 %v2990_v58  ;;  %3031 = vmatmul.f32.vlgmr.msrb.gmra.mxu1 %v2990_v58 }
 0xa61   :  { %3051 = vmatmul.f32.vlgmr.msrb.gmra.mxu2 %v2990_v58  ;;  %3071 = vmatmul.f32.vlgmr.msrb.gmra.mxu3 %v2990_v58 }
 0xadd   :  { %v3012_v24 = vpop.f32.mrf.mxu0  ;;  %v3032_v22 = vpop.f32.mrf.mxu1 }
 0xade   :  { %v3075_v25 = vadd.f32 %v3012_v24, %v1777_v7  ;;  %v3076_v4 = vadd.f32 %v3032_v22, %v1818_v42 }
 0xae0   :  { %v3321_v55 = vmul.f32 -1.442695, %v3075_v25  ;;  %v3322_v12 = vmul.f32 -1.442695, %v3076_v4 }
 0xae2   :  { %3565 = vpow2.f32 %v3321_v55 }
 0xae3   :  { %3567 = vpow2.f32 %v3322_v12 }
 0xae4   :  { %v3072_v46 = vpop.f32.mrf.mxu3  ;;  %v3052_v23 = vpop.f32.mrf.mxu2 }
 0xae5   :  { %v3078_v43 = vadd.f32 %v3072_v46, %v1900_v32  ;;  %v3077_v39 = vadd.f32 %v3052_v23, %v1859_v52 }
 0xae7   :  { %v3323_v30 = vmul.f32 -1.442695, %v3078_v43 }
 0xae8   :  { %v3566_v50 = vpop.eup %3565 }
 0xae9   :  { %v3568_v33 = vpop.eup %3567  ;;  %v3082_v0 = vadd.f32 1.0, %v3566_v50  ;;  %3569 = vpow2.f32 %v3323_v30 }
 0xaea   :  { %v3101_v31 = vadd.f32 1.0, %v3568_v33 }
 0xaeb   :  { %3571 = vrcp.f32 %v3082_v0  ;;  %v3094_v21 = vand.u32 2147483648, %v3082_v0  ;;  %v3092_v62 = vand.u32 2147483647, %v3082_v0  ;;  %vm3088_vm6 = vweird.f32 %v3082_v0 }
 0xaec   :  { %3573 = vrcp.f32 %v3101_v31  ;;  %v3113_v47 = vand.u32 2147483648, %v3101_v31  ;;  %v3111_v3 = vand.u32 2147483647, %v3101_v31  ;;  %vm3107_vm7 = vweird.f32 %v3101_v31 }
 0xaed   :  { %v3095_v13 = vor.u32 1.1754944e-38, %v3094_v21  ;;  %vm3093_vm10 = vcmp.eq.f32.partialorder %v3092_v62, 8.507059e+37 }
 0xaee   :  { %v3114_v29 = vor.u32 1.1754944e-38, %v3113_v47  ;;  %vm3112_vm11 = vcmp.eq.f32.partialorder %v3111_v3, 8.507059e+37 }
 0xaef   :  { %v3570_v37 = vpop.eup %3569 }
 0xaf0   :  { %v3121_v59 = vadd.f32 1.0, %v3570_v37 }
 0xaf1   :  { %v3572_v44 = vpop.eup %3571 }
 0xaf2   :  { %v3574_v28 = vpop.eup %3573  ;;  %v3084_v49 = vmul.f32 %v3572_v44, %v3082_v0  ;;  %3575 = vrcp.f32 %v3121_v59  ;;  %vm3089_vm4 = vweird.f32 %v3572_v44  ;;  %v3133_v20 = vand.u32 2147483648, %v3121_v59 }
 0xaf3   :  { %v3103_v6 = vmul.f32 %v3574_v28, %v3101_v31  ;;  %3577 = vtanh.f32 %v3077_v39  ;;  %vm3108_vm5 = vweird.f32 %v3574_v28  ;;  %vm3090_vm8 = vmor %vm3088_vm6, %vm3089_vm4  ;;  %vm3127_vm13 = vweird.f32 %v3121_v59 }
 0xaf4   :  { %v3085_v60 = vsub.f32 1.0, %v3084_v49  ;;  %vm3109_vm9 = vmor %vm3107_vm7, %vm3108_vm5  ;;  %v3131_v57 = vand.u32 2147483647, %v3121_v59  ;;  %v3134_v54 = vor.u32 1.1754944e-38, %v3133_v20 }
 0xaf5   :  { %v3104_v63 = vsub.f32 1.0, %v3103_v6 }
 0xaf6   :  { %v3086_v35 = vmul.f32 %v3572_v44, %v3085_v60  ;;  %vm3132_vm15 = vcmp.eq.f32.partialorder %v3131_v57, 8.507059e+37 }
 0xaf7   :  { %v3105_v27 = vmul.f32 %v3574_v28, %v3104_v63 }
 0xaf8   :  { %v3576_v15 = vpop.eup %3575  ;;  %v3087_v38 = vadd.f32 %v3572_v44, %v3086_v35 }
 0xaf9   :  { %v3106_v9 = vadd.f32 %v3574_v28, %v3105_v27  ;;  %v3123_v61 = vmul.f32 %v3576_v15, %v3121_v59  ;;  %v3578_v11 = vpop.eup %3577  ;;  %vm3128_vm12 = vweird.f32 %v3576_v15 }
 0xafa   :  { %v3091_v41 = vsel %vm3090_vm8, %v3572_v44, %v3087_v38  ;;  %vm3129_vm14 = vmor %vm3127_vm13, %vm3128_vm12 }
 0xafb   :  { %v3096_v34 = vsel %vm3093_vm10, %v3095_v13, %v3091_v41  ;;  %v3110_v18 = vsel %vm3109_vm9, %v3574_v28, %v3106_v9  ;;  %v3124_v8 = vsub.f32 1.0, %v3123_v61 }
 0xafc   :  { %v3115_v45 = vsel %vm3112_vm11, %v3114_v29, %v3110_v18  ;;  %v3138_v48 = vmul.f32 %v3578_v11, %v3096_v34 }
 0xafd   :  { %v3137_v5 = vmul.f32 %v3115_v45, %v6857_v26  ;;  %v3125_v16 = vmul.f32 %v3576_v15, %v3124_v8 }
 0xaff   :  { %v3139_v56 = vadd.f32 %v3138_v48, %v3137_v5  ;;  %v3126_v51 = vadd.f32 %v3576_v15, %v3125_v16 }
 0xb01   :  { %3579 = vtanh.f32 %v3139_v56  ;;  %v3130_v17 = vsel %vm3129_vm14, %v3576_v15, %v3126_v51 }
 0xb02   :  { %v3135_v40 = vsel %vm3132_vm15, %v3134_v54, %v3130_v17 }
 0xb07   :  { %v3580_v14 = vpop.eup %3579 }
 0xb08   :  { %v3141_v10 = vmul.f32 %v3580_v14, %v3135_v40 }
 0xb0a   :  { %3142 = vst [vmem:[%s6876_s4] sm:$0xff] %v3141_v10 }

</bundles_post_ra>
